<compile_context>
chip_gen: v5e
topology: v5e:2x2
jax: 0.10.0
libtpu: 0.0.40
codegen_flags: <defaults>
</compile_context>

<pallas_src>
import functools

import jax
import jax.numpy as jnp
from jax.experimental import pallas as pl
from jax.experimental.pallas import tpu as pltpu


# ----------------------------- kernel ----------------------------------------


def _layernorm(x, w, b, eps=1e-5):
    mu = jnp.mean(x, axis=-1, keepdims=True)
    xc = x - mu
    var = jnp.mean(xc * xc, axis=-1, keepdims=True)
    inv = jax.lax.rsqrt(var + eps)
    return xc * inv * w + b


def encoder_stack_kernel(n_heads,
                         x_ref, bias_ref,
                         wqkv_ref, bqkv_ref, wo_ref, bo_ref,
                         ln_w_ref, ln_b_ref,
                         w1_ref, b1_ref, w2_ref, b2_ref, w3_ref, b3_ref,
                         hw1_ref, hb1_ref, hw2_ref, hb2_ref,
                         out_ref, x_scr):
    layer = pl.program_id(1)
    last_layer = pl.num_programs(1) - 1

    # Layer 0: load this batch tile's embeddings into the VMEM-resident carrier.
    @pl.when(layer == 0)
    def _():
        x_scr[...] = x_ref[...]

    x3 = x_scr[...]                          # (Bt, S, E)
    Bt, S, E = x3.shape
    H = n_heads
    Dh = E // H
    M = Bt * S
    scale = 1.0 / (Dh ** 0.5)

    x2 = x3.reshape(M, E)                    # flattened (M, E) view for big matmuls

    # --- fused QKV projection: ONE lane-dense (M,E) x (E,3E) matmul ----------
    qkv = jnp.dot(x2, wqkv_ref[0], preferred_element_type=jnp.float32) + bqkv_ref[0]

    bias = bias_ref[...]                     # (Bt, 1, S) additive key-padding bias

    # --- per-head score / softmax / context (small SxS stage only) -----------
    # Heads come from static lane slices of the fused projection; no operand
    # replication, no 4-D transposes.
    ctx_parts = []
    for h in range(H):
        q_h = qkv[:, h * Dh:(h + 1) * Dh].reshape(Bt, S, Dh) * scale
        k_h = qkv[:, E + h * Dh:E + (h + 1) * Dh].reshape(Bt, S, Dh)
        v_h = qkv[:, 2 * E + h * Dh:2 * E + (h + 1) * Dh].reshape(Bt, S, Dh)

        s = jnp.einsum('bqd,bkd->bqk', q_h, k_h,
                       preferred_element_type=jnp.float32) + bias
        s = s - jnp.max(s, axis=-1, keepdims=True)
        p = jnp.exp(s)
        # approx reciprocal runs on the EUP slot; use approx=False for
        # bit-closeness to the PyTorch reference.
        p = p * pl.reciprocal(jnp.sum(p, axis=-1, keepdims=True), approx=True)

        ctx_h = jnp.einsum('bqk,bkd->bqd', p, v_h,
                           preferred_element_type=jnp.float32)   # (Bt, S, Dh)
        ctx_parts.append(ctx_h.reshape(M, Dh))

    ctx = jnp.concatenate(ctx_parts, axis=-1)                    # (M, E)

    # --- out-projection: single (M,E) x (E,E) matmul (K = full E) ------------
    attn = jnp.dot(ctx, wo_ref[0], preferred_element_type=jnp.float32) + bo_ref[0]

    ln_w = ln_w_ref[0]
    ln_b = ln_b_ref[0]

    # dropout(attention) + x, then LayerNorm (dropout = identity in eval)
    x1 = _layernorm(attn + x2, ln_w, ln_b)

    # feedforward: Linear -> ReLU -> Linear -> ReLU -> Linear (dropouts = id)
    h1 = jnp.maximum(
        jnp.dot(x1, w1_ref[0], preferred_element_type=jnp.float32) + b1_ref[0], 0.0)
    h2 = jnp.maximum(
        jnp.dot(h1, w2_ref[0], preferred_element_type=jnp.float32) + b2_ref[0], 0.0)
    ff = jnp.dot(h2, w3_ref[0], preferred_element_type=jnp.float32) + b3_ref[0]

    # norm(out + x) -- same LayerNorm parameters reused (as in the PyTorch code)
    y3 = _layernorm(ff + x1, ln_w, ln_b).reshape(Bt, S, E)

    x_scr[...] = y3                          # carry to next layer (stays in VMEM)

    # --- fused classifier epilogue: mean-pool + MLP head, logits only --------
    @pl.when(layer == last_layer)
    def _():
        pooled = jnp.mean(y3, axis=1)        # (Bt, E) == x.mean(dim=1), incl. padding
        hh = jnp.maximum(
            jnp.dot(pooled, hw1_ref[...], preferred_element_type=jnp.float32)
            + hb1_ref[...], 0.0)
        out_ref[...] = (jnp.dot(hh, hw2_ref[...], preferred_element_type=jnp.float32)
                        + hb2_ref[...])


# ----------------------------- wrapper ----------------------------------------


def _pick_bt(B, S, target_m=512):
    """Batch-tile size: divides B, is a multiple of 8 (or == B) for the output
    block constraint, prefers >=2 tiles (v7x has 2 TensorCores), and caps
    M = bt*S around target_m to bound VMEM for the score stage."""
    cands = [d for d in range(1, B + 1) if B % d == 0 and (d % 8 == 0 or d == B)]
    cap = max(1, target_m // max(S, 1))
    multi = [d for d in cands if (B // d) >= 2 and d <= cap]
    if multi:
        return max(multi)
    under = [d for d in cands if d <= cap]
    if under:
        return max(under)
    return min(cands)


def run_transformer(x, mask_bias, stack, head, n_heads, *, bt=None):
    B, S, E = x.shape
    L = stack['wqkv'].shape[0]
    C = head['w2'].shape[1]
    if bt is None:
        bt = _pick_bt(B, S)
    assert B % bt == 0
    nb = B // bt

    layer_names = ['wqkv', 'bqkv', 'wo', 'bo', 'ln_w', 'ln_b',
                   'w1', 'b1', 'w2', 'b2', 'w3', 'b3']
    ws = [stack[k] for k in layer_names]
    head_ws = [head['w1'], head['b1'], head['w2'], head['b2']]

    def w_spec(a):                           # stream layer l's slice of (L, ...)
        nd = a.ndim
        return pl.BlockSpec((1,) + a.shape[1:],
                            lambda bi, l, _nd=nd: (l,) + (0,) * (_nd - 1))

    def full_spec(a):                        # whole (small) array, constant index
        nd = a.ndim
        return pl.BlockSpec(a.shape, lambda bi, l, _nd=nd: (0,) * _nd)

    in_specs = ([pl.BlockSpec((bt, S, E), lambda bi, l: (bi, 0, 0)),   # embeddings
                 pl.BlockSpec((bt, 1, S), lambda bi, l: (bi, 0, 0))]   # key-pad bias
                + [w_spec(w) for w in ws]
                + [full_spec(w) for w in head_ws])

    return pl.pallas_call(
        functools.partial(encoder_stack_kernel, n_heads),
        out_shape=jax.ShapeDtypeStruct((B, C), jnp.float32),
        grid=(nb, L),
        in_specs=in_specs,
        out_specs=pl.BlockSpec((bt, C), lambda bi, l: (bi, 0)),
        scratch_shapes=[pltpu.VMEM((bt, S, E), jnp.float32)],
        compiler_params=pltpu.CompilerParams(
            dimension_semantics=("parallel", "arbitrary"),
            vmem_limit_bytes=40 * 1024 * 1024),
    )(x, mask_bias, *ws, *head_ws)


def transformer_forward(token_ids, mask, params):
    # Embedding lookup (padding_idx=0 row is zeros) -- glue outside the kernel.
    x = jnp.take(params['embedding'], token_ids, axis=0).astype(jnp.float32)   # (B,S,E)
    mask_bias = (1.0 - mask.astype(jnp.float32))[:, None, :] * (-1e9)          # (B,1,S)
    return run_transformer(x, mask_bias, params['stack'], params['head'],
                           params['n_heads'])


# ----------------------------- param init -------------------------------------


def init_params(key, vocab_size, E, n_heads, Hd, C, num_blocks):
    assert E % n_heads == 0

    def lin(k, fan_in, fan_out):
        kw, kb = jax.random.split(k)
        w = jax.random.normal(kw, (fan_in, fan_out), jnp.float32) * (1.0 / jnp.sqrt(fan_in))
        b = jax.random.normal(kb, (fan_out,), jnp.float32) * 0.01
        return w, b

    keys = jax.random.split(key, 2 + num_blocks)
    emb = jax.random.normal(keys[0], (vocab_size, E), jnp.float32) * 0.05
    emb = emb.at[0].set(0.0)                 # padding_idx=0

    names = ['wqkv', 'bqkv', 'wo', 'bo', 'ln_w', 'ln_b',
             'w1', 'b1', 'w2', 'b2', 'w3', 'b3']
    per_layer = {k: [] for k in names}
    for i in range(num_blocks):
        bkeys = jax.random.split(keys[1 + i], 5)
        w_in, b_in = lin(bkeys[0], E, 3 * E)     # packed in_proj (q,k,v), stored (in,out)
        w_o, b_o = lin(bkeys[1], E, E)           # out_proj, stored (in,out)
        w1, b1 = lin(bkeys[2], E, Hd)
        w2, b2 = lin(bkeys[3], Hd, Hd)
        w3, b3 = lin(bkeys[4], Hd, E)

        per_layer['wqkv'].append(w_in)
        per_layer['bqkv'].append(b_in.reshape(1, 3 * E))
        per_layer['wo'].append(w_o)
        per_layer['bo'].append(b_o.reshape(1, E))
        per_layer['ln_w'].append(jnp.ones((1, E), jnp.float32))
        per_layer['ln_b'].append(jnp.zeros((1, E), jnp.float32))
        per_layer['w1'].append(w1); per_layer['b1'].append(b1.reshape(1, Hd))
        per_layer['w2'].append(w2); per_layer['b2'].append(b2.reshape(1, Hd))
        per_layer['w3'].append(w3); per_layer['b3'].append(b3.reshape(1, E))

    stack = {k: jnp.stack(v, axis=0) for k, v in per_layer.items()}

    hk = jax.random.split(keys[-1], 2)
    hw1, hb1 = lin(hk[0], E, Hd)
    hw2, hb2 = lin(hk[1], Hd, C)
    head = dict(w1=hw1, b1=hb1.reshape(1, Hd), w2=hw2, b2=hb2.reshape(1, C))

    return dict(embedding=emb, stack=stack, head=head, n_heads=n_heads)


# ----------------------------- main --------------------------------------------


if __name__ == "__main__":
    # Lane-dense small config: E and hidden multiples of 128, S multiple of 8.
    VOCAB, E, N_HEADS, HIDDEN, CLASSES, BLOCKS = 50, 128, 4, 128, 2, 2
    B, S = 16, 8          # bt=8 -> nb=2 batch tiles (both v7x TCs get work)

    key = jax.random.PRNGKey(0)
    kp, kt = jax.random.split(key)
    params = init_params(kp, VOCAB, E, N_HEADS, HIDDEN, CLASSES, BLOCKS)

    token_ids = jax.random.randint(kt, (B, S), 1, VOCAB, dtype=jnp.int32)
    mask = jnp.ones((B, S), dtype=jnp.int32)
    mask = mask.at[1, 5:].set(0)                     # pad tail of second sequence
    token_ids = jnp.where(mask == 1, token_ids, 0)   # padded positions -> id 0

    out = transformer_forward(token_ids, mask, params)
    out = jax.block_until_ready(out)
    assert out.shape == (B, CLASSES) and out.dtype == jnp.float32
    print("KERNEL_OK")
</pallas_src>

<mosaic_0001>
module attributes {stable_mosaic.version = 11 : i64} {
  func.func @encoder_stack_kernel(%arg0: i32, %arg1: i32, %arg2: memref<8x8x128xf32, #tpu.memory_space<vmem>>, %arg3: memref<8x1x8xf32, #tpu.memory_space<vmem>>, %arg4: memref<1x128x384xf32, #tpu.memory_space<vmem>>, %arg5: memref<1x1x384xf32, #tpu.memory_space<vmem>>, %arg6: memref<1x128x128xf32, #tpu.memory_space<vmem>>, %arg7: memref<1x1x128xf32, #tpu.memory_space<vmem>>, %arg8: memref<1x1x128xf32, #tpu.memory_space<vmem>>, %arg9: memref<1x1x128xf32, #tpu.memory_space<vmem>>, %arg10: memref<1x128x128xf32, #tpu.memory_space<vmem>>, %arg11: memref<1x1x128xf32, #tpu.memory_space<vmem>>, %arg12: memref<1x128x128xf32, #tpu.memory_space<vmem>>, %arg13: memref<1x1x128xf32, #tpu.memory_space<vmem>>, %arg14: memref<1x128x128xf32, #tpu.memory_space<vmem>>, %arg15: memref<1x1x128xf32, #tpu.memory_space<vmem>>, %arg16: memref<128x128xf32, #tpu.memory_space<vmem>>, %arg17: memref<1x128xf32, #tpu.memory_space<vmem>>, %arg18: memref<128x2xf32, #tpu.memory_space<vmem>>, %arg19: memref<1x2xf32, #tpu.memory_space<vmem>>, %arg20: memref<8x2xf32, #tpu.memory_space<vmem>>, %arg21: memref<8x8x128xf32, #tpu.memory_space<vmem>>) attributes {dimension_semantics = [#tpu.dimension_semantics<parallel>, #tpu.dimension_semantics<arbitrary>], iteration_bounds = array<i64: 2, 2>, scalar_prefetch = 0 : i64, scratch_operands = 1 : i64, tpu.core_type = #tpu.core_type<tc>, window_params = [{transform_indices = @transform_0, window_bounds = array<i64: 8, 8, 128>}, {transform_indices = @transform_1, window_bounds = array<i64: 8, 1, 8>}, {transform_indices = @transform_2, window_bounds = array<i64: 1, 128, 384>}, {transform_indices = @transform_3, window_bounds = array<i64: 1, 1, 384>}, {transform_indices = @transform_4, window_bounds = array<i64: 1, 128, 128>}, {transform_indices = @transform_5, window_bounds = array<i64: 1, 1, 128>}, {transform_indices = @transform_6, window_bounds = array<i64: 1, 1, 128>}, {transform_indices = @transform_7, window_bounds = array<i64: 1, 1, 128>}, {transform_indices = @transform_8, window_bounds = array<i64: 1, 128, 128>}, {transform_indices = @transform_9, window_bounds = array<i64: 1, 1, 128>}, {transform_indices = @transform_10, window_bounds = array<i64: 1, 128, 128>}, {transform_indices = @transform_11, window_bounds = array<i64: 1, 1, 128>}, {transform_indices = @transform_12, window_bounds = array<i64: 1, 128, 128>}, {transform_indices = @transform_13, window_bounds = array<i64: 1, 1, 128>}, {pipeline_mode = #tpu.pipeline_mode<synchronous>, transform_indices = @transform_14, window_bounds = array<i64: 128, 128>}, {pipeline_mode = #tpu.pipeline_mode<synchronous>, transform_indices = @transform_15, window_bounds = array<i64: 1, 128>}, {pipeline_mode = #tpu.pipeline_mode<synchronous>, transform_indices = @transform_16, window_bounds = array<i64: 128, 2>}, {pipeline_mode = #tpu.pipeline_mode<synchronous>, transform_indices = @transform_17, window_bounds = array<i64: 1, 2>}, {transform_indices = @transform_18, window_bounds = array<i64: 8, 2>}]} {
    %c0_i32 = arith.constant 0 : i32
    %0 = arith.cmpi eq, %arg1, %c0_i32 : i32
    %1 = arith.extui %0 : i1 to i32
    %c0_i32_0 = arith.constant 0 : i32
    %2 = arith.cmpi ne, %1, %c0_i32_0 : i32
    scf.if %2 {
      %c0_82 = arith.constant 0 : index
      %c0_83 = arith.constant 0 : index
      %c0_84 = arith.constant 0 : index
      %189 = vector.load %arg2[%c0_82, %c0_83, %c0_84] : memref<8x8x128xf32, #tpu.memory_space<vmem>>, vector<8x8x128xf32>
      %c0_85 = arith.constant 0 : index
      %c0_86 = arith.constant 0 : index
      %c0_87 = arith.constant 0 : index
      %190 = vector.load %arg21[%c0_85, %c0_86, %c0_87] : memref<8x8x128xf32, #tpu.memory_space<vmem>>, vector<8x8x128xf32>
      tpu.vector_store %arg21[%c0_85, %c0_86, %c0_87], %189 {strides = array<i32>} : memref<8x8x128xf32, #tpu.memory_space<vmem>>, vector<8x8x128xf32>,
    } else {
    }
    %c0 = arith.constant 0 : index
    %c0_1 = arith.constant 0 : index
    %c0_2 = arith.constant 0 : index
    %3 = vector.load %arg21[%c0, %c0_1, %c0_2] : memref<8x8x128xf32, #tpu.memory_space<vmem>>, vector<8x8x128xf32>
    %4 = vector.shape_cast %3 : vector<8x8x128xf32> to vector<64x128xf32>
    %c0_3 = arith.constant 0 : index
    %c0_4 = arith.constant 0 : index
    %c0_5 = arith.constant 0 : index
    %5 = vector.load %arg4[%c0_3, %c0_4, %c0_5] : memref<1x128x384xf32, #tpu.memory_space<vmem>>, vector<1x128x384xf32>
    %6 = vector.shape_cast %5 : vector<1x128x384xf32> to vector<128x384xf32>
    %cst = arith.constant dense<0.000000e+00> : vector<64x384xf32>
    %7 = tpu.matmul %4, %6, %cst {dimension_numbers = #tpu.dot_dimension_numbers<[1], [0], [0], [1], [0, 0, 1, 1], [], []>} : vector<64x128xf32>, vector<128x384xf32>, vector<64x384xf32> -> vector<64x384xf32>
    %c0_6 = arith.constant 0 : index
    %c0_7 = arith.constant 0 : index
    %c0_8 = arith.constant 0 : index
    %8 = vector.load %arg5[%c0_6, %c0_7, %c0_8] : memref<1x1x384xf32, #tpu.memory_space<vmem>>, vector<1x1x384xf32>
    %9 = vector.shape_cast %8 : vector<1x1x384xf32> to vector<1x384xf32>
    %10 = vector.broadcast %9 : vector<1x384xf32> to vector<64x384xf32>
    %11 = arith.addf %7, %10 : vector<64x384xf32>
    %c0_9 = arith.constant 0 : index
    %c0_10 = arith.constant 0 : index
    %c0_11 = arith.constant 0 : index
    %12 = vector.load %arg3[%c0_9, %c0_10, %c0_11] : memref<8x1x8xf32, #tpu.memory_space<vmem>>, vector<8x1x8xf32>
    %13 = vector.extract_strided_slice %11 {offsets = [0, 0], sizes = [64, 32], strides = [1, 1]} : vector<64x384xf32> to vector<64x32xf32>
    %14 = vector.shape_cast %13 : vector<64x32xf32> to vector<8x8x32xf32>
    %cst_12 = arith.constant 0.176776692 : f32
    %15 = vector.broadcast %cst_12 : f32 to vector<8x8x32xf32>
    %16 = arith.mulf %14, %15 : vector<8x8x32xf32>
    %17 = vector.extract_strided_slice %11 {offsets = [0, 128], sizes = [64, 32], strides = [1, 1]} : vector<64x384xf32> to vector<64x32xf32>
    %18 = vector.shape_cast %17 : vector<64x32xf32> to vector<8x8x32xf32>
    %19 = vector.extract_strided_slice %11 {offsets = [0, 256], sizes = [64, 32], strides = [1, 1]} : vector<64x384xf32> to vector<64x32xf32>
    %20 = vector.shape_cast %19 : vector<64x32xf32> to vector<8x8x32xf32>
    "tpu.trace_start"() <{level = 10 : i32, message = "bqd,bkd->bqk"}> : () -> ()
    %cst_13 = arith.constant dense<0.000000e+00> : vector<8x8x8xf32>
    %21 = tpu.matmul %16, %18, %cst_13 {dimension_numbers = #tpu.dot_dimension_numbers<[2], [2], [1], [1], [0, 0, 0, 1, 1, 1], [0], [0]>} : vector<8x8x32xf32>, vector<8x8x32xf32>, vector<8x8x8xf32> -> vector<8x8x8xf32>
    "tpu.trace_stop"() : () -> ()
    %22 = vector.broadcast %12 : vector<8x1x8xf32> to vector<8x8x8xf32>
    %23 = arith.addf %21, %22 : vector<8x8x8xf32>
    %cst_14 = arith.constant dense<0xFF800000> : vector<8x8xf32>
    %24 = vector.multi_reduction <maximumf>, %23, %cst_14 [2] : vector<8x8x8xf32> to vector<8x8xf32>
    %25 = vector.shape_cast %24 : vector<8x8xf32> to vector<8x8x1xf32>
    %26 = vector.broadcast %25 : vector<8x8x1xf32> to vector<8x8x8xf32>
    %27 = arith.subf %23, %26 : vector<8x8x8xf32>
    %28 = math.exp %27 : vector<8x8x8xf32>
    %cst_15 = arith.constant dense<0.000000e+00> : vector<8x8xf32>
    %29 = vector.multi_reduction <add>, %28, %cst_15 [2] : vector<8x8x8xf32> to vector<8x8xf32>
    %30 = vector.shape_cast %29 : vector<8x8xf32> to vector<8x8x1xf32>
    %31 = tpu.reciprocal %30 {approx = true} : vector<8x8x1xf32> -> vector<8x8x1xf32>
    %32 = vector.broadcast %31 : vector<8x8x1xf32> to vector<8x8x8xf32>
    %33 = arith.mulf %28, %32 : vector<8x8x8xf32>
    "tpu.trace_start"() <{level = 10 : i32, message = "bqk,bkd->bqd"}> : () -> ()
    %cst_16 = arith.constant dense<0.000000e+00> : vector<8x8x32xf32>
    %34 = tpu.matmul %33, %20, %cst_16 {dimension_numbers = #tpu.dot_dimension_numbers<[2], [1], [1], [2], [0, 0, 0, 1, 1, 2], [0], [0]>} : vector<8x8x8xf32>, vector<8x8x32xf32>, vector<8x8x32xf32> -> vector<8x8x32xf32>
    "tpu.trace_stop"() : () -> ()
    %35 = vector.shape_cast %34 : vector<8x8x32xf32> to vector<64x32xf32>
    %36 = vector.extract_strided_slice %11 {offsets = [0, 32], sizes = [64, 32], strides = [1, 1]} : vector<64x384xf32> to vector<64x32xf32>
    %37 = vector.shape_cast %36 : vector<64x32xf32> to vector<8x8x32xf32>
    %cst_17 = arith.constant 0.176776692 : f32
    %38 = vector.broadcast %cst_17 : f32 to vector<8x8x32xf32>
    %39 = arith.mulf %37, %38 : vector<8x8x32xf32>
    %40 = vector.extract_strided_slice %11 {offsets = [0, 160], sizes = [64, 32], strides = [1, 1]} : vector<64x384xf32> to vector<64x32xf32>
    %41 = vector.shape_cast %40 : vector<64x32xf32> to vector<8x8x32xf32>
    %42 = vector.extract_strided_slice %11 {offsets = [0, 288], sizes = [64, 32], strides = [1, 1]} : vector<64x384xf32> to vector<64x32xf32>
    %43 = vector.shape_cast %42 : vector<64x32xf32> to vector<8x8x32xf32>
    "tpu.trace_start"() <{level = 10 : i32, message = "bqd,bkd->bqk"}> : () -> ()
    %cst_18 = arith.constant dense<0.000000e+00> : vector<8x8x8xf32>
    %44 = tpu.matmul %39, %41, %cst_18 {dimension_numbers = #tpu.dot_dimension_numbers<[2], [2], [1], [1], [0, 0, 0, 1, 1, 1], [0], [0]>} : vector<8x8x32xf32>, vector<8x8x32xf32>, vector<8x8x8xf32> -> vector<8x8x8xf32>
    "tpu.trace_stop"() : () -> ()
    %45 = vector.broadcast %12 : vector<8x1x8xf32> to vector<8x8x8xf32>
    %46 = arith.addf %44, %45 : vector<8x8x8xf32>
    %cst_19 = arith.constant dense<0xFF800000> : vector<8x8xf32>
    %47 = vector.multi_reduction <maximumf>, %46, %cst_19 [2] : vector<8x8x8xf32> to vector<8x8xf32>
    %48 = vector.shape_cast %47 : vector<8x8xf32> to vector<8x8x1xf32>
    %49 = vector.broadcast %48 : vector<8x8x1xf32> to vector<8x8x8xf32>
    %50 = arith.subf %46, %49 : vector<8x8x8xf32>
    %51 = math.exp %50 : vector<8x8x8xf32>
    %cst_20 = arith.constant dense<0.000000e+00> : vector<8x8xf32>
    %52 = vector.multi_reduction <add>, %51, %cst_20 [2] : vector<8x8x8xf32> to vector<8x8xf32>
    %53 = vector.shape_cast %52 : vector<8x8xf32> to vector<8x8x1xf32>
    %54 = tpu.reciprocal %53 {approx = true} : vector<8x8x1xf32> -> vector<8x8x1xf32>
    %55 = vector.broadcast %54 : vector<8x8x1xf32> to vector<8x8x8xf32>
    %56 = arith.mulf %51, %55 : vector<8x8x8xf32>
    "tpu.trace_start"() <{level = 10 : i32, message = "bqk,bkd->bqd"}> : () -> ()
    %cst_21 = arith.constant dense<0.000000e+00> : vector<8x8x32xf32>
    %57 = tpu.matmul %56, %43, %cst_21 {dimension_numbers = #tpu.dot_dimension_numbers<[2], [1], [1], [2], [0, 0, 0, 1, 1, 2], [0], [0]>} : vector<8x8x8xf32>, vector<8x8x32xf32>, vector<8x8x32xf32> -> vector<8x8x32xf32>
    "tpu.trace_stop"() : () -> ()
    %58 = vector.shape_cast %57 : vector<8x8x32xf32> to vector<64x32xf32>
    %59 = vector.extract_strided_slice %11 {offsets = [0, 64], sizes = [64, 32], strides = [1, 1]} : vector<64x384xf32> to vector<64x32xf32>
    %60 = vector.shape_cast %59 : vector<64x32xf32> to vector<8x8x32xf32>
    %cst_22 = arith.constant 0.176776692 : f32
    %61 = vector.broadcast %cst_22 : f32 to vector<8x8x32xf32>
    %62 = arith.mulf %60, %61 : vector<8x8x32xf32>
    %63 = vector.extract_strided_slice %11 {offsets = [0, 192], sizes = [64, 32], strides = [1, 1]} : vector<64x384xf32> to vector<64x32xf32>
    %64 = vector.shape_cast %63 : vector<64x32xf32> to vector<8x8x32xf32>
    %65 = vector.extract_strided_slice %11 {offsets = [0, 320], sizes = [64, 32], strides = [1, 1]} : vector<64x384xf32> to vector<64x32xf32>
    %66 = vector.shape_cast %65 : vector<64x32xf32> to vector<8x8x32xf32>
    "tpu.trace_start"() <{level = 10 : i32, message = "bqd,bkd->bqk"}> : () -> ()
    %cst_23 = arith.constant dense<0.000000e+00> : vector<8x8x8xf32>
    %67 = tpu.matmul %62, %64, %cst_23 {dimension_numbers = #tpu.dot_dimension_numbers<[2], [2], [1], [1], [0, 0, 0, 1, 1, 1], [0], [0]>} : vector<8x8x32xf32>, vector<8x8x32xf32>, vector<8x8x8xf32> -> vector<8x8x8xf32>
    "tpu.trace_stop"() : () -> ()
    %68 = vector.broadcast %12 : vector<8x1x8xf32> to vector<8x8x8xf32>
    %69 = arith.addf %67, %68 : vector<8x8x8xf32>
    %cst_24 = arith.constant dense<0xFF800000> : vector<8x8xf32>
    %70 = vector.multi_reduction <maximumf>, %69, %cst_24 [2] : vector<8x8x8xf32> to vector<8x8xf32>
    %71 = vector.shape_cast %70 : vector<8x8xf32> to vector<8x8x1xf32>
    %72 = vector.broadcast %71 : vector<8x8x1xf32> to vector<8x8x8xf32>
    %73 = arith.subf %69, %72 : vector<8x8x8xf32>
    %74 = math.exp %73 : vector<8x8x8xf32>
    %cst_25 = arith.constant dense<0.000000e+00> : vector<8x8xf32>
    %75 = vector.multi_reduction <add>, %74, %cst_25 [2] : vector<8x8x8xf32> to vector<8x8xf32>
    %76 = vector.shape_cast %75 : vector<8x8xf32> to vector<8x8x1xf32>
    %77 = tpu.reciprocal %76 {approx = true} : vector<8x8x1xf32> -> vector<8x8x1xf32>
    %78 = vector.broadcast %77 : vector<8x8x1xf32> to vector<8x8x8xf32>
    %79 = arith.mulf %74, %78 : vector<8x8x8xf32>
    "tpu.trace_start"() <{level = 10 : i32, message = "bqk,bkd->bqd"}> : () -> ()
    %cst_26 = arith.constant dense<0.000000e+00> : vector<8x8x32xf32>
    %80 = tpu.matmul %79, %66, %cst_26 {dimension_numbers = #tpu.dot_dimension_numbers<[2], [1], [1], [2], [0, 0, 0, 1, 1, 2], [0], [0]>} : vector<8x8x8xf32>, vector<8x8x32xf32>, vector<8x8x32xf32> -> vector<8x8x32xf32>
    "tpu.trace_stop"() : () -> ()
    %81 = vector.shape_cast %80 : vector<8x8x32xf32> to vector<64x32xf32>
    %82 = vector.extract_strided_slice %11 {offsets = [0, 96], sizes = [64, 32], strides = [1, 1]} : vector<64x384xf32> to vector<64x32xf32>
    %83 = vector.shape_cast %82 : vector<64x32xf32> to vector<8x8x32xf32>
    %cst_27 = arith.constant 0.176776692 : f32
    %84 = vector.broadcast %cst_27 : f32 to vector<8x8x32xf32>
    %85 = arith.mulf %83, %84 : vector<8x8x32xf32>
    %86 = vector.extract_strided_slice %11 {offsets = [0, 224], sizes = [64, 32], strides = [1, 1]} : vector<64x384xf32> to vector<64x32xf32>
    %87 = vector.shape_cast %86 : vector<64x32xf32> to vector<8x8x32xf32>
    %88 = vector.extract_strided_slice %11 {offsets = [0, 352], sizes = [64, 32], strides = [1, 1]} : vector<64x384xf32> to vector<64x32xf32>
    %89 = vector.shape_cast %88 : vector<64x32xf32> to vector<8x8x32xf32>
    "tpu.trace_start"() <{level = 10 : i32, message = "bqd,bkd->bqk"}> : () -> ()
    %cst_28 = arith.constant dense<0.000000e+00> : vector<8x8x8xf32>
    %90 = tpu.matmul %85, %87, %cst_28 {dimension_numbers = #tpu.dot_dimension_numbers<[2], [2], [1], [1], [0, 0, 0, 1, 1, 1], [0], [0]>} : vector<8x8x32xf32>, vector<8x8x32xf32>, vector<8x8x8xf32> -> vector<8x8x8xf32>
    "tpu.trace_stop"() : () -> ()
    %91 = vector.broadcast %12 : vector<8x1x8xf32> to vector<8x8x8xf32>
    %92 = arith.addf %90, %91 : vector<8x8x8xf32>
    %cst_29 = arith.constant dense<0xFF800000> : vector<8x8xf32>
    %93 = vector.multi_reduction <maximumf>, %92, %cst_29 [2] : vector<8x8x8xf32> to vector<8x8xf32>
    %94 = vector.shape_cast %93 : vector<8x8xf32> to vector<8x8x1xf32>
    %95 = vector.broadcast %94 : vector<8x8x1xf32> to vector<8x8x8xf32>
    %96 = arith.subf %92, %95 : vector<8x8x8xf32>
    %97 = math.exp %96 : vector<8x8x8xf32>
    %cst_30 = arith.constant dense<0.000000e+00> : vector<8x8xf32>
    %98 = vector.multi_reduction <add>, %97, %cst_30 [2] : vector<8x8x8xf32> to vector<8x8xf32>
    %99 = vector.shape_cast %98 : vector<8x8xf32> to vector<8x8x1xf32>
    %100 = tpu.reciprocal %99 {approx = true} : vector<8x8x1xf32> -> vector<8x8x1xf32>
    %101 = vector.broadcast %100 : vector<8x8x1xf32> to vector<8x8x8xf32>
    %102 = arith.mulf %97, %101 : vector<8x8x8xf32>
    "tpu.trace_start"() <{level = 10 : i32, message = "bqk,bkd->bqd"}> : () -> ()
    %cst_31 = arith.constant dense<0.000000e+00> : vector<8x8x32xf32>
    %103 = tpu.matmul %102, %89, %cst_31 {dimension_numbers = #tpu.dot_dimension_numbers<[2], [1], [1], [2], [0, 0, 0, 1, 1, 2], [0], [0]>} : vector<8x8x8xf32>, vector<8x8x32xf32>, vector<8x8x32xf32> -> vector<8x8x32xf32>
    "tpu.trace_stop"() : () -> ()
    %104 = vector.shape_cast %103 : vector<8x8x32xf32> to vector<64x32xf32>
    %105 = tpu.concatenate %35, %58, %81, %104 in 1 : vector<64x32xf32>, vector<64x32xf32>, vector<64x32xf32>, vector<64x32xf32> -> vector<64x128xf32>
    %c0_32 = arith.constant 0 : index
    %c0_33 = arith.constant 0 : index
    %c0_34 = arith.constant 0 : index
    %106 = vector.load %arg6[%c0_32, %c0_33, %c0_34] : memref<1x128x128xf32, #tpu.memory_space<vmem>>, vector<1x128x128xf32>
    %107 = vector.shape_cast %106 : vector<1x128x128xf32> to vector<128x128xf32>
    %cst_35 = arith.constant dense<0.000000e+00> : vector<64x128xf32>
    %108 = tpu.matmul %105, %107, %cst_35 {dimension_numbers = #tpu.dot_dimension_numbers<[1], [0], [0], [1], [0, 0, 1, 1], [], []>} : vector<64x128xf32>, vector<128x128xf32>, vector<64x128xf32> -> vector<64x128xf32>
    %c0_36 = arith.constant 0 : index
    %c0_37 = arith.constant 0 : index
    %c0_38 = arith.constant 0 : index
    %109 = vector.load %arg7[%c0_36, %c0_37, %c0_38] : memref<1x1x128xf32, #tpu.memory_space<vmem>>, vector<1x1x128xf32>
    %110 = vector.shape_cast %109 : vector<1x1x128xf32> to vector<1x128xf32>
    %111 = vector.broadcast %110 : vector<1x128xf32> to vector<64x128xf32>
    %112 = arith.addf %108, %111 : vector<64x128xf32>
    %c0_39 = arith.constant 0 : index
    %c0_40 = arith.constant 0 : index
    %c0_41 = arith.constant 0 : index
    %113 = vector.load %arg8[%c0_39, %c0_40, %c0_41] : memref<1x1x128xf32, #tpu.memory_space<vmem>>, vector<1x1x128xf32>
    %114 = vector.shape_cast %113 : vector<1x1x128xf32> to vector<1x128xf32>
    %c0_42 = arith.constant 0 : index
    %c0_43 = arith.constant 0 : index
    %c0_44 = arith.constant 0 : index
    %115 = vector.load %arg9[%c0_42, %c0_43, %c0_44] : memref<1x1x128xf32, #tpu.memory_space<vmem>>, vector<1x1x128xf32>
    %116 = vector.shape_cast %115 : vector<1x1x128xf32> to vector<1x128xf32>
    %117 = arith.addf %112, %4 : vector<64x128xf32>
    %cst_45 = arith.constant dense<0.000000e+00> : vector<64xf32>
    %118 = vector.multi_reduction <add>, %117, %cst_45 [1] : vector<64x128xf32> to vector<64xf32>
    %119 = vector.shape_cast %118 : vector<64xf32> to vector<64x1xf32>
    %cst_46 = arith.constant 1.280000e+02 : f32
    %120 = vector.broadcast %cst_46 : f32 to vector<64x1xf32>
    %121 = arith.divf %119, %120 : vector<64x1xf32>
    %122 = vector.broadcast %121 : vector<64x1xf32> to vector<64x128xf32>
    %123 = arith.subf %117, %122 : vector<64x128xf32>
    %124 = arith.mulf %123, %123 : vector<64x128xf32>
    %cst_47 = arith.constant dense<0.000000e+00> : vector<64xf32>
    %125 = vector.multi_reduction <add>, %124, %cst_47 [1] : vector<64x128xf32> to vector<64xf32>
    %126 = vector.shape_cast %125 : vector<64xf32> to vector<64x1xf32>
    %cst_48 = arith.constant 1.280000e+02 : f32
    %127 = vector.broadcast %cst_48 : f32 to vector<64x1xf32>
    %128 = arith.divf %126, %127 : vector<64x1xf32>
    %cst_49 = arith.constant 9.99999974E-6 : f32
    %129 = vector.broadcast %cst_49 : f32 to vector<64x1xf32>
    %130 = arith.addf %128, %129 : vector<64x1xf32>
    %131 = math.rsqrt %130 : vector<64x1xf32>
    %132 = vector.broadcast %131 : vector<64x1xf32> to vector<64x128xf32>
    %133 = arith.mulf %123, %132 : vector<64x128xf32>
    %134 = vector.broadcast %114 : vector<1x128xf32> to vector<64x128xf32>
    %135 = arith.mulf %133, %134 : vector<64x128xf32>
    %136 = vector.broadcast %116 : vector<1x128xf32> to vector<64x128xf32>
    %137 = arith.addf %135, %136 : vector<64x128xf32>
    %c0_50 = arith.constant 0 : index
    %c0_51 = arith.constant 0 : index
    %c0_52 = arith.constant 0 : index
    %138 = vector.load %arg10[%c0_50, %c0_51, %c0_52] : memref<1x128x128xf32, #tpu.memory_space<vmem>>, vector<1x128x128xf32>
    %139 = vector.shape_cast %138 : vector<1x128x128xf32> to vector<128x128xf32>
    %cst_53 = arith.constant dense<0.000000e+00> : vector<64x128xf32>
    %140 = tpu.matmul %137, %139, %cst_53 {dimension_numbers = #tpu.dot_dimension_numbers<[1], [0], [0], [1], [0, 0, 1, 1], [], []>} : vector<64x128xf32>, vector<128x128xf32>, vector<64x128xf32> -> vector<64x128xf32>
    %c0_54 = arith.constant 0 : index
    %c0_55 = arith.constant 0 : index
    %c0_56 = arith.constant 0 : index
    %141 = vector.load %arg11[%c0_54, %c0_55, %c0_56] : memref<1x1x128xf32, #tpu.memory_space<vmem>>, vector<1x1x128xf32>
    %142 = vector.shape_cast %141 : vector<1x1x128xf32> to vector<1x128xf32>
    %143 = vector.broadcast %142 : vector<1x128xf32> to vector<64x128xf32>
    %144 = arith.addf %140, %143 : vector<64x128xf32>
    %cst_57 = arith.constant 0.000000e+00 : f32
    %145 = vector.broadcast %cst_57 : f32 to vector<64x128xf32>
    %146 = arith.maximumf %144, %145 : vector<64x128xf32>
    %c0_58 = arith.constant 0 : index
    %c0_59 = arith.constant 0 : index
    %c0_60 = arith.constant 0 : index
    %147 = vector.load %arg12[%c0_58, %c0_59, %c0_60] : memref<1x128x128xf32, #tpu.memory_space<vmem>>, vector<1x128x128xf32>
    %148 = vector.shape_cast %147 : vector<1x128x128xf32> to vector<128x128xf32>
    %cst_61 = arith.constant dense<0.000000e+00> : vector<64x128xf32>
    %149 = tpu.matmul %146, %148, %cst_61 {dimension_numbers = #tpu.dot_dimension_numbers<[1], [0], [0], [1], [0, 0, 1, 1], [], []>} : vector<64x128xf32>, vector<128x128xf32>, vector<64x128xf32> -> vector<64x128xf32>
    %c0_62 = arith.constant 0 : index
    %c0_63 = arith.constant 0 : index
    %c0_64 = arith.constant 0 : index
    %150 = vector.load %arg13[%c0_62, %c0_63, %c0_64] : memref<1x1x128xf32, #tpu.memory_space<vmem>>, vector<1x1x128xf32>
    %151 = vector.shape_cast %150 : vector<1x1x128xf32> to vector<1x128xf32>
    %152 = vector.broadcast %151 : vector<1x128xf32> to vector<64x128xf32>
    %153 = arith.addf %149, %152 : vector<64x128xf32>
    %cst_65 = arith.constant 0.000000e+00 : f32
    %154 = vector.broadcast %cst_65 : f32 to vector<64x128xf32>
    %155 = arith.maximumf %153, %154 : vector<64x128xf32>
    %c0_66 = arith.constant 0 : index
    %c0_67 = arith.constant 0 : index
    %c0_68 = arith.constant 0 : index
    %156 = vector.load %arg14[%c0_66, %c0_67, %c0_68] : memref<1x128x128xf32, #tpu.memory_space<vmem>>, vector<1x128x128xf32>
    %157 = vector.shape_cast %156 : vector<1x128x128xf32> to vector<128x128xf32>
    %cst_69 = arith.constant dense<0.000000e+00> : vector<64x128xf32>
    %158 = tpu.matmul %155, %157, %cst_69 {dimension_numbers = #tpu.dot_dimension_numbers<[1], [0], [0], [1], [0, 0, 1, 1], [], []>} : vector<64x128xf32>, vector<128x128xf32>, vector<64x128xf32> -> vector<64x128xf32>
    %c0_70 = arith.constant 0 : index
    %c0_71 = arith.constant 0 : index
    %c0_72 = arith.constant 0 : index
    %159 = vector.load %arg15[%c0_70, %c0_71, %c0_72] : memref<1x1x128xf32, #tpu.memory_space<vmem>>, vector<1x1x128xf32>
    %160 = vector.shape_cast %159 : vector<1x1x128xf32> to vector<1x128xf32>
    %161 = vector.broadcast %160 : vector<1x128xf32> to vector<64x128xf32>
    %162 = arith.addf %158, %161 : vector<64x128xf32>
    %163 = arith.addf %162, %137 : vector<64x128xf32>
    %cst_73 = arith.constant dense<0.000000e+00> : vector<64xf32>
    %164 = vector.multi_reduction <add>, %163, %cst_73 [1] : vector<64x128xf32> to vector<64xf32>
    %165 = vector.shape_cast %164 : vector<64xf32> to vector<64x1xf32>
    %cst_74 = arith.constant 1.280000e+02 : f32
    %166 = vector.broadcast %cst_74 : f32 to vector<64x1xf32>
    %167 = arith.divf %165, %166 : vector<64x1xf32>
    %168 = vector.broadcast %167 : vector<64x1xf32> to vector<64x128xf32>
    %169 = arith.subf %163, %168 : vector<64x128xf32>
    %170 = arith.mulf %169, %169 : vector<64x128xf32>
    %cst_75 = arith.constant dense<0.000000e+00> : vector<64xf32>
    %171 = vector.multi_reduction <add>, %170, %cst_75 [1] : vector<64x128xf32> to vector<64xf32>
    %172 = vector.shape_cast %171 : vector<64xf32> to vector<64x1xf32>
    %cst_76 = arith.constant 1.280000e+02 : f32
    %173 = vector.broadcast %cst_76 : f32 to vector<64x1xf32>
    %174 = arith.divf %172, %173 : vector<64x1xf32>
    %cst_77 = arith.constant 9.99999974E-6 : f32
    %175 = vector.broadcast %cst_77 : f32 to vector<64x1xf32>
    %176 = arith.addf %174, %175 : vector<64x1xf32>
    %177 = math.rsqrt %176 : vector<64x1xf32>
    %178 = vector.broadcast %177 : vector<64x1xf32> to vector<64x128xf32>
    %179 = arith.mulf %169, %178 : vector<64x128xf32>
    %180 = vector.broadcast %114 : vector<1x128xf32> to vector<64x128xf32>
    %181 = arith.mulf %179, %180 : vector<64x128xf32>
    %182 = vector.broadcast %116 : vector<1x128xf32> to vector<64x128xf32>
    %183 = arith.addf %181, %182 : vector<64x128xf32>
    %184 = vector.shape_cast %183 : vector<64x128xf32> to vector<8x8x128xf32>
    %c0_78 = arith.constant 0 : index
    %c0_79 = arith.constant 0 : index
    %c0_80 = arith.constant 0 : index
    %185 = vector.load %arg21[%c0_78, %c0_79, %c0_80] : memref<8x8x128xf32, #tpu.memory_space<vmem>>, vector<8x8x128xf32>
    tpu.vector_store %arg21[%c0_78, %c0_79, %c0_80], %184 {strides = array<i32>} : memref<8x8x128xf32, #tpu.memory_space<vmem>>, vector<8x8x128xf32>,
    %c1_i32 = arith.constant 1 : i32
    %186 = arith.cmpi eq, %arg1, %c1_i32 : i32
    %187 = arith.extui %186 : i1 to i32
    %c0_i32_81 = arith.constant 0 : i32
    %188 = arith.cmpi ne, %187, %c0_i32_81 : i32
    scf.if %188 {
      %cst_82 = arith.constant dense<0.000000e+00> : vector<8x128xf32>
      %189 = vector.multi_reduction <add>, %184, %cst_82 [1] : vector<8x8x128xf32> to vector<8x128xf32>
      %cst_83 = arith.constant 8.000000e+00 : f32
      %190 = vector.broadcast %cst_83 : f32 to vector<8x128xf32>
      %191 = arith.divf %189, %190 : vector<8x128xf32>
      %c0_84 = arith.constant 0 : index
      %c0_85 = arith.constant 0 : index
      %192 = vector.load %arg16[%c0_84, %c0_85] : memref<128x128xf32, #tpu.memory_space<vmem>>, vector<128x128xf32>
      %cst_86 = arith.constant dense<0.000000e+00> : vector<8x128xf32>
      %193 = tpu.matmul %191, %192, %cst_86 {dimension_numbers = #tpu.dot_dimension_numbers<[1], [0], [0], [1], [0, 0, 1, 1], [], []>} : vector<8x128xf32>, vector<128x128xf32>, vector<8x128xf32> -> vector<8x128xf32>
      %c0_87 = arith.constant 0 : index
      %c0_88 = arith.constant 0 : index
      %194 = vector.load %arg17[%c0_87, %c0_88] : memref<1x128xf32, #tpu.memory_space<vmem>>, vector<1x128xf32>
      %195 = vector.broadcast %194 : vector<1x128xf32> to vector<8x128xf32>
      %196 = arith.addf %193, %195 : vector<8x128xf32>
      %cst_89 = arith.constant 0.000000e+00 : f32
      %197 = vector.broadcast %cst_89 : f32 to vector<8x128xf32>
      %198 = arith.maximumf %196, %197 : vector<8x128xf32>
      %c0_90 = arith.constant 0 : index
      %c0_91 = arith.constant 0 : index
      %199 = vector.load %arg18[%c0_90, %c0_91] : memref<128x2xf32, #tpu.memory_space<vmem>>, vector<128x2xf32>
      %cst_92 = arith.constant dense<0.000000e+00> : vector<8x2xf32>
      %200 = tpu.matmul %198, %199, %cst_92 {dimension_numbers = #tpu.dot_dimension_numbers<[1], [0], [0], [1], [0, 0, 1, 1], [], []>} : vector<8x128xf32>, vector<128x2xf32>, vector<8x2xf32> -> vector<8x2xf32>
      %c0_93 = arith.constant 0 : index
      %c0_94 = arith.constant 0 : index
      %201 = vector.load %arg19[%c0_93, %c0_94] : memref<1x2xf32, #tpu.memory_space<vmem>>, vector<1x2xf32>
      %202 = vector.broadcast %201 : vector<1x2xf32> to vector<8x2xf32>
      %203 = arith.addf %200, %202 : vector<8x2xf32>
      %c0_95 = arith.constant 0 : index
      %c0_96 = arith.constant 0 : index
      %204 = vector.load %arg20[%c0_95, %c0_96] : memref<8x2xf32, #tpu.memory_space<vmem>>, vector<8x2xf32>
      tpu.vector_store %arg20[%c0_95, %c0_96], %203 {strides = array<i32>} : memref<8x2xf32, #tpu.memory_space<vmem>>, vector<8x2xf32>,
    } else {
    }
    return
  }
  func.func @transform_0(%arg0: i32, %arg1: i32) -> (i32, i32, i32) {
    %c0_i32 = arith.constant 0 : i32
    %c0_i32_0 = arith.constant 0 : i32
    %c0_i32_1 = arith.constant 0 : i32
    return %arg0, %c0_i32, %c0_i32_0 : i32, i32, i32
  }
  func.func @transform_1(%arg0: i32, %arg1: i32) -> (i32, i32, i32) {
    %c0_i32 = arith.constant 0 : i32
    %c0_i32_0 = arith.constant 0 : i32
    %c0_i32_1 = arith.constant 0 : i32
    return %arg0, %c0_i32, %c0_i32_0 : i32, i32, i32
  }
  func.func @transform_2(%arg0: i32, %arg1: i32) -> (i32, i32, i32) {
    %c0_i32 = arith.constant 0 : i32
    %c0_i32_0 = arith.constant 0 : i32
    %c0_i32_1 = arith.constant 0 : i32
    return %arg1, %c0_i32, %c0_i32_0 : i32, i32, i32
  }
  func.func @transform_3(%arg0: i32, %arg1: i32) -> (i32, i32, i32) {
    %c0_i32 = arith.constant 0 : i32
    %c0_i32_0 = arith.constant 0 : i32
    %c0_i32_1 = arith.constant 0 : i32
    return %arg1, %c0_i32, %c0_i32_0 : i32, i32, i32
  }
  func.func @transform_4(%arg0: i32, %arg1: i32) -> (i32, i32, i32) {
    %c0_i32 = arith.constant 0 : i32
    %c0_i32_0 = arith.constant 0 : i32
    %c0_i32_1 = arith.constant 0 : i32
    return %arg1, %c0_i32, %c0_i32_0 : i32, i32, i32
  }
  func.func @transform_5(%arg0: i32, %arg1: i32) -> (i32, i32, i32) {
    %c0_i32 = arith.constant 0 : i32
    %c0_i32_0 = arith.constant 0 : i32
    %c0_i32_1 = arith.constant 0 : i32
    return %arg1, %c0_i32, %c0_i32_0 : i32, i32, i32
  }
  func.func @transform_6(%arg0: i32, %arg1: i32) -> (i32, i32, i32) {
    %c0_i32 = arith.constant 0 : i32
    %c0_i32_0 = arith.constant 0 : i32
    %c0_i32_1 = arith.constant 0 : i32
    return %arg1, %c0_i32, %c0_i32_0 : i32, i32, i32
  }
  func.func @transform_7(%arg0: i32, %arg1: i32) -> (i32, i32, i32) {
    %c0_i32 = arith.constant 0 : i32
    %c0_i32_0 = arith.constant 0 : i32
    %c0_i32_1 = arith.constant 0 : i32
    return %arg1, %c0_i32, %c0_i32_0 : i32, i32, i32
  }
  func.func @transform_8(%arg0: i32, %arg1: i32) -> (i32, i32, i32) {
    %c0_i32 = arith.constant 0 : i32
    %c0_i32_0 = arith.constant 0 : i32
    %c0_i32_1 = arith.constant 0 : i32
    return %arg1, %c0_i32, %c0_i32_0 : i32, i32, i32
  }
  func.func @transform_9(%arg0: i32, %arg1: i32) -> (i32, i32, i32) {
    %c0_i32 = arith.constant 0 : i32
    %c0_i32_0 = arith.constant 0 : i32
    %c0_i32_1 = arith.constant 0 : i32
    return %arg1, %c0_i32, %c0_i32_0 : i32, i32, i32
  }
  func.func @transform_10(%arg0: i32, %arg1: i32) -> (i32, i32, i32) {
    %c0_i32 = arith.constant 0 : i32
    %c0_i32_0 = arith.constant 0 : i32
    %c0_i32_1 = arith.constant 0 : i32
    return %arg1, %c0_i32, %c0_i32_0 : i32, i32, i32
  }
  func.func @transform_11(%arg0: i32, %arg1: i32) -> (i32, i32, i32) {
    %c0_i32 = arith.constant 0 : i32
    %c0_i32_0 = arith.constant 0 : i32
    %c0_i32_1 = arith.constant 0 : i32
    return %arg1, %c0_i32, %c0_i32_0 : i32, i32, i32
  }
  func.func @transform_12(%arg0: i32, %arg1: i32) -> (i32, i32, i32) {
    %c0_i32 = arith.constant 0 : i32
    %c0_i32_0 = arith.constant 0 : i32
    %c0_i32_1 = arith.constant 0 : i32
    return %arg1, %c0_i32, %c0_i32_0 : i32, i32, i32
  }
  func.func @transform_13(%arg0: i32, %arg1: i32) -> (i32, i32, i32) {
    %c0_i32 = arith.constant 0 : i32
    %c0_i32_0 = arith.constant 0 : i32
    %c0_i32_1 = arith.constant 0 : i32
    return %arg1, %c0_i32, %c0_i32_0 : i32, i32, i32
  }
  func.func @transform_14(%arg0: i32, %arg1: i32) -> (i32, i32) {
    %c0_i32 = arith.constant 0 : i32
    %c0_i32_0 = arith.constant 0 : i32
    %c0_i32_1 = arith.constant 0 : i32
    return %c0_i32, %c0_i32_0 : i32, i32
  }
  func.func @transform_15(%arg0: i32, %arg1: i32) -> (i32, i32) {
    %c0_i32 = arith.constant 0 : i32
    %c0_i32_0 = arith.constant 0 : i32
    %c0_i32_1 = arith.constant 0 : i32
    return %c0_i32, %c0_i32_0 : i32, i32
  }
  func.func @transform_16(%arg0: i32, %arg1: i32) -> (i32, i32) {
    %c0_i32 = arith.constant 0 : i32
    %c0_i32_0 = arith.constant 0 : i32
    %c0_i32_1 = arith.constant 0 : i32
    return %c0_i32, %c0_i32_0 : i32, i32
  }
  func.func @transform_17(%arg0: i32, %arg1: i32) -> (i32, i32) {
    %c0_i32 = arith.constant 0 : i32
    %c0_i32_0 = arith.constant 0 : i32
    %c0_i32_1 = arith.constant 0 : i32
    return %c0_i32, %c0_i32_0 : i32, i32
  }
  func.func @transform_18(%arg0: i32, %arg1: i32) -> (i32, i32) {
    %c0_i32 = arith.constant 0 : i32
    %c0_i32_0 = arith.constant 0 : i32
    return %arg0, %c0_i32 : i32, i32
  }
}

</mosaic_0001>

<bundles_post_ra>
// kernel: tpu_custom_call.1
= control target key start
LH: loop header
LB: loop body
LE: loop exit
PB: predicated region body
PF: predicated region fallthrough
CT: control target
= control target key end

     0   :  { %s6751_s0 = inlined_call_operand.vmem [shape: f32[16,8,128], index: 0, kind: input, shape index: {}]   ;;  %s6752_s1 = inlined_call_operand.vmem [shape: f32[16,1,8], index: 1, kind: input, shape index: {}]   ;;  %s6753_s2 = inlined_call_operand.hbm [shape: f32[2,128,384], index: 2, kind: input, shape index: {}]   ;;  %s6754_s3 = inlined_call_operand.vmem [shape: f32[2,1,384], index: 3, kind: input, shape index: {}]   ;;  %s6755_s4 = inlined_call_operand.hbm [shape: f32[2,128,128], index: 4, kind: input, shape index: {}]   ;;  %s6756_s5 = inlined_call_operand.vmem [shape: f32[2,1,128], index: 5, kind: input, shape index: {}]   ;;  %s6757_s6 = inlined_call_operand.vmem [shape: f32[2,1,128], index: 6, kind: input, shape index: {}]   ;;  %s6758_s7 = inlined_call_operand.vmem [shape: f32[2,1,128], index: 7, kind: input, shape index: {}]   ;;  %s6759_s8 = inlined_call_operand.hbm [shape: f32[2,128,128], index: 8, kind: input, shape index: {}]   ;;  %s6760_s9 = inlined_call_operand.vmem [shape: f32[2,1,128], index: 9, kind: input, shape index: {}]   ;;  %s6761_s10 = inlined_call_operand.hbm [shape: f32[2,128,128], index: 10, kind: input, shape index: {}]   ;;  %s6762_s11 = inlined_call_operand.vmem [shape: f32[2,1,128], index: 11, kind: input, shape index: {}]   ;;  %s6763_s12 = inlined_call_operand.hbm [shape: f32[2,128,128], index: 12, kind: input, shape index: {}]   ;;  %s6764_s13 = inlined_call_operand.vmem [shape: f32[2,1,128], index: 13, kind: input, shape index: {}]   ;;  %s6765_s14 = inlined_call_operand.hbm [shape: f32[128,128], index: 14, kind: input, shape index: {}]   ;;  %s6766_s15 = inlined_call_operand.vmem [shape: f32[1,128], index: 15, kind: input, shape index: {}]   ;;  %s6767_s16 = inlined_call_operand.vmem [shape: f32[128,2], index: 16, kind: input, shape index: {}]   ;;  %s6768_s17 = inlined_call_operand.vmem [shape: f32[1,2], index: 17, kind: input, shape index: {}]   ;;  %s6769_s18 = inlined_call_operand.vmem [shape: f32[16,2], index: 18, kind: output, shape index: {}]  }
   0x1   :  { %6785 = sst [smem:[#allocation36_spill]] %s6751_s0 }
   0x2   :  { %6786 = sst [smem:[#allocation37_spill]] %s6752_s1 }
   0x3   :  { %6787 = sst [smem:[#allocation38_spill]] %s6753_s2 }
   0x4   :  { %6788 = sst [smem:[#allocation39_spill]] %s6754_s3 }
   0x5   :  { %6789 = sst [smem:[#allocation40_spill]] %s6755_s4 }
   0x6   :  { %6790 = sst [smem:[#allocation41_spill]] %s6756_s5 }
   0x7   :  { %6791 = sst [smem:[#allocation42_spill]] %s6757_s6 }
   0x8   :  { %6792 = sst [smem:[#allocation43_spill]] %s6758_s7 }
   0x9   :  { %6793 = sst [smem:[#allocation44_spill]] %s6759_s8 }
   0xa   :  { %6794 = sst [smem:[#allocation45_spill]] %s6760_s9 }
   0xb   :  { %6795 = sst [smem:[#allocation46_spill]] %s6761_s10 }
   0xc   :  { %6796 = sst [smem:[#allocation47_spill]] %s6762_s11 }
   0xd   :  { %6797 = sst [smem:[#allocation48_spill]] %s6763_s12 }
   0xe   :  { %6798 = sst [smem:[#allocation49_spill]] %s6764_s13 }
   0xf   :  { %6799 = sst [smem:[#allocation50_spill]] %s6765_s14 }
  0x10   :  { %6800 = sst [smem:[#allocation51_spill]] %s6766_s15 }
  0x11   :  { %6801 = sst [smem:[#allocation52_spill]] %s6767_s16 }
  0x12   :  { %6802 = sst [smem:[#allocation53_spill]] %s6768_s17 }
  0x13   :  { %6803 = sst [smem:[#allocation54_spill]] %s6769_s18 }
  0x14   :  { %23 = vsyncpa [#allocation4], 0 }
  0x15   :  { %25 = vsyncpa [#allocation4 + $0x1], 0 }
  0x16   :  { %26 = vsyncpa [#allocation6], 0 }
  0x17   :  { %28 = vsyncpa [#allocation6 + $0x1], 0 }
  0x18   :  { %29 = vsyncpa [#allocation9], 0 }
  0x19   :  { %31 = vsyncpa [#allocation9 + $0x1], 0 }
  0x1a   :  { %32 = vsyncpa [#allocation12], 0  ;;  %s5324_s27 = smov 0   ;;  %s5326_s28 = smov 0  }
  0x1b   :  { %s5328_s29 = smov 0   ;;  %s5330_s30 = smov 0  }
  0x1c   :  { %s5332_s0 = smov 0   ;;  %s5334_s19 = smov 0  }
  0x1d   :  { %s5336_s1 = smov 0   ;;  %s5338_s20 = smov 0  }
  0x1e LB: > { %6804 = sst [smem:[#allocation17_spill]] %s5193_s28  ;;  %s47_s21 = sadd.s32 1, %s5209_s19  ;;  %s5217_s20 = sphi %s5338_s20, %s38_s20   ;;  %s5213_s1 = sphi %s5336_s1, %s6874_s1   ;;  %s5209_s19 = sphi %s5334_s19, %s6873_s19   ;;  %s5205_s0 = sphi %s5332_s0, %s6872_s0   ;;  %s5201_s30 = sphi %s5330_s30, %s6871_s30   ;;  %s5197_s29 = sphi %s5328_s29, %s6870_s29   ;;  %s5193_s28 = sphi %s5326_s28, %s6869_s28   ;;  %s5189_s27 = sphi %s5324_s27, %s6868_s27  }
  0x1f   : > { %6805 = sst [smem:[#allocation18_spill]] %s5197_s29  ;;  %s50_s22 = sadd.s32 1, %s5213_s1 }
  0x20   : > { %6806 = sst [smem:[#allocation19_spill]] %s5209_s19  ;;  %p48_p0 = scmp.ge.s32.totalorder %s47_s21, 2 }
  0x21   : > { %6807 = sst [smem:[#allocation20_spill]] %s5213_s1  ;;  %s109_s2 = sadd.s32 1, %s5197_s29 }
  0x22   : > { %6808 = sst [smem:[#allocation21_spill]] %s5217_s20  ;;  %p116_p1 = scmp.ne.s32.totalorder %s5197_s29, %s5193_s28 }
  0x23   : > { %p117_p2 = scmp.eq.s32.totalorder %s5217_s20, 0  ;;  %s6876_s21 = smov (%p48_p0, %s47_s21), 0 }
  0x24   : > { %6809 = sst [smem:[#allocation22_spill]] %s6876_s21  ;;  %s6878_s22 = smov (!%p48_p0, %s50_s22), %s5213_s1 }
  0x25   : > { %s106_s23 = ssub.s32 %s5209_s19, %s6876_s21  ;;  %p118_p3 = por %p117_p2, %p116_p1 }
  0x26   : > { %p52_p4 = scmp.ge.s32.totalorder %s6878_s22, 2  ;;  %p107_p5 = scmp.eq.s32.totalorder %s106_s23, 0 }
  0x27   : > { %p4602_p6 = scmp.lt.s32.totalorder %s5217_s20, 4  ;;  %s5382_s25 = sand.u32 1, %s5197_s29  }
  0x28   : > { %s6880_s22 = smov (%p52_p4, %s6878_s22), 0  ;;  %s611_s26 = sand.u32 1, %s5217_s20  }
  0x29   : > { %6810 = sst [smem:[#allocation23_spill]] %s6880_s22  ;;  %p5385_p7 = pnand %p4602_p6, %p118_p3 }
  0x2a   : > { %s5378_s24 = scalar_select %p107_p5, %s5197_s29, %s109_s2  }
  0x2b   : > { %s5390_s15 = sshll.u32 %s5382_s25, 7  ;;  %s5393_s21 = sshll.u32 %s5209_s19, 7 }
  0x2c   : > { %6811 = sst [smem:[#allocation24_spill]] %s5378_s24  ;;  %s615_s1 = scalar_lea.vmem [#allocation5], %s5390_s15 }
  0x2d   : > { %s6813_s4 = sld [smem:[#allocation40_spill]]  ;;  %s623_s24 = sshll.u32 %s615_s1, 4  ;;  %s624_s24 = int_to_ptr.vmem [resolvable:$true] %s623_s24 }
  0x2e   : > { %s5400_s16 = scalar_lea.sflag [#allocation6], %s611_s26  ;;  %s6775_s18 = smov 128  }
  0x2f   : > { %s6777_s13 = smov 8   ;;  %s6814_s10 = sld [smem:[#allocation46_spill]] }
  0x30   : > { %s5413_s9 = scalar_lea.sflag [#allocation9], %s611_s26  ;;  %p122_p8 = scmp.ne.s32.totalorder %s5193_s28, %s5189_s27 }
  0x31   : > { %p4433_p10 = scmp.ge.s32.totalorder %s5217_s20, 1  ;;  %p529_p11 = scmp.lt.s32.totalorder %s5217_s20, 5 }
  0x32   : > { %s6817_s14 = sld [smem:[#allocation50_spill]]  ;;  %s5221_s23 = smov [#allocation11]  }
  0x33   : > { %s620_s22 = scalar_lea.hbm %s6813_s4, %s5393_s21  ;;  %s683_s4 = scalar_lea.vmem [#allocation8], %s5390_s15 }
  0x34   : > { %s621_s29 = sshll.u32 %s620_s22, 4  ;;  %s691_s11 = sshll.u32 %s683_s4, 4  ;;  %s622_s29 = int_to_ptr.hbm [resolvable:$true] %s621_s29  ;;  %s692_s11 = int_to_ptr.vmem [resolvable:$true] %s691_s11 }
  0x35   : > { %4591 = dma.hbm_to_vmem [thread:$0]  (!%p5385_p7), %s622_s29, 2048, %s624_s24, %s5400_s16, %s6775_s18, %s6775_s18, %s6777_s13  }
  0x36   : > { %s688_s22 = scalar_lea.hbm %s6814_s10, %s5393_s21  ;;  %s6774_s29 = sadd.s32 4294967295, %s5217_s20  }
  0x37   : > { %s689_s2 = sshll.u32 %s688_s22, 4  ;;  %p5426_p9 = scmp.eq.s32.totalorder %s6774_s29, 0  ;;  %s690_s2 = int_to_ptr.hbm [resolvable:$true] %s689_s2 }
  0x38   : > { %4597 = dma.hbm_to_vmem [thread:$0]  (!%p5385_p7), %s690_s2, 2048, %s692_s11, %s5413_s9, %s6775_s18, %s6775_s18, %s6777_s13  }
  0x39   : > { %p5434_p12 = por %p5426_p9, %p122_p8  ;;  %s540_s11 = sshll.u32 %s6817_s14, 4  ;;  %s541_s11 = int_to_ptr.hbm [resolvable:$true] %s540_s11 }
  0x3a   : > { %p5441_p13 = pnand %p4433_p10, %p529_p11  ;;  %s542_s22 = sshll.u32 %s5221_s23, 4  ;;  %s543_s22 = int_to_ptr.vmem [resolvable:$true] %s542_s22 }
  0x3b   : > { %s4563_s2 = smul.u32 384, %s5382_s25  ;;  %s6819_s18 = sld [smem:[#allocation38_spill]] }
  0x3c   : > { %p4581_p0 = pneg %p5441_p13  ;;  %s4564_s26 = smul.u32 384, %s5209_s19 }
  0x3d   : > { %s6820_s10 = smov 8   ;;  %s6821_s14 = smov 128  }
  0x3e   : > { %p4582_p1 = pnand %p4581_p0, %p5426_p9  ;;  %s586_s23 = scalar_lea.vmem [#allocation3], %s4563_s2 }
  0x3f   : > { %s594_s6 = sshll.u32 %s586_s23, 4  ;;  %s583_s3 = scalar_lea.sflag [#allocation4], %s5382_s25  ;;  %s595_s6 = int_to_ptr.vmem [resolvable:$true] %s594_s6 }
  0x40   : > { %4584 = dma.hbm_to_vmem [thread:$0]  (!%p4582_p1), %s541_s11, 2048, %s543_s22, [#allocation12], %s6821_s14, %s6821_s14, %s6820_s10  }
  0x41   : > { %s591_s13 = scalar_lea.hbm %s6819_s18, %s4564_s26  ;;  %s5222_s5 = smov 384  }
  0x42   : > { %s592_s7 = sshll.u32 %s591_s13, 4  ;;  %s5223_s19 = smov 24   ;;  %s593_s7 = int_to_ptr.hbm [resolvable:$true] %s592_s7 }
  0x43   : > { %4588 = dma.hbm_to_vmem [thread:$0]  (!%p5385_p7), %s593_s7, 6144, %s595_s6, %s583_s3, %s5222_s5, %s5222_s5, %s5223_s19  }
  0x44   : > { %s6822_s8 = sld [smem:[#allocation44_spill]]  ;;  %s655_s22 = scalar_lea.vmem [#allocation7], %s5390_s15 }
  0x45   : > { %s663_s26 = sshll.u32 %s655_s22, 4  ;;  %s6823_s12 = sld [smem:[#allocation48_spill]]  ;;  %s664_s26 = int_to_ptr.vmem [resolvable:$true] %s663_s26 }
  0x46   : > { %s711_s23 = scalar_lea.vmem [#allocation10], %s5390_s15 }
  0x47   : > { %s719_s3 = sshll.u32 %s711_s23, 4  ;;  %s720_s3 = int_to_ptr.vmem [resolvable:$true] %s719_s3 }
  0x4a   : > { %s660_s11 = scalar_lea.hbm %s6822_s8, %s5393_s21  ;;  %737 = sbr.rel (%p5441_p13) target bundleno = 3673 (0xe59), region = 92 }
  0x4b   : > { %s661_s13 = sshll.u32 %s660_s11, 4  ;;  %s716_s1 = scalar_lea.hbm %s6823_s12, %s5393_s21  ;;  %s662_s13 = int_to_ptr.hbm [resolvable:$true] %s661_s13 }
  0x4c   : > { %4594 = dma.hbm_to_vmem [thread:$0]  (!%p5385_p7), %s662_s13, 2048, %s664_s26, %s5400_s16, %s6821_s14, %s6821_s14, %s6820_s10  }
  0x4d   : > { %s717_s5 = sshll.u32 %s716_s1, 4  ;;  %s718_s5 = int_to_ptr.hbm [resolvable:$true] %s717_s5 }
  0x4e   : > { %4600 = dma.hbm_to_vmem [thread:$0]  (!%p5385_p7), %s718_s5, 2048, %s720_s3, %s5413_s9, %s6821_s14, %s6821_s14, %s6820_s10  }
  0x4f   : > { %s739_s6 = sand.u32 1, %s5193_s28  }
  0x50   : > { %s4565_s7 = smul.u32 384, %s739_s6  ;;  %s740_s16 = scalar_lea.sflag [#allocation4], %s739_s6 }
  0x52   : > { %s5485_s19 = scalar_lea.vmem [#allocation3], %s4565_s7 }
  0x53   : > { %5172 = dma.done.wait (%p5434_p12), %s740_s16, 6144  }
  0x54   : > { %5174 = vsyncadd (%p5434_p12), %s740_s16, 4294961152  ;;  %s6824_s15 = sadd.s32 4294967295, %s5217_s20   ;;  %s4450_s9 = sshll.u32 %s739_s6, 7 }
  0x55   : > { %s749_s17 = sand.u32 1, %s6824_s15   ;;  %s5493_s14 = scalar_lea.vmem [#allocation5], %s4450_s9 }
  0x56   : > { %s750_s10 = scalar_lea.sflag [#allocation6], %s749_s17 }
  0x57   : > { %5176 = dma.done.wait (%p5434_p12), %s750_s10, 4096  }
  0x58   : > { %5178 = vsyncadd (%p5434_p12), %s750_s10, 4294963200  ;;  %s5499_s21 = scalar_lea.vmem [#allocation7], %s4450_s9  ;;  %s770_s27 = scalar_lea.sflag [#allocation9], %s749_s17 }
  0x59   : > { %s5501_s18 = scalar_lea.vmem [#allocation8], %s4450_s9 }
  0x5a   : > { %5180 = dma.done.wait (%p5434_p12), %s770_s27, 4096  }
  0x5b   : > { %5182 = vsyncadd (%p5434_p12), %s770_s27, 4294963200  ;;  %s5507_s29 = scalar_lea.vmem [#allocation10], %s4450_s9 }
  0x5c   : > { %6825 = sst [smem:[#allocation25_spill]] %s5507_s29 }
  0x5d   : > { %5184 = dma.done.wait (%p5426_p9), [#allocation12], 2048  }
  0x5e   : > { %5186 = vsyncadd (%p5426_p9), [#allocation12], 4294965248  ;;  %s4455_s11 = sshll.u32 %s5205_s0, 3  ;;  %p903_p2 = scmp.lt.s32.totalorder %s5201_s30, 1 }
  0x5f   : > { %p893_p3 = scmp.lt.s32.totalorder %s4455_s11, 15  ;;  %p925_p4 = scmp.lt.s32.totalorder %s5205_s0, 1 }
  0x60   : > { %s5517_s4 = scalar_select %p903_p2, %s5201_s30, 1 }
  0x61   : > { %s6882_s11 = smov (!%p893_p3, %s4455_s11), 15  ;;  %s6827_s3 = sld [smem:[#allocation37_spill]] }
  0x62   : > { %s4566_s24 = smul.u32 3, %s5517_s4  ;;  %s4456_s2 = sshll.u32 %s6882_s11, 3 }
  0x63   : > { %s6828_s16 = sld [smem:[#allocation36_spill]]  ;;  %s6884_s0 = smov (!%p925_p4, %s5205_s0), 1 }
  0x64   : > { %s6829_s10 = sld [smem:[#allocation39_spill]]  ;;  %s4458_s8 = sshll.u32 %s6884_s0, 3 }
  0x65   : > { %s6830_s28 = sld [smem:[#allocation42_spill]]  ;;  %p4459_p5 = scmp.ne.s32.totalorder %s5201_s30, 0 }
  0x66   : > { %s6831_s25 = sld [smem:[#allocation43_spill]] }
  0x67   : > { %s5527_s5 = scalar_lea.vmem %s6827_s3, %s6882_s11  ;;  %s6832_s23 = sld [smem:[#allocation45_spill]] }
  0x69   : > { %s896_s15 = scalar_lea.vmem %s6828_s16, %s4456_s2  ;;  %s6833_s2 = sld [smem:[#allocation47_spill]] }
  0x6a   : > { %s5535_s27 = scalar_lea.vmem %s6829_s10, %s4566_s24  ;;  %s6834_s24 = sld [smem:[#allocation49_spill]] }
  0x6b   : > { %s912_s22 = scalar_lea.vmem %s6830_s28, %s5517_s4  ;;  %s6835_s10 = sld [smem:[#allocation54_spill]] }
  0x6c   : > { %s915_s20 = scalar_lea.vmem %s6831_s25, %s5517_s4 }
  0x6d   : > { %s918_s3 = scalar_lea.vmem %s6832_s23, %s5517_s4  ;;  %932 = sbr.rel (%p4459_p5) target bundleno = 123 (0x7b), region = 120 }
  0x6f   : > { %s921_s7 = scalar_lea.vmem %s6833_s2, %s5517_s4 }
  0x70   : > { %s924_s9 = scalar_lea.vmem %s6834_s24, %s5517_s4 }
  0x71   : > { %s5563_s26 = scalar_lea.vmem %s6835_s10, %s4458_s8 }
  0x72   : > { %v933_v0 = vld [vmem:[%s896_s15] sm:$0xff]  ;;  %v934_v1 = vld [vmem:[%s896_s15 + $0x8] sm:$0xff]  ;;  %v935_v2 = vld [vmem:[%s896_s15 + $0x10] sm:$0xff] }
  0x73   : > { %941 = vst [vmem:[#allocation2 + $0x30] sm:$0xff] %v933_v0  ;;  %v936_v3 = vld [vmem:[%s896_s15 + $0x18] sm:$0xff]  ;;  %v937_v4 = vld [vmem:[%s896_s15 + $0x20] sm:$0xff]  ;;  %v938_v5 = vld [vmem:[%s896_s15 + $0x28] sm:$0xff] }
  0x74   : > { %942 = vst [vmem:[#allocation2] sm:$0xff] %v934_v1  ;;  %v939_v6 = vld [vmem:[%s896_s15 + $0x30] sm:$0xff]  ;;  %v940_v7 = vld [vmem:[%s896_s15 + $0x38] sm:$0xff] }
  0x75   : > { %943 = vst [vmem:[#allocation2 + $0x18] sm:$0xff] %v935_v2 }
  0x76   : > { %944 = vst [vmem:[#allocation2 + $0x10] sm:$0xff] %v936_v3 }
  0x77   : > { %945 = vst [vmem:[#allocation2 + $0x8] sm:$0xff] %v937_v4 }
  0x78   : > { %946 = vst [vmem:[#allocation2 + $0x20] sm:$0xff] %v938_v5 }
  0x79   : > { %947 = vst [vmem:[#allocation2 + $0x28] sm:$0xff] %v939_v6 }
  0x7a   : > { %948 = vst [vmem:[#allocation2 + $0x38] sm:$0xff] %v940_v7 }
  0x7b PF: > { %v1002_v8 = vld [vmem:[%s5485_s19 + $0x168] sm:$0xff]  ;;  %v1003_v9 = vld [vmem:[%s5485_s19 + $0x170] sm:$0xff]  ;;  %v1000_v11 = vld [vmem:[%s5485_s19 + $0x158] sm:$0xff]  ;;  %vm1176_vm0 = vcmask 261120   ;;  %s5224_s0 = smov 96   ;;  %vm1385_vm1 = vcmask 64512  }
  0x7c   : > { %v999_v10 = vld [vmem:[%s5485_s19 + $0x150] sm:$0xff]  ;;  %1013 = vmatpush.msra.mxu0 %v1002_v8  ;;  %1054 = vmatpush.msra.mxu1 %v1003_v9  ;;  %v996_v12 = vld [vmem:[%s5485_s19 + $0x138] sm:$0xff]  ;;  %v997_v13 = vld [vmem:[%s5485_s19 + $0x140] sm:$0xff]  ;;  %s5226_s29 = smov 32   ;;  %vm3330_vm2 = vcmask 523264   ;;  %vm3339_vm3 = vcmask 785408  }
  0x7d   : > { %v993_v14 = vld [vmem:[%s5485_s19 + $0x120] sm:$0xff]  ;;  %v994_v15 = vld [vmem:[%s5485_s19 + $0x128] sm:$0xff]  ;;  %v991_v17 = vld [vmem:[%s5485_s19 + $0x110] sm:$0xff]  ;;  %s6861_s6 = sld [smem:[#allocation25_spill]]  ;;  %p4556_p6 = scmp.ne.s32.totalorder %s5201_s30, 1 }
  0x7e   : > { %1014 = vmatpush.msra.mxu0 %v999_v10  ;;  %1055 = vmatpush.msra.mxu1 %v1000_v11  ;;  %v990_v16 = vld [vmem:[%s5485_s19 + $0x108] sm:$0xff]  ;;  %v987_v18 = vld [vmem:[%s5485_s19 + $0xf0] sm:$0xff]  ;;  %v988_v19 = vld [vmem:[%s5485_s19 + $0xf8] sm:$0xff]  ;;  %s6865_s10 = sld [smem:[#allocation51_spill]] (!%p4556_p6) }
  0x7f   : > { %v984_v20 = vld [vmem:[%s5485_s19 + $0xd8] sm:$0xff]  ;;  %v985_v21 = vld [vmem:[%s5485_s19 + $0xe0] sm:$0xff]  ;;  %v982_v23 = vld [vmem:[%s5485_s19 + $0xc8] sm:$0xff] }
  0x80   : > { %1015 = vmatpush.msra.mxu0 %v996_v12  ;;  %1056 = vmatpush.msra.mxu1 %v997_v13  ;;  %v981_v22 = vld [vmem:[%s5485_s19 + $0xc0] sm:$0xff]  ;;  %v978_v24 = vld [vmem:[%s5485_s19 + $0xa8] sm:$0xff]  ;;  %v979_v25 = vld [vmem:[%s5485_s19 + $0xb0] sm:$0xff] }
  0x81   : > { %v975_v26 = vld [vmem:[%s5485_s19 + $0x90] sm:$0xff]  ;;  %v976_v27 = vld [vmem:[%s5485_s19 + $0x98] sm:$0xff]  ;;  %v973_v29 = vld [vmem:[%s5485_s19 + $0x80] sm:$0xff] }
  0x82   : > { %1016 = vmatpush.msra.mxu0 %v993_v14  ;;  %1057 = vmatpush.msra.mxu1 %v994_v15  ;;  %v972_v28 = vld [vmem:[%s5485_s19 + $0x78] sm:$0xff]  ;;  %v969_v30 = vld [vmem:[%s5485_s19 + $0x60] sm:$0xff]  ;;  %v970_v31 = vld [vmem:[%s5485_s19 + $0x68] sm:$0xff] }
  0x83   : > { %v966_v32 = vld [vmem:[%s5485_s19 + $0x48] sm:$0xff]  ;;  %v967_v33 = vld [vmem:[%s5485_s19 + $0x50] sm:$0xff]  ;;  %v964_v35 = vld [vmem:[%s5485_s19 + $0x38] sm:$0xff] }
  0x84   : > { %1017 = vmatpush.msra.mxu0 %v990_v16  ;;  %1058 = vmatpush.msra.mxu1 %v991_v17  ;;  %v963_v34 = vld [vmem:[%s5485_s19 + $0x30] sm:$0xff]  ;;  %v960_v36 = vld [vmem:[%s5485_s19 + $0x18] sm:$0xff]  ;;  %v961_v37 = vld [vmem:[%s5485_s19 + $0x20] sm:$0xff] }
  0x85   : > { %v957_v38 = vld [vmem:[%s5485_s19] sm:$0xff]  ;;  %v958_v39 = vld [vmem:[%s5485_s19 + $0x8] sm:$0xff]  ;;  %v949_v40 = vld [vmem:[#allocation2 + $0x30] sm:$0xff] }
  0x86   : > { %1018 = vmatpush.msra.mxu0 %v987_v18  ;;  %1059 = vmatpush.msra.mxu1 %v988_v19  ;;  %v950_v41 = vld [vmem:[#allocation2] sm:$0xff]  ;;  %v1004_v42 = vld [vmem:[%s5485_s19 + $0x178] sm:$0xff]  ;;  %v998_v45 = vld [vmem:[%s5485_s19 + $0x148] sm:$0xff] }
  0x87   : > { %v1001_v43 = vld [vmem:[%s5485_s19 + $0x160] sm:$0xff]  ;;  %1095 = vmatpush.msra.mxu2 %v1004_v42  ;;  %v951_v44 = vld [vmem:[#allocation2 + $0x18] sm:$0xff]  ;;  %v995_v46 = vld [vmem:[%s5485_s19 + $0x130] sm:$0xff] }
  0x88   : > { %1019 = vmatpush.msra.mxu0 %v984_v20  ;;  %1060 = vmatpush.msra.mxu1 %v985_v21  ;;  %v992_v47 = vld [vmem:[%s5485_s19 + $0x118] sm:$0xff]  ;;  %v989_v48 = vld [vmem:[%s5485_s19 + $0x100] sm:$0xff]  ;;  %v952_v49 = vld [vmem:[#allocation2 + $0x10] sm:$0xff] }
  0x89   : > { %1096 = vmatpush.msra.mxu2 %v1001_v43  ;;  %v986_v50 = vld [vmem:[%s5485_s19 + $0xe8] sm:$0xff]  ;;  %v983_v51 = vld [vmem:[%s5485_s19 + $0xd0] sm:$0xff]  ;;  %v980_v52 = vld [vmem:[%s5485_s19 + $0xb8] sm:$0xff] }
  0x8a   : > { %1020 = vmatpush.msra.mxu0 %v981_v22  ;;  %1061 = vmatpush.msra.mxu1 %v982_v23  ;;  %v977_v53 = vld [vmem:[%s5485_s19 + $0xa0] sm:$0xff]  ;;  %v953_v54 = vld [vmem:[#allocation2 + $0x8] sm:$0xff]  ;;  %v971_v56 = vld [vmem:[%s5485_s19 + $0x70] sm:$0xff] }
  0x8b   : > { %1097 = vmatpush.msra.mxu2 %v998_v45  ;;  %v974_v55 = vld [vmem:[%s5485_s19 + $0x88] sm:$0xff]  ;;  %v968_v57 = vld [vmem:[%s5485_s19 + $0x58] sm:$0xff]  ;;  %v965_v58 = vld [vmem:[%s5485_s19 + $0x40] sm:$0xff] }
  0x8c   : > { %1021 = vmatpush.msra.mxu0 %v978_v24  ;;  %1062 = vmatpush.msra.mxu1 %v979_v25  ;;  %v954_v59 = vld [vmem:[#allocation2 + $0x20] sm:$0xff]  ;;  %v962_v60 = vld [vmem:[%s5485_s19 + $0x28] sm:$0xff]  ;;  %v959_v61 = vld [vmem:[%s5485_s19 + $0x10] sm:$0xff]  ;;  %s5225_s19 = smov 64  }
  0x8d   : > { %1098 = vmatpush.msra.mxu2 %v995_v46  ;;  %v955_v62 = vld [vmem:[#allocation2 + $0x28] sm:$0xff]  ;;  %v956_v63 = vld [vmem:[#allocation2 + $0x38] sm:$0xff]  ;;  %v5615_v0 = vld [vmem:[%s5535_s27] sm:$0x7] }
  0x8e   : > { %1022 = vmatpush.msra.mxu0 %v975_v26  ;;  %1063 = vmatpush.msra.mxu1 %v976_v27  ;;  %v5618_v1 = vperm.slane %v5615_v0, 0  ;;  %v5621_v2 = vperm.slane %v5615_v0, 1 }
  0x8f   : > { %1099 = vmatpush.msra.mxu2 %v992_v47 }
  0x90   : > { %1023 = vmatpush.msra.mxu0 %v972_v28  ;;  %1064 = vmatpush.msra.mxu1 %v973_v29 }
  0x91   : > { %1100 = vmatpush.msra.mxu2 %v989_v48 }
  0x92   : > { %1024 = vmatpush.msra.mxu0 %v969_v30  ;;  %1065 = vmatpush.msra.mxu1 %v970_v31 }
  0x93   : > { %1101 = vmatpush.msra.mxu2 %v986_v50 }
  0x94   : > { %1025 = vmatpush.msra.mxu0 %v966_v32  ;;  %1066 = vmatpush.msra.mxu1 %v967_v33 }
  0x95   : > { %1102 = vmatpush.msra.mxu2 %v983_v51 }
  0x96   : > { %1026 = vmatpush.msra.mxu0 %v963_v34  ;;  %1067 = vmatpush.msra.mxu1 %v964_v35 }
  0x97   : > { %1103 = vmatpush.msra.mxu2 %v980_v52 }
  0x98   : > { %1027 = vmatpush.msra.mxu0 %v960_v36  ;;  %1068 = vmatpush.msra.mxu1 %v961_v37 }
  0x99   : > { %1104 = vmatpush.msra.mxu2 %v977_v53 }
  0x9a   : > { %1028 = vmatpush.msra.mxu0 %v957_v38  ;;  %1069 = vmatpush.msra.mxu1 %v958_v39 }
  0x9b   : > { %1029 = vmatmul.f32.vlgmr.msra.gmra.mxu0 %v949_v40  ;;  %1070 = vmatmul.f32.vlgmr.msra.gmra.mxu1 %v949_v40 }
  0x9c   : > { %1105 = vmatpush.msra.mxu2 %v974_v55 }
  0x9e   : > { %1106 = vmatpush.msra.mxu2 %v971_v56 }
  0xa0   : > { %1107 = vmatpush.msra.mxu2 %v968_v57 }
  0xa2   : > { %1108 = vmatpush.msra.mxu2 %v965_v58 }
  0xa3   : > { %1073 = vmatmul.f32.gmra.mxu1 %v950_v41  ;;  %1032 = vmatmul.f32.gmra.mxu0 %v950_v41 }
  0xa4   : > { %1109 = vmatpush.msra.mxu2 %v962_v60 }
  0xa6   : > { %1110 = vmatpush.msra.mxu2 %v959_v61 }
  0xa7   : > { %1111 = vmatmul.f32.vlgmr.msra.gmra.mxu2 %v949_v40 }
  0xab   : > { %1076 = vmatmul.f32.gmra.mxu1 %v951_v44  ;;  %1035 = vmatmul.f32.gmra.mxu0 %v951_v44 }
  0xaf   : > { %1114 = vmatmul.f32.gmra.mxu2 %v950_v41  ;;  %v5714_v41 = vperm.slane %v5615_v0, 2  ;;  %v5761_v0 = vld [vmem:[%s5527_s5 + $0x1] ss:$0 sm:$0xff] }
  0xb3   : > { %1079 = vmatmul.f32.gmra.mxu1 %v952_v49  ;;  %1038 = vmatmul.f32.gmra.mxu0 %v952_v49 }
  0xb7   : > { %1117 = vmatmul.f32.gmra.mxu2 %v951_v44 }
  0xbb   : > { %1082 = vmatmul.f32.gmra.mxu1 %v953_v54  ;;  %1041 = vmatmul.f32.gmra.mxu0 %v953_v54 }
  0xbf   : > { %1120 = vmatmul.f32.gmra.mxu2 %v952_v49 }
  0xc3   : > { %1085 = vmatmul.f32.gmra.mxu1 %v954_v59  ;;  %1044 = vmatmul.f32.gmra.mxu0 %v954_v59 }
  0xc7   : > { %1123 = vmatmul.f32.gmra.mxu2 %v953_v54 }
  0xcb   : > { %1088 = vmatmul.f32.gmra.mxu1 %v955_v62  ;;  %1047 = vmatmul.f32.gmra.mxu0 %v955_v62 }
  0xcf   : > { %1126 = vmatmul.f32.gmra.mxu2 %v954_v59  ;;  %v5755_v59 = vld [vmem:[%s5527_s5] ss:$0 sm:$0xff] }
  0xd3   : > { %1091 = vmatmul.f32.gmra.mxu1 %v956_v63  ;;  %1050 = vmatmul.f32.gmra.mxu0 %v956_v63 }
  0xd7   : > { %1129 = vmatmul.f32.gmra.mxu2 %v955_v62 }
  0xdf   : > { %1132 = vmatmul.f32.gmra.mxu2 %v956_v63 }
 0x118   : > { %v1030_v3 = vpop.f32.mrf.mxu0  ;;  %v1071_v4 = vpop.f32.mrf.mxu1 }
 0x119   : > { %v1031_v5 = vadd.f32 %v1030_v3, %v5618_v1  ;;  %v5625_v6 = vadd.f32 %v1071_v4, %v5621_v2  ;;  %v5766_v4 = vld [vmem:[%s5527_s5 + $0x2] ss:$0 sm:$0xff] }
 0x11b   : > { %v5627_v7 = vmul.f32 0.17677669, %v1031_v5  ;;  %1660 = vrot.lane.b32.xlu1 %v5625_v6, %s5224_s0  ;;  %4460 = vmatpush.xpose.msk.msra.mxu3 %vm1176_vm0, %v5625_v6 }
 0x11d   : > { %1658 = vrot.lane.b32.xlu0 %v5627_v7, %s5224_s0 }
 0x11e   : > { %4461 = vmatmul.msk.f32.vlgmr.msra.gmra.mxu3 %vm1176_vm0, %v5627_v7 }
 0x120   : > { %v1074_v8 = vpop.f32.mrf.mxu1  ;;  %v1033_v9 = vpop.f32.mrf.mxu0 }
 0x121   : > { %v5638_v10 = vadd.f32 %v1074_v8, %v5621_v2  ;;  %v1034_v11 = vadd.f32 %v1033_v9, %v5618_v1 }
 0x123   : > { %v5641_v12 = vmul.f32 0.17677669, %v1034_v11  ;;  %4462 = vmatpush.xpose.msk.msrb.mxu3 %vm1176_vm0, %v5638_v10  ;;  %v5771_v11 = vld [vmem:[%s5527_s5 + $0x3] ss:$0 sm:$0xff] }
 0x125   : > { %1688 = vrot.lane.b32.xlu0 %v5638_v10, %s5224_s0 }
 0x126   : > { %4463 = vmatmul.msk.f32.vlgmr.msrb.gmra.mxu3 %vm1176_vm0, %v5641_v12 }
 0x128   : > { %v1077_v13 = vpop.f32.mrf.mxu1  ;;  %v1036_v14 = vpop.f32.mrf.mxu0 }
 0x129   : > { %v5650_v15 = vadd.f32 %v1077_v13, %v5621_v2  ;;  %v1037_v16 = vadd.f32 %v1036_v14, %v5618_v1 }
 0x12a   : > { %v1112_v37 = vpop.f32.mrf.mxu2 }
 0x12b   : > { %v5653_v17 = vmul.f32 0.17677669, %v1037_v16  ;;  %4464 = vmatpush.xpose.msk.msra.mxu3 %vm1176_vm0, %v5650_v15  ;;  %v5721_v44 = vadd.f32 %v1112_v37, %v5714_v41  ;;  %v5794_v37 = vld [vmem:[%s5527_s5 + $0x7] ss:$0 sm:$0xff] }
 0x12d   : > { %1714 = vrot.lane.b32.xlu2 %v5653_v17, %s5224_s0  ;;  %1716 = vrot.lane.b32.xlu0 %v5650_v15, %s5224_s0 }
 0x12e   : > { %4465 = vmatmul.msk.f32.vlgmr.msra.gmra.mxu3 %vm1176_vm0, %v5653_v17 }
 0x130   : > { %v1080_v18 = vpop.f32.mrf.mxu1  ;;  %v1039_v19 = vpop.f32.mrf.mxu0 }
 0x131   : > { %v5664_v20 = vadd.f32 %v1080_v18, %v5621_v2  ;;  %v1040_v21 = vadd.f32 %v1039_v19, %v5618_v1  ;;  %v5779_v18 = vld [vmem:[%s5527_s5 + $0x4] ss:$0 sm:$0xff] }
 0x132   : > { %v1115_v45 = vpop.f32.mrf.mxu2 }
 0x133   : > { %v5667_v22 = vmul.f32 0.17677669, %v1040_v21  ;;  %4466 = vmatpush.xpose.msk.msrb.mxu3 %vm1176_vm0, %v5664_v20  ;;  %v5729_v47 = vadd.f32 %v1115_v45, %v5714_v41 }
 0x135   : > { %1742 = vrot.lane.b32.xlu2 %v5667_v22, %s5224_s0  ;;  %1744 = vrot.lane.b32.xlu0 %v5664_v20, %s5224_s0 }
 0x136   : > { %4467 = vmatmul.msk.f32.vlgmr.msrb.gmra.mxu3 %vm1176_vm0, %v5667_v22 }
 0x138   : > { %v1083_v23 = vpop.f32.mrf.mxu1  ;;  %v1042_v24 = vpop.f32.mrf.mxu0 }
 0x139   : > { %v5678_v25 = vadd.f32 %v1083_v23, %v5621_v2  ;;  %v1043_v26 = vadd.f32 %v1042_v24, %v5618_v1  ;;  %v5784_v24 = vld [vmem:[%s5527_s5 + $0x5] ss:$0 sm:$0xff] }
 0x13a   : > { %v5734_v48 = vpop.f32.mrf.mxu2 }
 0x13b   : > { %v5681_v27 = vmul.f32 0.17677669, %v1043_v26  ;;  %4468 = vmatpush.xpose.msk.msra.mxu3 %vm1176_vm0, %v5678_v25 }
 0x13d   : > { %1772 = vrot.lane.b32.xlu2 %v5678_v25, %s5224_s0 }
 0x13e   : > { %4469 = vmatmul.msk.f32.vlgmr.msra.gmra.mxu3 %vm1176_vm0, %v5681_v27 }
 0x140   : > { %v1086_v28 = vpop.f32.mrf.mxu1  ;;  %v1045_v29 = vpop.f32.mrf.mxu0 }
 0x141   : > { %v5690_v30 = vadd.f32 %v1086_v28, %v5621_v2  ;;  %v1046_v31 = vadd.f32 %v1045_v29, %v5618_v1 }
 0x142   : > { %v5736_v49 = vpop.f32.mrf.mxu2 }
 0x143   : > { %v5693_v32 = vmul.f32 0.17677669, %v1046_v31  ;;  %4470 = vmatpush.xpose.msk.msrb.mxu3 %vm1176_vm0, %v5690_v30  ;;  %v5789_v31 = vld [vmem:[%s5527_s5 + $0x6] ss:$0 sm:$0xff] }
 0x146   : > { %4471 = vmatmul.msk.f32.vlgmr.msrb.gmra.mxu3 %vm1176_vm0, %v5693_v32 }
 0x148   : > { %v1089_v33 = vpop.f32.mrf.mxu1  ;;  %v1048_v34 = vpop.f32.mrf.mxu0 }
 0x149   : > { %v5700_v35 = vadd.f32 %v1089_v33, %v5621_v2  ;;  %v1049_v36 = vadd.f32 %v1048_v34, %v5618_v1 }
 0x14a   : > { %v1124_v50 = vpop.f32.mrf.mxu2 }
 0x14b   : > { %v5703_v38 = vmul.f32 0.17677669, %v1049_v36  ;;  %4472 = vmatpush.xpose.msk.msra.mxu3 %vm1176_vm0, %v5700_v35  ;;  %1828 = vrot.lane.b32.xlu2 %v5700_v35, %s5224_s0  ;;  %v5739_v51 = vadd.f32 %v1124_v50, %v5714_v41 }
 0x14d   : > { %1826 = vrot.lane.b32.xlu1 %v5703_v38, %s5224_s0  ;;  %1584 = vmatpush.msrb.mxu0 %v5739_v51 }
 0x14e   : > { %4473 = vmatmul.msk.f32.vlgmr.msra.gmra.mxu3 %vm1176_vm0, %v5703_v38 }
 0x150   : > { %v1092_v39 = vpop.f32.mrf.mxu1  ;;  %v1051_v40 = vpop.f32.mrf.mxu0 }
 0x151   : > { %v5717_v42 = vadd.f32 %v1092_v39, %v5621_v2  ;;  %v1052_v43 = vadd.f32 %v1051_v40, %v5618_v1 }
 0x152   : > { %v1127_v52 = vpop.f32.mrf.mxu2 }
 0x153   : > { %v5723_v46 = vmul.f32 0.17677669, %v1052_v43  ;;  %4474 = vmatpush.xpose.msk.msrb.mxu3 %vm1176_vm0, %v5717_v42  ;;  %v5743_v53 = vadd.f32 %v1127_v52, %v5714_v41 }
 0x155   : > { %1607 = vmatpush.msrb.mxu1 %v5743_v53 }
 0x156   : > { %4475 = vmatmul.msk.f32.vlgmr.msrb.gmra.mxu3 %vm1176_vm0, %v5723_v46 }
 0x157   : > { %1492 = vmatpush.msra.mxu3 %v5721_v44 }
 0x159   : > { %1515 = vmatpush.msrb.mxu3 %v5729_v47 }
 0x15a   : > { %v1130_v55 = vpop.f32.mrf.mxu2 }
 0x15b   : > { %v5748_v56 = vadd.f32 %v1130_v55, %v5714_v41 }
 0x15d   : > { %6836 = vst [vmem:[#allocation26_spill] sm:$0xff] %v5748_v56  ;;  %1630 = vmatpush.msrb.mxu2 %v5748_v56 }
 0x187   : > { %v5802_v50 = vpop.permute.xlu2 %1714 }
 0x18d   : > { %v1661_v54 = vpop.permute.xlu1 %1660 }
 0x18e   : > { %4484 = vmatpush.xpose.msk.msra.mxu0 %vm1176_vm0, %v1661_v54 }
 0x18f   : > { %v5750_v57 = vpop.permute.xlu0 %1658 }
 0x197   : > { %v1689_v58 = vpop.permute.xlu0 %1688 }
 0x198   : > { %4486 = vmatpush.xpose.msk.msra.mxu1 %vm1176_vm0, %v1689_v58  ;;  %v5804_v58 = vpop.permute.xlu2 %1742 }
 0x19f   : > { %v1717_v60 = vpop.permute.xlu0 %1716 }
 0x1a0   : > { %4488 = vmatpush.xpose.msk.msra.mxu2 %vm1176_vm0, %v1717_v60 }
 0x1a1   : > { %v1200_v61 = vpop.f32.mrf.mxu3 }
 0x1a2   : > { %v1201_v62 = vadd.f32 %v5755_v59, %v1200_v61 }
 0x1a4   : > { %v1386_v63 = vsel %vm1385_vm1, %v1201_v62, -inf }
 0x1a5   : > { %1387 = vmax.xlane.f32.xlu0 %v1386_v63 }
 0x1a7   : > { %v5800_v45 = vpop.permute.xlu0 %1744 }
 0x1a9   : > { %v1226_v1 = vpop.f32.mrf.mxu3 }
 0x1aa   : > { %v1227_v2 = vadd.f32 %v5761_v0, %v1226_v1 }
 0x1ac   : > { %v1389_v3 = vsel %vm1385_vm1, %v1227_v2, -inf }
 0x1ad   : > { %1390 = vmax.xlane.f32.xlu0 %v1389_v3 }
 0x1b1   : > { %v1252_v5 = vpop.f32.mrf.mxu3 }
 0x1b2   : > { %v1253_v8 = vadd.f32 %v5766_v4, %v1252_v5 }
 0x1b4   : > { %v1392_v9 = vsel %vm1385_vm1, %v1253_v8, -inf }
 0x1b5   : > { %1393 = vmax.xlane.f32.xlu1 %v1392_v9  ;;  %v5812_v9 = vpop.permute.xlu2 %1772 }
 0x1b9   : > { %v1278_v13 = vpop.f32.mrf.mxu3 }
 0x1ba   : > { %v5774_v14 = vadd.f32 %v5771_v11, %v1278_v13 }
 0x1bc   : > { %v1395_v16 = vsel %vm1385_vm1, %v5774_v14, -inf }
 0x1bd   : > { %1396 = vmax.xlane.f32.xlu1 %v1395_v16 }
 0x1bf   : > { %v5806_v60 = vpop.permute.xlu1 %1826 }
 0x1c1   : > { %v1304_v19 = vpop.f32.mrf.mxu3 }
 0x1c2   : > { %v1305_v21 = vadd.f32 %v5779_v18, %v1304_v19 }
 0x1c4   : > { %v1398_v23 = vsel %vm1385_vm1, %v1305_v21, -inf }
 0x1c5   : > { %1399 = vmax.xlane.f32.xlu2 %v1398_v23 }
 0x1c9   : > { %v1330_v26 = vpop.f32.mrf.mxu3 }
 0x1ca   : > { %v1331_v28 = vadd.f32 %v5784_v24, %v1330_v26 }
 0x1cc   : > { %v1401_v29 = vsel %vm1385_vm1, %v1331_v28, -inf }
 0x1cd   : > { %1402 = vmax.xlane.f32.xlu1 %v1401_v29 }
 0x1d1   : > { %v1356_v33 = vpop.f32.mrf.mxu3 }
 0x1d2   : > { %v1357_v34 = vadd.f32 %v5789_v31, %v1356_v33 }
 0x1d4   : > { %v1404_v36 = vsel %vm1385_vm1, %v1357_v34, -inf }
 0x1d5   : > { %1405 = vmax.xlane.f32.xlu2 %v1404_v36 }
 0x1d9   : > { %v1382_v39 = vpop.f32.mrf.mxu3 }
 0x1da   : > { %v1383_v40 = vadd.f32 %v5794_v37, %v1382_v39 }
 0x1dc   : > { %v1407_v43 = vsel %vm1385_vm1, %v1383_v40, -inf }
 0x1dd   : > { %1408 = vmax.xlane.f32.xlu0 %v1407_v43 }
 0x1e6   : > { %1856 = vrot.lane.b32.xlu1 %v5717_v42, %s5224_s0 }
 0x218   : > { %v1388_v52 = vpop.xlane.xlu0 %1387 }
 0x219   : > { %v1410_v54 = vsub.f32 %v1201_v62, %v1388_v52 }
 0x21b   : > { %v1418_v55 = vmul.f32 1.442695, %v1410_v54 }
 0x21d   : > { %4777 = vpow2.f32 %v1418_v55 }
 0x220   : > { %v1391_v61 = vpop.xlane.xlu0 %1390 }
 0x221   : > { %v1411_v63 = vsub.f32 %v1227_v2, %v1391_v61  ;;  %v5818_v2 = vpop.permute.xlu2 %1828 }
 0x223   : > { %v5808_v1 = vpop.eup %4777  ;;  %v1420_v3 = vmul.f32 1.442695, %v1411_v63 }
 0x224   : > { %v1434_v5 = vsel %vm1385_vm1, %v5808_v1, 0.0 }
 0x225   : > { %4779 = vpow2.f32 %v1420_v3  ;;  %1435 = vadd.xlane.f32.xlu2 %v1434_v5 }
 0x228   : > { %v1394_v13 = vpop.xlane.xlu1 %1393 }
 0x229   : > { %v1412_v62 = vsub.f32 %v1253_v8, %v1394_v13 }
 0x22b   : > { %v5814_v16 = vpop.eup %4779  ;;  %v1422_v19 = vmul.f32 1.442695, %v1412_v62 }
 0x22c   : > { %v1437_v23 = vsel %vm1385_vm1, %v5814_v16, 0.0 }
 0x22d   : > { %4781 = vpow2.f32 %v1422_v19  ;;  %1438 = vadd.xlane.f32.xlu0 %v1437_v23 }
 0x230   : > { %v1397_v33 = vpop.xlane.xlu1 %1396 }
 0x231   : > { %v1413_v3 = vsub.f32 %v5774_v14, %v1397_v33 }
 0x233   : > { %v5820_v26 = vpop.eup %4781  ;;  %v1424_v5 = vmul.f32 1.442695, %v1413_v3 }
 0x234   : > { %v1440_v29 = vsel %vm1385_vm1, %v5820_v26, 0.0 }
 0x235   : > { %1441 = vadd.xlane.f32.xlu1 %v1440_v29 }
 0x238   : > { %v1400_v36 = vpop.xlane.xlu2 %1399 }
 0x239   : > { %v1414_v39 = vsub.f32 %v1305_v21, %v1400_v36 }
 0x23b   : > { %v1426_v8 = vmul.f32 1.442695, %v1414_v39 }
 0x23d   : > { %4783 = vpow2.f32 %v1426_v8  ;;  %1770 = vrot.lane.b32.xlu2 %v5681_v27, %s5224_s0  ;;  %v5843_v8 = vadd.f32 %v5734_v48, %v5714_v41  ;;  %v5860_v48 = vpack.i.bf16 %v5739_v51, %v5729_v47 }
 0x23f   : > { %v4678_v33 = vpack.i.bf16 %v5721_v44, %v5843_v8 }
 0x240   : > { %v1403_v43 = vpop.xlane.xlu1 %1402 }
 0x241   : > { %v1415_v52 = vsub.f32 %v1331_v28, %v1403_v43  ;;  %1686 = vrot.lane.b32.xlu0 %v5641_v12, %s5224_s0 }
 0x243   : > { %v5828_v54 = vpop.eup %4783  ;;  %v1428_v55 = vmul.f32 1.442695, %v1415_v52  ;;  %v1133_v52 = vpop.f32.mrf.mxu2 }
 0x244   : > { %v1446_v61 = vsel %vm1385_vm1, %v5828_v54, 0.0 }
 0x245   : > { %4785 = vpow2.f32 %v1428_v55  ;;  %1447 = vadd.xlane.f32.xlu1 %v1446_v61  ;;  %v5865_v55 = vadd.f32 %v1133_v52, %v5714_v41 }
 0x246   : > { %4787 = vpow2.f32 %v1424_v5 }
 0x247   : > { %v4693_v61 = vpack.i.bf16 %v5743_v53, %v5865_v55 }
 0x248   : > { %v1406_v28 = vpop.xlane.xlu2 %1405 }
 0x249   : > { %v1416_v13 = vsub.f32 %v1357_v34, %v1406_v28 }
 0x24b   : > { %v5832_v63 = vpop.eup %4785  ;;  %v1430_v23 = vmul.f32 1.442695, %v1416_v13 }
 0x24c   : > { %v1449_v21 = vsel %vm1385_vm1, %v5832_v63, 0.0  ;;  %v5837_v36 = vpop.eup %4787 }
 0x24d   : > { %1450 = vadd.xlane.f32.xlu1 %v1449_v21  ;;  %4789 = vpow2.f32 %v1430_v23  ;;  %v1443_v39 = vsel %vm1385_vm1, %v5837_v36, 0.0  ;;  %v5874_v21 = vadd.f32 %v5736_v49, %v5714_v41 }
 0x24f   : > { %6837 = vst [vmem:[#allocation27_spill] sm:$0xff] %v5874_v21  ;;  %v5884_v3 = vpack.i.bf16 %v5748_v56, %v5874_v21 }
 0x250   : > { %v1409_v62 = vpop.xlane.xlu0 %1408 }
 0x251   : > { %v1417_v19 = vsub.f32 %v1383_v40, %v1409_v62 }
 0x253   : > { %v1432_v29 = vmul.f32 1.442695, %v1417_v19  ;;  %v5847_v14 = vpop.eup %4789 }
 0x254   : > { %v1452_v40 = vsel %vm1385_vm1, %v5847_v14, 0.0 }
 0x255   : > { %4791 = vpow2.f32 %v1432_v29 }
 0x258   : > { %v1857_v28 = vpop.permute.xlu1 %1856 }
 0x25b   : > { %v5849_v34 = vpop.eup %4791 }
 0x25c   : > { %v1455_v43 = vsel %vm1385_vm1, %v5849_v34, 0.0 }
 0x266   : > { %1854 = vrot.lane.b32.xlu1 %v5723_v46, %s5224_s0  ;;  %1444 = vadd.xlane.f32.xlu2 %v1443_v39 }
 0x26b   : > { %1453 = vadd.xlane.f32.xlu0 %v1452_v40 }
 0x26e   : > { %4679 = vrot.lane.b32.xlu1 %v4678_v33, %s5224_s0  ;;  %1456 = vadd.xlane.f32.xlu2 %v1455_v43 }
 0x276   : > { %4689 = vrot.lane.b32.xlu1 %v5860_v48, %s5224_s0 }
 0x27e   : > { %4694 = vrot.lane.b32.xlu1 %v4693_v61, %s5224_s0 }
 0x27f   : > { %1800 = vrot.lane.b32.xlu0 %v5690_v30, %s5224_s0 }
 0x286   : > { %2242 = vrot.lane.b32.xlu1 %v5653_v17, %s5225_s19  ;;  %1798 = vrot.lane.b32.xlu2 %v5693_v32, %s5224_s0 }
 0x287   : > { %2244 = vrot.lane.b32.xlu0 %v5650_v15, %s5225_s19 }
 0x28e   : > { %2356 = vrot.lane.b32.xlu1 %v5700_v35, %s5225_s19  ;;  %4684 = vrot.lane.b32.xlu2 %v5884_v3, %s5224_s0 }
 0x28f   : > { %2272 = vrot.lane.b32.xlu0 %v5664_v20, %s5225_s19 }
 0x296   : > { %2270 = vrot.lane.b32.xlu1 %v5667_v22, %s5225_s19  ;;  %2188 = vrot.lane.b32.xlu2 %v5625_v6, %s5225_s19 }
 0x297   : > { %2300 = vrot.lane.b32.xlu0 %v5678_v25, %s5225_s19 }
 0x298   : > { %v1436_v41 = vpop.xlane.xlu2 %1435 }
 0x299   : > { %4793 = vrcp.f32 %v1436_v41 }
 0x29e   : > { %2186 = vrot.lane.b32.xlu2 %v5627_v7, %s5225_s19 }
 0x29f   : > { %v4794_v49 = vpop.eup %4793 }
 0x2a0   : > { %v1466_v5 = vmul.f32 %v4794_v49, %v5808_v1  ;;  %v1439_v13 = vpop.xlane.xlu0 %1438 }
 0x2a1   : > { %4795 = vrcp.f32 %v1439_v13 }
 0x2a2   : > { %4476 = vmatmul.msk.f32.vlgmr.msra.gmra.mxu3 %vm1385_vm1, %v1466_v5 }
 0x2a3   : > { %1538 = vmatpush.msra.mxu3 %v5843_v8 }
 0x2a6   : > { %2216 = vrot.lane.b32.xlu2 %v5638_v10, %s5225_s19 }
 0x2a7   : > { %v4796_v62 = vpop.eup %4795 }
 0x2a8   : > { %v1467_v19 = vmul.f32 %v4796_v62, %v5814_v16  ;;  %v1442_v23 = vpop.xlane.xlu1 %1441 }
 0x2a9   : > { %4797 = vrcp.f32 %v1442_v23 }
 0x2aa   : > { %4477 = vmatmul.msk.f32.vlgmr.msrb.gmra.mxu3 %vm1385_vm1, %v1467_v19 }
 0x2ab   : > { %1561 = vmatpush.msrb.mxu3 %v5874_v21 }
 0x2ae   : > { %2354 = vrot.lane.b32.xlu2 %v5703_v38, %s5225_s19 }
 0x2af   : > { %v4798_v1 = vpop.eup %4797 }
 0x2b0   : > { %v1468_v29 = vmul.f32 %v4798_v1, %v5820_v26  ;;  %v1771_v26 = vpop.permute.xlu2 %1770 }
 0x2b2   : > { %4478 = vmatmul.msk.f32.vlgmr.msra.gmra.mxu3 %vm1385_vm1, %v1468_v29 }
 0x2b3   : > { %1653 = vmatpush.msra.mxu3 %v5865_v55  ;;  %v1687_v61 = vpop.permute.xlu0 %1686 }
 0x2b8   : > { %v1448_v39 = vpop.xlane.xlu1 %1447 }
 0x2b9   : > { %4799 = vrcp.f32 %v1448_v39 }
 0x2bf   : > { %v4800_v40 = vpop.eup %4799 }
 0x2c0   : > { %v1451_v16 = vpop.xlane.xlu1 %1450  ;;  %v1470_v33 = vmul.f32 %v4800_v40, %v5828_v54 }
 0x2c1   : > { %4801 = vrcp.f32 %v1451_v16 }
 0x2c2   : > { %4480 = vmatmul.msk.f32.vlgmr.msrb.gmra.mxu0 %vm1385_vm1, %v1470_v33 }
 0x2c3   : > { %4492 = vmatpush.xpose.msk.msrb.mxu0 %vm1176_vm0, %v5812_v9 }
 0x2c7   : > { %v4802_v43 = vpop.eup %4801 }
 0x2c8   : > { %v1471_v52 = vmul.f32 %v4802_v43, %v5832_v63 }
 0x2ca   : > { %4481 = vmatmul.msk.f32.vlgmr.msrb.gmra.mxu1 %vm1385_vm1, %v1471_v52  ;;  %4485 = vmatmul.msk.f32.vlgmr.msra.gmra.mxu0 %vm1176_vm0, %v5750_v57 }
 0x2d2   : > { %4487 = vmatmul.msk.f32.vlgmr.msra.gmra.mxu1 %vm1176_vm0, %v1687_v61  ;;  %4493 = vmatmul.msk.f32.vlgmr.msrb.gmra.mxu0 %vm1176_vm0, %v1771_v26 }
 0x2d8   : > { %v1855_v54 = vpop.permute.xlu1 %1854 }
 0x2d9   : > { %v1445_v41 = vpop.xlane.xlu2 %1444 }
 0x2da   : > { %4803 = vrcp.f32 %v1445_v41 }
 0x2de   : > { %v1454_v49 = vpop.xlane.xlu0 %1453 }
 0x2df   : > { %4805 = vrcp.f32 %v1454_v49 }
 0x2e0   : > { %v4804_v9 = vpop.eup %4803  ;;  %v4680_v5 = vpop.permute.xlu1 %4679 }
 0x2e1   : > { %v1469_v63 = vmul.f32 %v4804_v9, %v5837_v36  ;;  %v4682_v13 = vunpack.i.h.bf16 %v4680_v5  ;;  %v1457_v62 = vpop.xlane.xlu2 %1456 }
 0x2e2   : > { %4807 = vrcp.f32 %v1457_v62 }
 0x2e3   : > { %4479 = vmatmul.msk.f32.vlgmr.msrb.gmra.mxu3 %vm1385_vm1, %v1469_v63  ;;  %1992 = vmatpush.msra.mxu0 %v4682_v13 }
 0x2e4   : > { %4490 = vmatpush.xpose.msk.msrb.mxu3 %vm1176_vm0, %v5800_v45  ;;  %v4681_v45 = vunpack.i.l.bf16 %v4680_v5 }
 0x2e5   : > { %v4806_v57 = vpop.eup %4805 }
 0x2e6   : > { %v1472_v19 = vmul.f32 %v4806_v57, %v5847_v14 }
 0x2e8   : > { %v4808_v23 = vpop.eup %4807  ;;  %v4690_v1 = vpop.permute.xlu1 %4689  ;;  %4482 = vmatmul.msk.f32.vlgmr.msrb.gmra.mxu2 %vm1385_vm1, %v1472_v19 }
 0x2e9   : > { %v1473_v29 = vmul.f32 %v4808_v23, %v5849_v34  ;;  %v4692_v39 = vunpack.i.h.bf16 %v4690_v1  ;;  %4496 = vmatpush.xpose.msk.msrb.mxu2 %vm1176_vm0, %v5818_v2  ;;  %v1799_v36 = vpop.permute.xlu2 %1798  ;;  %v4691_v40 = vunpack.i.l.bf16 %v4690_v1 }
 0x2eb   : > { %4483 = vmatmul.msk.f32.vlgmr.msra.gmra.mxu3 %vm1385_vm1, %v1473_v29  ;;  %2100 = vmatpush.msrb.mxu0 %v4692_v39 }
 0x2ec   : > { %4498 = vmatpush.xpose.msk.msra.mxu3 %vm1176_vm0, %v1857_v28 }
 0x2f0   : > { %v4695_v16 = vpop.permute.xlu1 %4694  ;;  %4489 = vmatmul.msk.f32.vlgmr.msra.gmra.mxu2 %vm1176_vm0, %v5802_v50 }
 0x2f1   : > { %v4685_v14 = vpop.permute.xlu2 %4684  ;;  %v1801_v33 = vpop.permute.xlu0 %1800  ;;  %2046 = vmatpush.msra.mxu2 %v4681_v45  ;;  %v4697_v34 = vunpack.i.h.bf16 %v4695_v16  ;;  %v4696_v28 = vunpack.i.l.bf16 %v4695_v16 }
 0x2f2   : > { %v4686_v43 = vunpack.i.l.bf16 %v4685_v14  ;;  %4494 = vmatpush.xpose.msk.msrb.mxu1 %vm1176_vm0, %v1801_v33  ;;  %v4687_v2 = vunpack.i.h.bf16 %v4685_v14 }
 0x2f3   : > { %4491 = vmatmul.msk.f32.vlgmr.msrb.gmra.mxu3 %vm1176_vm0, %v5804_v58 }
 0x2f4   : > { %2073 = vmatpush.msrb.mxu3 %v4686_v43 }
 0x2f5   : > { %4495 = vmatmul.msk.f32.vlgmr.msrb.gmra.mxu1 %vm1176_vm0, %v1799_v36 }
 0x2f6   : > { %2019 = vmatpush.msra.mxu1 %v4691_v40 }
 0x2f8   : > { %2127 = vmatpush.msrb.mxu1 %v4697_v34  ;;  %4497 = vmatmul.msk.f32.vlgmr.msrb.gmra.mxu2 %vm1176_vm0, %v5806_v60 }
 0x2f9   : > { %2154 = vmatpush.msrb.mxu2 %v4687_v2 }
 0x2fb   : > { %4499 = vmatmul.msk.f32.vlgmr.msra.gmra.mxu3 %vm1176_vm0, %v1855_v54 }
 0x2fc   : > { %2181 = vmatpush.msra.mxu3 %v4696_v28 }
 0x325   : > { %v5948_v61 = vpop.f32.mrf.mxu3 }
 0x326   : > { %6840 = vst [vmem:[#allocation30_spill] sm:$0xff] %v5948_v61 }
 0x32d   : > { %v5955_v13 = vpop.f32.mrf.mxu3 }
 0x32e   : > { %6841 = vst [vmem:[#allocation31_spill] sm:$0xff] %v5955_v13 }
 0x335   : > { %v5957_v62 = vpop.f32.mrf.mxu3 }
 0x336   : > { %6842 = vst [vmem:[#allocation32_spill] sm:$0xff] %v5957_v62 }
 0x33f   : > { %v5943_v50 = vpop.f32.mrf.mxu0 }
 0x340   : > { %6838 = vst [vmem:[#allocation28_spill] sm:$0xff] %v5943_v50 }
 0x347   : > { %v5945_v52 = vpop.f32.mrf.mxu1  ;;  %v1683_v26 = vpop.f32.mrf.mxu0 }
 0x348   : > { %6839 = vst [vmem:[#allocation29_spill] sm:$0xff] %v5945_v52  ;;  %v1684_v58 = vadd.f32 %v5755_v59, %v1683_v26 }
 0x34a   : > { %v1882_v41 = vsel %vm1385_vm1, %v1684_v58, -inf }
 0x34b   : > { %1883 = vmax.xlane.f32.xlu0 %v1882_v41 }
 0x34f   : > { %v1711_v49 = vpop.f32.mrf.mxu1  ;;  %v1795_v9 = vpop.f32.mrf.mxu0 }
 0x350   : > { %v1712_v60 = vadd.f32 %v5761_v0, %v1711_v49  ;;  %v1796_v5 = vadd.f32 %v5779_v18, %v1795_v9  ;;  %v5982_v49 = vpop.permute.xlu2 %2188  ;;  %v5986_v9 = vpop.permute.xlu0 %2244 }
 0x352   : > { %v1894_v54 = vsel %vm1385_vm1, %v1796_v5, -inf  ;;  %v1885_v63 = vsel %vm1385_vm1, %v1712_v60, -inf }
 0x353   : > { %1895 = vmax.xlane.f32.xlu2 %v1894_v54  ;;  %1886 = vmax.xlane.f32.xlu0 %v1885_v63 }
 0x358   : > { %v5988_v54 = vpop.permute.xlu2 %2186  ;;  %v5990_v63 = vpop.permute.xlu0 %2272 }
 0x366   : > { %v5959_v57 = vpop.f32.mrf.mxu3 }
 0x367   : > { %6843 = vst [vmem:[#allocation33_spill] sm:$0xff] %v5959_v57  ;;  %v6002_v57 = vpop.permute.xlu1 %2242 }
 0x36b   : > { %v5961_v19 = vpop.f32.mrf.mxu2 }
 0x36c   : > { %6844 = vst [vmem:[#allocation34_spill] sm:$0xff] %v5961_v19 }
 0x36e   : > { %v5963_v23 = vpop.f32.mrf.mxu3 }
 0x36f   : > { %6845 = vst [vmem:[#allocation35_spill] sm:$0xff] %v5963_v23 }
 0x372   : > { %v1823_v1 = vpop.f32.mrf.mxu1 }
 0x373   : > { %v1824_v29 = vadd.f32 %v5784_v24, %v1823_v1  ;;  %v1739_v39 = vpop.f32.mrf.mxu2  ;;  %v5992_v1 = vpop.permute.xlu2 %2216 }
 0x374   : > { %v1740_v36 = vadd.f32 %v5766_v4, %v1739_v39  ;;  %v5994_v39 = vpop.permute.xlu0 %2300 }
 0x375   : > { %v1897_v45 = vsel %vm1385_vm1, %v1824_v29, -inf }
 0x376   : > { %v1767_v40 = vpop.f32.mrf.mxu3  ;;  %1898 = vmax.xlane.f32.xlu0 %v1897_v45  ;;  %v1888_v16 = vsel %vm1385_vm1, %v1740_v36, -inf }
 0x377   : > { %v1768_v14 = vadd.f32 %v5771_v11, %v1767_v40  ;;  %1889 = vmax.xlane.f32.xlu1 %v1888_v16 }
 0x379   : > { %v1891_v33 = vsel %vm1385_vm1, %v1768_v14, -inf }
 0x37a   : > { %1892 = vmax.xlane.f32.xlu2 %v1891_v33 }
 0x37b   : > { %v1851_v34 = vpop.f32.mrf.mxu2  ;;  %v5996_v45 = vpop.permute.xlu2 %2354 }
 0x37c   : > { %v1852_v43 = vadd.f32 %v5789_v31, %v1851_v34 }
 0x37e   : > { %v1900_v2 = vsel %vm1385_vm1, %v1852_v43, -inf  ;;  %v1879_v28 = vpop.f32.mrf.mxu3 }
 0x37f   : > { %1901 = vmax.xlane.f32.xlu1 %v1900_v2  ;;  %v5974_v26 = vadd.f32 %v5794_v37, %v1879_v28 }
 0x381   : > { %v1903_v41 = vsel %vm1385_vm1, %v5974_v26, -inf }
 0x387   : > { %1904 = vmax.xlane.f32.xlu1 %v1903_v41 }
 0x38a   : > { %2214 = vrot.lane.b32.xlu0 %v5641_v12, %s5225_s19 }
 0x392   : > { %2384 = vrot.lane.b32.xlu2 %v5717_v42, %s5225_s19 }
 0x3a0   : > { %2298 = vrot.lane.b32.xlu1 %v5681_v27, %s5225_s19 }
 0x3be   : > { %v1884_v40 = vpop.xlane.xlu0 %1883 }
 0x3bf   : > { %v1906_v16 = vsub.f32 %v1684_v58, %v1884_v40  ;;  %v6012_v40 = vpop.permute.xlu1 %2356 }
 0x3c1   : > { %v1914_v33 = vmul.f32 1.442695, %v1906_v16 }
 0x3c3   : > { %4809 = vpow2.f32 %v1914_v33 }
 0x3c6   : > { %v1896_v34 = vpop.xlane.xlu2 %1895  ;;  %v1887_v2 = vpop.xlane.xlu0 %1886 }
 0x3c7   : > { %v1910_v28 = vsub.f32 %v1796_v5, %v1896_v34  ;;  %v1907_v41 = vsub.f32 %v1712_v60, %v1887_v2  ;;  %v6014_v16 = vpop.permute.xlu1 %2270 }
 0x3c9   : > { %v5998_v23 = vpop.eup %4809  ;;  %v1922_v19 = vmul.f32 1.442695, %v1910_v28  ;;  %v1916_v52 = vmul.f32 1.442695, %v1907_v41 }
 0x3ca   : > { %v1930_v50 = vsel %vm1385_vm1, %v5998_v23, 0.0 }
 0x3cb   : > { %4811 = vpow2.f32 %v1922_v19  ;;  %1931 = vadd.xlane.f32.xlu1 %v1930_v50 }
 0x3cc   : > { %4813 = vpow2.f32 %v1916_v52 }
 0x3d1   : > { %v6004_v62 = vpop.eup %4811 }
 0x3d2   : > { %v6006_v58 = vpop.eup %4813  ;;  %v1942_v5 = vsel %vm1385_vm1, %v6004_v62, 0.0 }
 0x3d3   : > { %1943 = vadd.xlane.f32.xlu2 %v1942_v5  ;;  %v1933_v60 = vsel %vm1385_vm1, %v6006_v58, 0.0 }
 0x3d4   : > { %1934 = vadd.xlane.f32.xlu0 %v1933_v60 }
 0x3e4   : > { %2382 = vrot.lane.b32.xlu1 %v5723_v46, %s5225_s19 }
 0x3e9   : > { %v1899_v50 = vpop.xlane.xlu0 %1898 }
 0x3ea   : > { %v1911_v52 = vsub.f32 %v1824_v29, %v1899_v50  ;;  %v1890_v19 = vpop.xlane.xlu1 %1889 }
 0x3eb   : > { %v1908_v33 = vsub.f32 %v1740_v36, %v1890_v19 }
 0x3ec   : > { %v1924_v34 = vmul.f32 1.442695, %v1911_v52  ;;  %2708 = vrot.lane.b32.xlu1 %v5625_v6, %s5226_s29 }
 0x3ed   : > { %v1918_v2 = vmul.f32 1.442695, %v1908_v33  ;;  %v1893_v28 = vpop.xlane.xlu2 %1892 }
 0x3ee   : > { %4815 = vpow2.f32 %v1924_v34  ;;  %v1909_v41 = vsub.f32 %v1768_v14, %v1893_v28  ;;  %v4713_v34 = vpack.i.bf16 %v5865_v55, %v5743_v53 }
 0x3ef   : > { %4817 = vpow2.f32 %v1918_v2 }
 0x3f0   : > { %v1920_v5 = vmul.f32 1.442695, %v1909_v41 }
 0x3f2   : > { %v1902_v60 = vpop.xlane.xlu1 %1901  ;;  %4819 = vpow2.f32 %v1920_v5 }
 0x3f3   : > { %v1912_v13 = vsub.f32 %v1852_v43, %v1902_v60 }
 0x3f4   : > { %v4816_v61 = vpop.eup %4815 }
 0x3f5   : > { %v4818_v21 = vpop.eup %4817  ;;  %v1926_v56 = vmul.f32 1.442695, %v1912_v13  ;;  %v1945_v29 = vsel %vm1385_vm1, %v4816_v61, 0.0 }
 0x3f6   : > { %1946 = vadd.xlane.f32.xlu0 %v1945_v29  ;;  %v1936_v36 = vsel %vm1385_vm1, %v4818_v21, 0.0 }
 0x3f7   : > { %4821 = vpow2.f32 %v1926_v56  ;;  %1937 = vadd.xlane.f32.xlu2 %v1936_v36 }
 0x3f8   : > { %v6022_v6 = vpop.eup %4819 }
 0x3f9   : > { %v1939_v43 = vsel %vm1385_vm1, %v6022_v6, 0.0 }
 0x3fa   : > { %v1905_v50 = vpop.xlane.xlu1 %1904 }
 0x3fb   : > { %v1913_v14 = vsub.f32 %v5974_v26, %v1905_v50  ;;  %v4698_v26 = vpack.i.bf16 %v5843_v8, %v5721_v44 }
 0x3fc   : > { %v2215_v41 = vpop.permute.xlu0 %2214 }
 0x3fd   : > { %v4822_v52 = vpop.eup %4821  ;;  %v1928_v19 = vmul.f32 1.442695, %v1913_v14 }
 0x3fe   : > { %1940 = vadd.xlane.f32.xlu0 %v1939_v43  ;;  %v1948_v13 = vsel %vm1385_vm1, %v4822_v52, 0.0 }
 0x3ff   : > { %4823 = vpow2.f32 %v1928_v19  ;;  %1949 = vadd.xlane.f32.xlu2 %v1948_v13 }
 0x405   : > { %v6028_v33 = vpop.eup %4823 }
 0x406   : > { %v1951_v56 = vsel %vm1385_vm1, %v6028_v33, 0.0 }
 0x407   : > { %1952 = vadd.xlane.f32.xlu0 %v1951_v56 }
 0x412   : > { %v2299_v2 = vpop.permute.xlu1 %2298 }
 0x417   : > { %2326 = vrot.lane.b32.xlu2 %v5693_v32, %s5225_s19 }
 0x41b   : > { %2328 = vrot.lane.b32.xlu0 %v5690_v30, %s5225_s19 }
 0x41f   : > { %4704 = vrot.lane.b32.xlu2 %v5860_v48, %s5225_s19  ;;  %v2385_v48 = vpop.permute.xlu2 %2384 }
 0x423   : > { %4699 = vrot.lane.b32.xlu0 %v4698_v26, %s5225_s19 }
 0x427   : > { %2764 = vrot.lane.b32.xlu2 %v5650_v15, %s5226_s29 }
 0x42b   : > { %4709 = vrot.lane.b32.xlu0 %v5884_v3, %s5225_s19 }
 0x433   : > { %4714 = vrot.lane.b32.xlu0 %v4713_v34, %s5225_s19 }
 0x43b   : > { %2706 = vrot.lane.b32.xlu0 %v5627_v7, %s5226_s29 }
 0x43e   : > { %v1932_v28 = vpop.xlane.xlu1 %1931 }
 0x43f   : > { %4825 = vrcp.f32 %v1932_v28 }
 0x445   : > { %v4826_v5 = vpop.eup %4825 }
 0x446   : > { %v1962_v60 = vmul.f32 %v4826_v5, %v5998_v23  ;;  %v1944_v15 = vpop.xlane.xlu2 %1943 }
 0x447   : > { %4827 = vrcp.f32 %v1944_v15  ;;  %v1935_v29 = vpop.xlane.xlu0 %1934 }
 0x448   : > { %4829 = vrcp.f32 %v1935_v29  ;;  %4500 = vmatmul.msk.f32.vlgmr.msra.gmra.mxu0 %vm1385_vm1, %v1962_v60 }
 0x449   : > { %4508 = vmatpush.xpose.msk.msra.mxu0 %vm1176_vm0, %v5982_v49 }
 0x44d   : > { %v4828_v3 = vpop.eup %4827 }
 0x44e   : > { %v4830_v36 = vpop.eup %4829  ;;  %v1966_v7 = vmul.f32 %v4828_v3, %v6004_v62 }
 0x44f   : > { %v1963_v50 = vmul.f32 %v4830_v36, %v6006_v58 }
 0x450   : > { %4504 = vmatmul.msk.f32.vlgmr.msrb.gmra.mxu0 %vm1385_vm1, %v1966_v7 }
 0x451   : > { %4501 = vmatmul.msk.f32.vlgmr.msra.gmra.mxu1 %vm1385_vm1, %v1963_v50  ;;  %4516 = vmatpush.xpose.msk.msrb.mxu0 %vm1176_vm0, %v5994_v39 }
 0x452   : > { %4510 = vmatpush.xpose.msk.msra.mxu1 %vm1176_vm0, %v5992_v1 }
 0x458   : > { %4509 = vmatmul.msk.f32.vlgmr.msra.gmra.mxu0 %vm1176_vm0, %v5988_v54 }
 0x460   : > { %4517 = vmatmul.msk.f32.vlgmr.msrb.gmra.mxu0 %vm1176_vm0, %v2299_v2 }
 0x469   : > { %v1947_v23 = vpop.xlane.xlu0 %1946 }
 0x46a   : > { %4831 = vrcp.f32 %v1947_v23  ;;  %v1938_v62 = vpop.xlane.xlu2 %1937 }
 0x46b   : > { %4833 = vrcp.f32 %v1938_v62 }
 0x470   : > { %v4832_v49 = vpop.eup %4831 }
 0x471   : > { %v4834_v58 = vpop.eup %4833  ;;  %v1967_v14 = vmul.f32 %v4832_v49, %v4816_v61  ;;  %v1941_v19 = vpop.xlane.xlu0 %1940 }
 0x472   : > { %v1964_v43 = vmul.f32 %v4834_v58, %v4818_v21  ;;  %4835 = vrcp.f32 %v1941_v19  ;;  %v1950_v13 = vpop.xlane.xlu2 %1949 }
 0x473   : > { %4837 = vrcp.f32 %v1950_v13  ;;  %4505 = vmatmul.msk.f32.vlgmr.msrb.gmra.mxu1 %vm1385_vm1, %v1967_v14 }
 0x474   : > { %4502 = vmatmul.msk.f32.vlgmr.msra.gmra.mxu2 %vm1385_vm1, %v1964_v43 }
 0x475   : > { %4512 = vmatpush.xpose.msk.msra.mxu2 %vm1176_vm0, %v5986_v9 }
 0x478   : > { %v4836_v54 = vpop.eup %4835 }
 0x479   : > { %v4838_v1 = vpop.eup %4837  ;;  %v1965_v39 = vmul.f32 %v4836_v54, %v6022_v6 }
 0x47a   : > { %v1968_v56 = vmul.f32 %v4838_v1, %v4822_v52  ;;  %v1953_v26 = vpop.xlane.xlu0 %1952  ;;  %v2327_v21 = vpop.permute.xlu2 %2326 }
 0x47b   : > { %4839 = vrcp.f32 %v1953_v26  ;;  %4503 = vmatmul.msk.f32.vlgmr.msrb.gmra.mxu3 %vm1385_vm1, %v1965_v39  ;;  %4511 = vmatmul.msk.f32.vlgmr.msra.gmra.mxu1 %vm1176_vm0, %v2215_v41  ;;  %v2383_v52 = vpop.permute.xlu1 %2382 }
 0x47c   : > { %4514 = vmatpush.xpose.msk.msrb.mxu3 %vm1176_vm0, %v5990_v63  ;;  %4506 = vmatmul.msk.f32.vlgmr.msrb.gmra.mxu2 %vm1385_vm1, %v1968_v56 }
 0x47d   : > { %4520 = vmatpush.xpose.msk.msrb.mxu2 %vm1176_vm0, %v6012_v40 }
 0x481   : > { %v4840_v61 = vpop.eup %4839 }
 0x482   : > { %v1969_v9 = vmul.f32 %v4840_v61, %v6028_v33  ;;  %v4705_v6 = vpop.permute.xlu2 %4704 }
 0x483   : > { %v4706_v63 = vunpack.i.l.bf16 %v4705_v6  ;;  %v4707_v2 = vunpack.i.h.bf16 %v4705_v6 }
 0x484   : > { %4507 = vmatmul.msk.f32.vlgmr.msra.gmra.mxu3 %vm1385_vm1, %v1969_v9  ;;  %4513 = vmatmul.msk.f32.vlgmr.msra.gmra.mxu2 %vm1176_vm0, %v6002_v57 }
 0x485   : > { %4522 = vmatpush.xpose.msk.msra.mxu3 %vm1176_vm0, %v2385_v48 }
 0x48c   : > { %4515 = vmatmul.msk.f32.vlgmr.msrb.gmra.mxu3 %vm1176_vm0, %v6014_v16  ;;  %4521 = vmatmul.msk.f32.vlgmr.msrb.gmra.mxu2 %vm1176_vm0, %v5996_v45 }
 0x48d   : > { %v2329_v40 = vpop.permute.xlu0 %2328 }
 0x48e   : > { %4518 = vmatpush.xpose.msk.msrb.mxu1 %vm1176_vm0, %v2329_v40 }
 0x491   : > { %4519 = vmatmul.msk.f32.vlgmr.msrb.gmra.mxu1 %vm1176_vm0, %v2327_v21 }
 0x492   : > { %2545 = vmatpush.msra.mxu1 %v4706_v63 }
 0x494   : > { %4523 = vmatmul.msk.f32.vlgmr.msra.gmra.mxu3 %vm1176_vm0, %v2383_v52 }
 0x495   : > { %v4700_v57 = vpop.permute.xlu0 %4699 }
 0x496   : > { %v4702_v33 = vunpack.i.h.bf16 %v4700_v57  ;;  %v4701_v34 = vunpack.i.l.bf16 %v4700_v57 }
 0x498   : > { %2519 = vmatpush.msra.mxu0 %v4701_v34  ;;  %2571 = vmatpush.msra.mxu2 %v4702_v33 }
 0x49a   : > { %2623 = vmatpush.msrb.mxu0 %v4707_v2 }
 0x49d   : > { %v4710_v16 = vpop.permute.xlu0 %4709 }
 0x49e   : > { %v4712_v48 = vunpack.i.h.bf16 %v4710_v16  ;;  %v4711_v45 = vunpack.i.l.bf16 %v4710_v16 }
 0x4a0   : > { %2597 = vmatpush.msrb.mxu3 %v4711_v45  ;;  %2675 = vmatpush.msrb.mxu2 %v4712_v48 }
 0x4a5   : > { %v4715_v28 = vpop.permute.xlu0 %4714 }
 0x4a6   : > { %v4717_v41 = vunpack.i.h.bf16 %v4715_v28  ;;  %v4716_v5 = vunpack.i.l.bf16 %v4715_v28 }
 0x4a8   : > { %2649 = vmatpush.msrb.mxu1 %v4716_v5  ;;  %2701 = vmatpush.msra.mxu3 %v4717_v41 }
 0x4c5   : > { %v6089_v60 = vpop.f32.mrf.mxu0 }
 0x4cd   : > { %v6091_v15 = vpop.f32.mrf.mxu0 }
 0x4ce   : > { %v6093_v29 = vpop.f32.mrf.mxu1 }
 0x4cf   : > { %v4733_v3 = vpack.i.bf16 %v6093_v29, %v6089_v60 }
 0x4d5   : > { %v2211_v36 = vpop.f32.mrf.mxu0 }
 0x4d6   : > { %v2212_v7 = vadd.f32 %v5755_v59, %v2211_v36 }
 0x4d8   : > { %v2410_v50 = vsel %vm1385_vm1, %v2212_v7, -inf }
 0x4d9   : > { %2411 = vmax.xlane.f32.xlu0 %v2410_v50  ;;  %v2709_v50 = vpop.permute.xlu1 %2708 }
 0x4dd   : > { %v2323_v23 = vpop.f32.mrf.mxu0 }
 0x4de   : > { %v2324_v62 = vadd.f32 %v5779_v18, %v2323_v23 }
 0x4e0   : > { %v2422_v49 = vsel %vm1385_vm1, %v2324_v62, -inf }
 0x4e1   : > { %2423 = vmax.xlane.f32.xlu0 %v2422_v49 }
 0x4f0   : > { %v6101_v58 = vpop.f32.mrf.mxu1 }
 0x4f1   : > { %v4758_v14 = vpack.i.bf16 %v6101_v58, %v6091_v15  ;;  %v3363_v15 = vld [vmem:[%s5493_s14 + $0x78] sm:$0xff]  ;;  %v3362_v58 = vld [vmem:[%s5493_s14 + $0x70] sm:$0xff] }
 0x4f7   : > { %v6105_v19 = vpop.f32.mrf.mxu2 }
 0x4f8   : > { %v2239_v43 = vpop.f32.mrf.mxu1 }
 0x4f9   : > { %v2240_v13 = vadd.f32 %v5761_v0, %v2239_v43 }
 0x4fb   : > { %v2413_v59 = vsel %vm1385_vm1, %v2240_v13, -inf }
 0x4fc   : > { %2414 = vmax.xlane.f32.xlu2 %v2413_v59 }
 0x4fe   : > { %v6109_v54 = vpop.f32.mrf.mxu3 }
 0x4ff   : > { %v4748_v18 = vpack.i.bf16 %v6109_v54, %v6105_v19  ;;  %v6113_v1 = vpop.f32.mrf.mxu2 }
 0x507   : > { %v6115_v39 = vpop.f32.mrf.mxu3  ;;  %v2267_v56 = vpop.f32.mrf.mxu2 }
 0x508   : > { %v2268_v26 = vadd.f32 %v5766_v4, %v2267_v56  ;;  %v6131_v4 = vpop.permute.xlu0 %2706 }
 0x50a   : > { %v2416_v21 = vsel %vm1385_vm1, %v2268_v26, -inf }
 0x50b   : > { %2417 = vmax.xlane.f32.xlu1 %v2416_v21 }
 0x50e   : > { %v2351_v61 = vpop.f32.mrf.mxu1 }
 0x50f   : > { %v2352_v0 = vadd.f32 %v5784_v24, %v2351_v61  ;;  %v2295_v9 = vpop.f32.mrf.mxu3  ;;  %v2379_v6 = vpop.f32.mrf.mxu2 }
 0x510   : > { %v2296_v63 = vadd.f32 %v5771_v11, %v2295_v9  ;;  %v2380_v40 = vadd.f32 %v5789_v31, %v2379_v6 }
 0x511   : > { %v2425_v52 = vsel %vm1385_vm1, %v2352_v0, -inf }
 0x512   : > { %2426 = vmax.xlane.f32.xlu0 %v2425_v52  ;;  %v2428_v57 = vsel %vm1385_vm1, %v2380_v40, -inf  ;;  %v2419_v33 = vsel %vm1385_vm1, %v2296_v63, -inf }
 0x513   : > { %2429 = vmax.xlane.f32.xlu2 %v2428_v57  ;;  %2420 = vmax.xlane.f32.xlu1 %v2419_v33 }
 0x517   : > { %v2407_v31 = vpop.f32.mrf.mxu3 }
 0x518   : > { %v6134_v2 = vadd.f32 %v5794_v37, %v2407_v31  ;;  %v6143_v37 = vpop.permute.xlu2 %2764 }
 0x526   : > { %2762 = vrot.lane.b32.xlu0 %v5653_v17, %s5226_s29  ;;  %v2431_v17 = vsel %vm1385_vm1, %v6134_v2, -inf }
 0x52b   : > { %2736 = vrot.lane.b32.xlu2 %v5638_v10, %s5226_s29 }
 0x52c   : > { %2734 = vrot.lane.b32.xlu1 %v5641_v12, %s5226_s29 }
 0x54c   : > { %v2412_v11 = vpop.xlane.xlu0 %2411 }
 0x54d   : > { %v2434_v24 = vsub.f32 %v2212_v7, %v2412_v11 }
 0x54f   : > { %v2442_v34 = vmul.f32 1.442695, %v2434_v24 }
 0x551   : > { %4841 = vpow2.f32 %v2442_v34 }
 0x554   : > { %v2424_v16 = vpop.xlane.xlu0 %2423 }
 0x555   : > { %v2438_v48 = vsub.f32 %v2324_v62, %v2424_v16 }
 0x556   : > { %2432 = vmax.xlane.f32.xlu1 %v2431_v17 }
 0x557   : > { %v4842_v10 = vpop.eup %4841  ;;  %v2450_v45 = vmul.f32 1.442695, %v2438_v48 }
 0x558   : > { %v2458_v12 = vsel %vm1385_vm1, %v4842_v10, 0.0 }
 0x559   : > { %4843 = vpow2.f32 %v2450_v45  ;;  %2459 = vadd.xlane.f32.xlu2 %v2458_v12 }
 0x55f   : > { %v6139_v28 = vpop.eup %4843 }
 0x560   : > { %v2470_v41 = vsel %vm1385_vm1, %v6139_v28, 0.0 }
 0x561   : > { %2471 = vadd.xlane.f32.xlu2 %v2470_v41 }
 0x56f   : > { %v2415_v5 = vpop.xlane.xlu2 %2414 }
 0x570   : > { %v2435_v36 = vsub.f32 %v2240_v13, %v2415_v5 }
 0x572   : > { %v2444_v7 = vmul.f32 1.442695, %v2435_v36 }
 0x574   : > { %4845 = vpow2.f32 %v2444_v7 }
 0x57a   : > { %v6145_v23 = vpop.eup %4845 }
 0x57b   : > { %v2461_v62 = vsel %vm1385_vm1, %v6145_v23, 0.0 }
 0x57c   : > { %2462 = vadd.xlane.f32.xlu1 %v2461_v62 }
 0x57e   : > { %v2418_v49 = vpop.xlane.xlu1 %2417 }
 0x57f   : > { %v2436_v43 = vsub.f32 %v2268_v26, %v2418_v49 }
 0x581   : > { %v2446_v59 = vmul.f32 1.442695, %v2436_v43 }
 0x583   : > { %4847 = vpow2.f32 %v2446_v59 }
 0x585   : > { %v2427_v56 = vpop.xlane.xlu0 %2426 }
 0x586   : > { %v2439_v21 = vsub.f32 %v2352_v0, %v2427_v56  ;;  %v2430_v61 = vpop.xlane.xlu2 %2429  ;;  %v2421_v9 = vpop.xlane.xlu1 %2420 }
 0x587   : > { %v2440_v6 = vsub.f32 %v2380_v40, %v2430_v61  ;;  %v2437_v13 = vsub.f32 %v2296_v63, %v2421_v9 }
 0x588   : > { %v2452_v52 = vmul.f32 1.442695, %v2439_v21 }
 0x589   : > { %v4848_v57 = vpop.eup %4847  ;;  %v2454_v33 = vmul.f32 1.442695, %v2440_v6  ;;  %v2448_v24 = vmul.f32 1.442695, %v2437_v13 }
 0x58a   : > { %4849 = vpow2.f32 %v2452_v52  ;;  %v2464_v11 = vsel %vm1385_vm1, %v4848_v57, 0.0 }
 0x58b   : > { %4851 = vpow2.f32 %v2454_v33  ;;  %2465 = vadd.xlane.f32.xlu0 %v2464_v11 }
 0x58c   : > { %4853 = vpow2.f32 %v2448_v24 }
 0x590   : > { %v4850_v31 = vpop.eup %4849 }
 0x591   : > { %v4852_v26 = vpop.eup %4851  ;;  %v2473_v34 = vsel %vm1385_vm1, %v4850_v31, 0.0 }
 0x592   : > { %2474 = vadd.xlane.f32.xlu1 %v2473_v34  ;;  %v2476_v0 = vsel %vm1385_vm1, %v4852_v26, 0.0  ;;  %v4854_v40 = vpop.eup %4853 }
 0x593   : > { %2477 = vadd.xlane.f32.xlu2 %v2476_v0  ;;  %v2467_v63 = vsel %vm1385_vm1, %v4854_v40, 0.0 }
 0x598   : > { %v2763_v41 = vpop.permute.xlu0 %2762 }
 0x59a   : > { %2468 = vadd.xlane.f32.xlu1 %v2467_v63 }
 0x59f   : > { %2792 = vrot.lane.b32.xlu0 %v5664_v20, %s5226_s29  ;;  %v2735_v20 = vpop.permute.xlu1 %2734 }
 0x5a7   : > { %2818 = vrot.lane.b32.xlu0 %v5681_v27, %s5226_s29  ;;  %v2737_v27 = vpop.permute.xlu2 %2736 }
 0x5ab   : > { %2790 = vrot.lane.b32.xlu2 %v5667_v22, %s5226_s29 }
 0x5af   : > { %2848 = vrot.lane.b32.xlu0 %v5690_v30, %s5226_s29 }
 0x5b3   : > { %2876 = vrot.lane.b32.xlu2 %v5700_v35, %s5226_s29  ;;  %2820 = vrot.lane.b32.xlu1 %v5678_v25, %s5226_s29 }
 0x5b7   : > { %2902 = vrot.lane.b32.xlu0 %v5723_v46, %s5226_s29 }
 0x5bb   : > { %2846 = vrot.lane.b32.xlu2 %v5693_v32, %s5226_s29 }
 0x5c9   : > { %v2433_v16 = vpop.xlane.xlu1 %2432 }
 0x5ca   : > { %v2441_v22 = vsub.f32 %v6134_v2, %v2433_v16 }
 0x5cc   : > { %v2460_v48 = vpop.xlane.xlu2 %2459  ;;  %v2456_v30 = vmul.f32 1.442695, %v2441_v22 }
 0x5cd   : > { %4855 = vrcp.f32 %v2460_v48 }
 0x5ce   : > { %4857 = vpow2.f32 %v2456_v30 }
 0x5d3   : > { %v4856_v17 = vpop.eup %4855 }
 0x5d4   : > { %v2490_v35 = vmul.f32 %v4856_v17, %v4842_v10  ;;  %v2472_v45 = vpop.xlane.xlu2 %2471  ;;  %v4858_v25 = vpop.eup %4857 }
 0x5d5   : > { %4859 = vrcp.f32 %v2472_v45  ;;  %v2479_v12 = vsel %vm1385_vm1, %v4858_v25, 0.0 }
 0x5d6   : > { %4524 = vmatmul.msk.f32.vlgmr.msra.gmra.mxu0 %vm1385_vm1, %v2490_v35  ;;  %v4940_v35 = vld [vmem:[%s5527_s5 + $0x1] ss:$0 sm:$0xff] }
 0x5d7   : > { %4532 = vmatpush.xpose.msk.msra.mxu0 %vm1176_vm0, %v2709_v50 }
 0x5db   : > { %v4860_v46 = vpop.eup %4859 }
 0x5dc   : > { %v2494_v32 = vmul.f32 %v4860_v46, %v6139_v28 }
 0x5dd   : > { %2480 = vadd.xlane.f32.xlu1 %v2479_v12 }
 0x5de   : > { %4528 = vmatmul.msk.f32.vlgmr.msrb.gmra.mxu0 %vm1385_vm1, %v2494_v32  ;;  %v4941_v32 = vld [vmem:[%s5527_s5 + $0x2] ss:$0 sm:$0xff] }
 0x5e6   : > { %4533 = vmatmul.msk.f32.vlgmr.msra.gmra.mxu0 %vm1176_vm0, %v6131_v4 }
 0x5ef   : > { %v2463_v2 = vpop.xlane.xlu1 %2462 }
 0x5f0   : > { %4861 = vrcp.f32 %v2463_v2 }
 0x5f6   : > { %v4862_v10 = vpop.eup %4861  ;;  %2874 = vrot.lane.b32.xlu1 %v5703_v38, %s5226_s29 }
 0x5f7   : > { %v2491_v5 = vmul.f32 %v4862_v10, %v6145_v23 }
 0x5f9   : > { %4525 = vmatmul.msk.f32.vlgmr.msra.gmra.mxu1 %vm1385_vm1, %v2491_v5 }
 0x5fa   : > { %4534 = vmatpush.xpose.msk.msra.mxu1 %vm1176_vm0, %v2737_v27 }
 0x5fe   : > { %2904 = vrot.lane.b32.xlu1 %v5717_v42, %s5226_s29  ;;  %v2466_v28 = vpop.xlane.xlu0 %2465 }
 0x5ff   : > { %4863 = vrcp.f32 %v2466_v28 }
 0x605   : > { %v4864_v36 = vpop.eup %4863  ;;  %v2475_v4 = vpop.xlane.xlu1 %2474 }
 0x606   : > { %v2492_v7 = vmul.f32 %v4864_v36, %v4848_v57  ;;  %4865 = vrcp.f32 %v2475_v4  ;;  %v2478_v50 = vpop.xlane.xlu2 %2477  ;;  %v4943_v4 = vld [vmem:[%s5527_s5 + $0x4] ss:$0 sm:$0xff] }
 0x607   : > { %4867 = vrcp.f32 %v2478_v50 }
 0x608   : > { %4526 = vmatmul.msk.f32.vlgmr.msra.gmra.mxu2 %vm1385_vm1, %v2492_v7 }
 0x609   : > { %4536 = vmatpush.xpose.msk.msra.mxu2 %vm1176_vm0, %v6143_v37 }
 0x60c   : > { %v4866_v38 = vpop.eup %4865 }
 0x60d   : > { %v4868_v23 = vpop.eup %4867  ;;  %v2495_v62 = vmul.f32 %v4866_v38, %v4850_v31  ;;  %v2469_v49 = vpop.xlane.xlu1 %2468 }
 0x60e   : > { %v2496_v43 = vmul.f32 %v4868_v23, %v4852_v26  ;;  %4869 = vrcp.f32 %v2469_v49  ;;  %v2791_v42 = vpop.permute.xlu2 %2790  ;;  %v4939_v26 = vld [vmem:[%s5527_s5] ss:$0 sm:$0xff] }
 0x60f   : > { %4529 = vmatmul.msk.f32.vlgmr.msrb.gmra.mxu1 %vm1385_vm1, %v2495_v62 }
 0x610   : > { %4530 = vmatmul.msk.f32.vlgmr.msrb.gmra.mxu2 %vm1385_vm1, %v2496_v43 }
 0x611   : > { %v2793_v59 = vpop.permute.xlu0 %2792 }
 0x614   : > { %v4870_v56 = vpop.eup %4869 }
 0x615   : > { %v2493_v21 = vmul.f32 %v4870_v56, %v4854_v40  ;;  %v4944_v56 = vld [vmem:[%s5527_s5 + $0x3] ss:$0 sm:$0xff] }
 0x616   : > { %v2877_v61 = vpop.permute.xlu2 %2876 }
 0x617   : > { %4527 = vmatmul.msk.f32.vlgmr.msrb.gmra.mxu3 %vm1385_vm1, %v2493_v21  ;;  %4535 = vmatmul.msk.f32.vlgmr.msra.gmra.mxu1 %vm1176_vm0, %v2735_v20 }
 0x618   : > { %4538 = vmatpush.xpose.msk.msrb.mxu3 %vm1176_vm0, %v2793_v59  ;;  %4544 = vmatpush.xpose.msk.msrb.mxu2 %vm1176_vm0, %v2877_v61 }
 0x619   : > { %4537 = vmatmul.msk.f32.vlgmr.msra.gmra.mxu2 %vm1176_vm0, %v2763_v41  ;;  %v2819_v37 = vpop.permute.xlu0 %2818  ;;  %v4942_v41 = vld [vmem:[%s5527_s5 + $0x5] ss:$0 sm:$0xff] }
 0x61e   : > { %v2847_v6 = vpop.permute.xlu2 %2846 }
 0x621   : > { %v2849_v9 = vpop.permute.xlu0 %2848 }
 0x622   : > { %4542 = vmatpush.xpose.msk.msrb.mxu1 %vm1176_vm0, %v2849_v9 }
 0x625   : > { %v2821_v52 = vpop.permute.xlu1 %2820  ;;  %4543 = vmatmul.msk.f32.vlgmr.msrb.gmra.mxu1 %vm1176_vm0, %v2847_v6  ;;  %v4945_v6 = vld [vmem:[%s5527_s5 + $0x6] ss:$0 sm:$0xff] }
 0x626   : > { %4540 = vmatpush.xpose.msk.msrb.mxu0 %vm1176_vm0, %v2821_v52 }
 0x629   : > { %4541 = vmatmul.msk.f32.vlgmr.msrb.gmra.mxu0 %vm1176_vm0, %v2819_v37  ;;  %v2903_v20 = vpop.permute.xlu0 %2902 }
 0x650   : > { %v2481_v13 = vpop.xlane.xlu1 %2480 }
 0x651   : > { %4871 = vrcp.f32 %v2481_v13 }
 0x653   : > { %v6198_v57 = vpop.f32.mrf.mxu0 }
 0x657   : > { %v4872_v33 = vpop.eup %4871 }
 0x658   : > { %v2497_v11 = vmul.f32 %v4872_v33, %v4858_v25 }
 0x65a   : > { %4531 = vmatmul.msk.f32.vlgmr.msra.gmra.mxu3 %vm1385_vm1, %v2497_v11  ;;  %v4946_v11 = vld [vmem:[%s5527_s5 + $0x7] ss:$0 sm:$0xff]  ;;  %s6856_s5 = sld [smem:[#allocation41_spill]] }
 0x65b   : > { %v6201_v24 = vpop.f32.mrf.mxu0 }
 0x660   : > { %s6857_s15 = scalar_lea.vmem %s6856_s5, %s5517_s4 }
 0x662   : > { %4539 = vmatmul.msk.f32.vlgmr.msrb.gmra.mxu3 %vm1176_vm0, %v2791_v42 }
 0x663   : > { %v2731_v31 = vpop.f32.mrf.mxu0 }
 0x664   : > { %v2732_v34 = vadd.f32 %v4939_v26, %v2731_v31 }
 0x666   : > { %v2930_v0 = vsel %vm1385_vm1, %v2732_v34, -inf }
 0x667   : > { %2931 = vmax.xlane.f32.xlu2 %v2930_v0 }
 0x668   : > { %v2875_v40 = vpop.permute.xlu1 %2874 }
 0x669   : > { %4545 = vmatmul.msk.f32.vlgmr.msrb.gmra.mxu2 %vm1176_vm0, %v2875_v40 }
 0x670   : > { %v2905_v63 = vpop.permute.xlu1 %2904 }
 0x671   : > { %4546 = vmatpush.xpose.msk.msra.mxu3 %vm1176_vm0, %v2905_v63  ;;  %v4718_v63 = vpack.i.bf16 %v5729_v47, %v5721_v44 }
 0x674   : > { %4547 = vmatmul.msk.f32.vlgmr.msra.gmra.mxu3 %vm1176_vm0, %v2903_v20 }
 0x676   : > { %v6209_v27 = vpop.f32.mrf.mxu1 }
 0x677   : > { %v4738_v16 = vpack.i.bf16 %v6209_v27, %v6198_v57 }
 0x68b   : > { %v6213_v22 = vpop.f32.mrf.mxu2 }
 0x68c   : > { %v6215_v48 = vpop.f32.mrf.mxu1 }
 0x693   : > { %v6217_v30 = vpop.f32.mrf.mxu2 }
 0x694   : > { %v2759_v17 = vpop.f32.mrf.mxu1 }
 0x695   : > { %v2760_v45 = vadd.f32 %v4940_v35, %v2759_v17 }
 0x697   : > { %v2933_v25 = vsel %vm1385_vm1, %v2760_v45, -inf }
 0x698   : > { %2934 = vmax.xlane.f32.xlu1 %v2933_v25 }
 0x69a   : > { %v6227_v38 = vpop.f32.mrf.mxu3 }
 0x69c   : > { %v2787_v46 = vpop.f32.mrf.mxu2 }
 0x69d   : > { %v2788_v12 = vadd.f32 %v4941_v32, %v2787_v46 }
 0x69f   : > { %v2936_v2 = vsel %vm1385_vm1, %v2788_v12, -inf }
 0x6a0   : > { %2937 = vmax.xlane.f32.xlu0 %v2936_v2 }
 0x6a2   : > { %v2871_v10 = vpop.f32.mrf.mxu1 }
 0x6a3   : > { %v2872_v5 = vadd.f32 %v4942_v41, %v2871_v10 }
 0x6a5   : > { %v2945_v28 = vsel %vm1385_vm1, %v2872_v5, -inf }
 0x6a6   : > { %v2843_v36 = vpop.f32.mrf.mxu0 }
 0x6a7   : > { %v2844_v7 = vadd.f32 %v4943_v4, %v2843_v36  ;;  %v6846_v36 = vld [vmem:[#allocation26_spill] sm:$0xff] }
 0x6a8   : > { %2946 = vmax.xlane.f32.xlu0 %v2945_v28 }
 0x6a9   : > { %v2942_v50 = vsel %vm1385_vm1, %v2844_v7, -inf }
 0x6aa   : > { %2943 = vmax.xlane.f32.xlu1 %v2942_v50 }
 0x6da   : > { %v2932_v23 = vpop.xlane.xlu2 %2931 }
 0x6db   : > { %v2954_v62 = vsub.f32 %v2732_v34, %v2932_v23 }
 0x6dd   : > { %v2962_v49 = vmul.f32 1.442695, %v2954_v62  ;;  %v6229_v43 = vpop.f32.mrf.mxu3 }
 0x6df   : > { %4873 = vpow2.f32 %v2962_v49 }
 0x6e5   : > { %v6231_v42 = vpop.eup %4873  ;;  %v2815_v59 = vpop.f32.mrf.mxu3 }
 0x6e6   : > { %v2816_v21 = vadd.f32 %v4944_v56, %v2815_v59  ;;  %v2978_v61 = vsel %vm1385_vm1, %v6231_v42, 0.0 }
 0x6e7   : > { %2979 = vadd.xlane.f32.xlu0 %v2978_v61 }
 0x6e8   : > { %v2939_v37 = vsel %vm1385_vm1, %v2816_v21, -inf }
 0x6e9   : > { %2940 = vmax.xlane.f32.xlu2 %v2939_v37 }
 0x6ec   : > { %v2899_v9 = vpop.f32.mrf.mxu2 }
 0x6ed   : > { %v2900_v52 = vadd.f32 %v4945_v6, %v2899_v9 }
 0x6ef   : > { %v2948_v13 = vsel %vm1385_vm1, %v2900_v52, -inf }
 0x6f1   : > { %2949 = vmax.xlane.f32.xlu2 %v2948_v13 }
 0x6f7   : > { %v2927_v33 = vpop.f32.mrf.mxu3 }
 0x6f8   : > { %v2928_v31 = vadd.f32 %v4946_v11, %v2927_v33 }
 0x6fa   : > { %v2951_v26 = vsel %vm1385_vm1, %v2928_v31, -inf }
 0x6fb   : > { %2952 = vmax.xlane.f32.xlu1 %v2951_v26 }
 0x70b   : > { %v2935_v34 = vpop.xlane.xlu1 %2934 }
 0x70c   : > { %v2955_v0 = vsub.f32 %v2760_v45, %v2935_v34  ;;  %v4728_v45 = vpack.i.bf16 %v5743_v53, %v5739_v51 }
 0x70e   : > { %v2964_v40 = vmul.f32 1.442695, %v2955_v0 }
 0x710   : > { %4875 = vpow2.f32 %v2964_v40 }
 0x713   : > { %v2938_v20 = vpop.xlane.xlu0 %2937 }
 0x714   : > { %v2956_v17 = vsub.f32 %v2788_v12, %v2938_v20  ;;  %4719 = vrot.lane.b32.xlu1 %v4718_v63, %s5226_s29 }
 0x716   : > { %v6244_v35 = vpop.eup %4875  ;;  %v2966_v25 = vmul.f32 1.442695, %v2956_v17 }
 0x717   : > { %v2981_v46 = vsel %vm1385_vm1, %v6244_v35, 0.0 }
 0x718   : > { %4877 = vpow2.f32 %v2966_v25  ;;  %2982 = vadd.xlane.f32.xlu2 %v2981_v46 }
 0x71b   : > { %v2947_v32 = vpop.xlane.xlu0 %2946 }
 0x71c   : > { %4729 = vrot.lane.b32.xlu1 %v4728_v45, %s5226_s29  ;;  %v2959_v10 = vsub.f32 %v2872_v5, %v2947_v32 }
 0x71d   : > { %v2944_v2 = vpop.xlane.xlu1 %2943 }
 0x71e   : > { %v6251_v44 = vpop.eup %4877  ;;  %v2958_v47 = vsub.f32 %v2844_v7, %v2944_v2  ;;  %v2972_v28 = vmul.f32 1.442695, %v2959_v10  ;;  %v6847_v7 = vld [vmem:[#allocation27_spill] sm:$0xff] }
 0x71f   : > { %v2984_v12 = vsel %vm1385_vm1, %v6251_v44, 0.0  ;;  %v4723_v50 = vpack.i.bf16 %v6847_v7, %v5843_v8 }
 0x720   : > { %v2970_v41 = vmul.f32 1.442695, %v2958_v47  ;;  %2985 = vadd.xlane.f32.xlu0 %v2984_v12 }
 0x722   : > { %4879 = vpow2.f32 %v2970_v41 }
 0x723   : > { %4881 = vpow2.f32 %v2972_v28 }
 0x724   : > { %3174 = vrot.lane.b32.xlu1 %v6846_v36, %s5226_s29 }
 0x728   : > { %v4880_v4 = vpop.eup %4879 }
 0x729   : > { %v2990_v51 = vsel %vm1385_vm1, %v4880_v4, 0.0  ;;  %v6262_v53 = vpop.eup %4881 }
 0x72a   : > { %2991 = vadd.xlane.f32.xlu2 %v2990_v51  ;;  %v2993_v5 = vsel %vm1385_vm1, %v6262_v53, 0.0 }
 0x72c   : > { %4734 = vrot.lane.b32.xlu1 %v4733_v3, %s5226_s29 }
 0x732   : > { %2994 = vadd.xlane.f32.xlu2 %v2993_v5 }
 0x734   : > { %4724 = vrot.lane.b32.xlu0 %v4723_v50, %s5226_s29  ;;  %4739 = vrot.lane.b32.xlu1 %v4738_v16, %s5225_s19 }
 0x75a   : > { %v2980_v16 = vpop.xlane.xlu0 %2979 }
 0x75c   : > { %v2941_v23 = vpop.xlane.xlu2 %2940 }
 0x75d   : > { %v2957_v62 = vsub.f32 %v2816_v21, %v2941_v23  ;;  %v4753_v23 = vpack.i.bf16 %v6227_v38, %v6213_v22  ;;  %v3359_v22 = vld [vmem:[%s5493_s14 + $0x58] sm:$0xff]  ;;  %v3356_v38 = vld [vmem:[%s5493_s14 + $0x40] sm:$0xff] }
 0x75f   : > { %v2968_v60 = vmul.f32 1.442695, %v2957_v62 }
 0x761   : > { %4883 = vpow2.f32 %v2968_v60 }
 0x764   : > { %v2950_v29 = vpop.xlane.xlu2 %2949 }
 0x765   : > { %v2960_v3 = vsub.f32 %v2900_v52, %v2950_v29 }
 0x767   : > { %v4884_v49 = vpop.eup %4883  ;;  %v2974_v59 = vmul.f32 1.442695, %v2960_v3  ;;  %v3355_v3 = vld [vmem:[%s5493_s14 + $0x38] sm:$0xff] }
 0x768   : > { %v2987_v56 = vsel %vm1385_vm1, %v4884_v49, 0.0 }
 0x769   : > { %4885 = vpow2.f32 %v2974_v59  ;;  %2988 = vadd.xlane.f32.xlu2 %v2987_v56  ;;  %v3352_v59 = vld [vmem:[%s5493_s14 + $0x20] sm:$0xff]  ;;  %v3351_v56 = vld [vmem:[%s5493_s14 + $0x18] sm:$0xff] }
 0x76e   : > { %v2953_v8 = vpop.xlane.xlu1 %2952 }
 0x76f   : > { %v4886_v61 = vpop.eup %4885  ;;  %v2961_v37 = vsub.f32 %v2928_v31, %v2953_v8  ;;  %v3350_v8 = vld [vmem:[%s5493_s14 + $0x10] sm:$0xff] }
 0x770   : > { %v2996_v9 = vsel %vm1385_vm1, %v4886_v61, 0.0 }
 0x771   : > { %v2976_v6 = vmul.f32 1.442695, %v2961_v37  ;;  %2997 = vadd.xlane.f32.xlu2 %v2996_v9  ;;  %v3348_v37 = vld [vmem:[%s5493_s14] sm:$0xff] }
 0x773   : > { %4887 = vpow2.f32 %v2976_v6 }
 0x774   : > { %4889 = vrcp.f32 %v2980_v16 }
 0x779   : > { %v4888_v57 = vpop.eup %4887 }
 0x77a   : > { %v2999_v27 = vsel %vm1385_vm1, %v4888_v57, 0.0  ;;  %v4890_v21 = vpop.eup %4889 }
 0x77b   : > { %3000 = vadd.xlane.f32.xlu0 %v2999_v27  ;;  %v3010_v11 = vmul.f32 %v4890_v21, %v6231_v42 }
 0x786   : > { %v4720_v52 = vpop.permute.xlu1 %4719 }
 0x787   : > { %v4722_v13 = vunpack.i.h.bf16 %v4720_v52  ;;  %v4721_v33 = vunpack.i.l.bf16 %v4720_v52 }
 0x789   : > { %3039 = vmatpush.msra.mxu0 %v4721_v33  ;;  %3065 = vmatpush.msra.mxu1 %v4722_v13  ;;  %v6848_v33 = vld [vmem:[#allocation30_spill] sm:$0xff] }
 0x78a   : > { %3200 = vrot.lane.b32.xlu2 %v5865_v55, %s5226_s29  ;;  %4548 = vmatmul.msk.f32.vlgmr.msra.gmra.mxu0 %vm1385_vm1, %v3010_v11 }
 0x78b   : > { %v2983_v31 = vpop.xlane.xlu2 %2982 }
 0x78c   : > { %4891 = vrcp.f32 %v2983_v31 }
 0x78e   : > { %v4730_v26 = vpop.permute.xlu1 %4729 }
 0x78f   : > { %v4732_v34 = vunpack.i.h.bf16 %v4730_v26  ;;  %v4731_v0 = vunpack.i.l.bf16 %v4730_v26 }
 0x791   : > { %3143 = vmatpush.msrb.mxu0 %v4731_v0  ;;  %3169 = vmatpush.msrb.mxu1 %v4732_v34 }
 0x792   : > { %v4892_v40 = vpop.eup %4891  ;;  %4749 = vrot.lane.b32.xlu2 %v4748_v18, %s5226_s29 }
 0x793   : > { %v3011_v42 = vmul.f32 %v4892_v40, %v6244_v35  ;;  %v2986_v55 = vpop.xlane.xlu0 %2985  ;;  %3368 = vmatpush.msra.mxu0 %v3363_v15 }
 0x795   : > { %4549 = vmatmul.msk.f32.vlgmr.msra.gmra.mxu1 %vm1385_vm1, %v3011_v42  ;;  %3369 = vmatpush.msra.mxu0 %v3362_v58 }
 0x796   : > { %v3175_v54 = vpop.permute.xlu1 %3174 }
 0x79d   : > { %v2992_v63 = vpop.xlane.xlu2 %2991 }
 0x79e   : > { %4893 = vrcp.f32 %v2992_v63 }
 0x79f   : > { %4895 = vrcp.f32 %v2986_v55  ;;  %v6849_v55 = vld [vmem:[#allocation31_spill] sm:$0xff] }
 0x7a4   : > { %v4894_v20 = vpop.eup %4893 }
 0x7a5   : > { %v4896_v17 = vpop.eup %4895  ;;  %v3014_v25 = vmul.f32 %v4894_v20, %v4880_v4  ;;  %v2995_v46 = vpop.xlane.xlu2 %2994 }
 0x7a6   : > { %v4725_v45 = vpop.permute.xlu0 %4724  ;;  %4897 = vrcp.f32 %v2995_v46  ;;  %v3012_v19 = vmul.f32 %v4896_v17, %v6251_v44 }
 0x7a7   : > { %v4727_v32 = vunpack.i.h.bf16 %v4725_v45  ;;  %v4726_v2 = vunpack.i.l.bf16 %v4725_v45  ;;  %4552 = vmatmul.msk.f32.vlgmr.msrb.gmra.mxu0 %vm1385_vm1, %v3014_v25  ;;  %v6850_v45 = vld [vmem:[#allocation32_spill] sm:$0xff] }
 0x7a9   : > { %3091 = vmatpush.msra.mxu2 %v4726_v2  ;;  %3117 = vmatpush.msrb.mxu3 %v4727_v32 }
 0x7aa   : > { %4550 = vmatmul.msk.f32.vlgmr.msra.gmra.mxu2 %vm1385_vm1, %v3012_v19 }
 0x7ab   : > { %3195 = vmatpush.msrb.mxu2 %v3175_v54 }
 0x7ac   : > { %v4898_v18 = vpop.eup %4897 }
 0x7ad   : > { %v3015_v35 = vmul.f32 %v4898_v18, %v6262_v53 }
 0x7af   : > { %4553 = vmatmul.msk.f32.vlgmr.msrb.gmra.mxu1 %vm1385_vm1, %v3015_v35 }
 0x7dc   : > { %v2989_v47 = vpop.xlane.xlu2 %2988 }
 0x7dd   : > { %4899 = vrcp.f32 %v2989_v47 }
 0x7e3   : > { %v4900_v12 = vpop.eup %4899 }
 0x7e4   : > { %v3013_v10 = vmul.f32 %v4900_v12, %v4884_v49  ;;  %v2998_v41 = vpop.xlane.xlu2 %2997  ;;  %v3354_v49 = vld [vmem:[%s5493_s14 + $0x30] sm:$0xff] }
 0x7e5   : > { %4901 = vrcp.f32 %v2998_v41 }
 0x7e6   : > { %4551 = vmatmul.msk.f32.vlgmr.msrb.gmra.mxu3 %vm1385_vm1, %v3013_v10  ;;  %v6851_v10 = vld [vmem:[#allocation33_spill] sm:$0xff] }
 0x7eb   : > { %v4902_v44 = vpop.eup %4901 }
 0x7ec   : > { %v3016_v28 = vmul.f32 %v4902_v44, %v4886_v61  ;;  %v3201_v36 = vpop.permute.xlu2 %3200  ;;  %v3349_v61 = vld [vmem:[%s5493_s14 + $0x8] sm:$0xff] }
 0x7ed   : > { %3221 = vmatpush.msra.mxu3 %v3201_v36 }
 0x7ee   : > { %v3001_v4 = vpop.xlane.xlu0 %3000  ;;  %4554 = vmatmul.msk.f32.vlgmr.msrb.gmra.mxu2 %vm1385_vm1, %v3016_v28 }
 0x7ef   : > { %4903 = vrcp.f32 %v3001_v4 }
 0x7f4   : > { %v4750_v40 = vpop.permute.xlu2 %4749 }
 0x7f5   : > { %v4904_v51 = vpop.eup %4903  ;;  %v4751_v17 = vunpack.i.l.bf16 %v4750_v40  ;;  %v4752_v35 = vunpack.i.h.bf16 %v4750_v40  ;;  %v4950_v40 = vld [vmem:[#allocation2 + $0x10] sm:$0xff] }
 0x7f6   : > { %v3017_v53 = vmul.f32 %v4904_v51, %v4888_v57  ;;  %v4735_v57 = vpop.permute.xlu1 %4734 }
 0x7f7   : > { %v4736_v21 = vunpack.i.l.bf16 %v4735_v57  ;;  %v4737_v34 = vunpack.i.h.bf16 %v4735_v57  ;;  %v3324_v32 = vsel %vm1176_vm0, %v6850_v45, %v4751_v17  ;;  %v3325_v41 = vsel %vm1176_vm0, %v6851_v10, %v4752_v35  ;;  %v4951_v17 = vld [vmem:[#allocation2 + $0x8] sm:$0xff] }
 0x7f8   : > { %4555 = vmatmul.msk.f32.vlgmr.msra.gmra.mxu3 %vm1385_vm1, %v3017_v53  ;;  %v6852_v53 = vld [vmem:[#allocation28_spill] sm:$0xff] }
 0x7f9   : > { %v3322_v11 = vsel %vm1176_vm0, %v6848_v33, %v4736_v21  ;;  %v3323_v63 = vsel %vm1176_vm0, %v6849_v55, %v4737_v34  ;;  %v4948_v33 = vld [vmem:[#allocation2] sm:$0xff] }
 0x7fe   : > { %v4740_v16 = vpop.permute.xlu1 %4739 }
 0x7ff   : > { %v4741_v52 = vunpack.i.l.bf16 %v4740_v16 }
 0x807   : > { %v3041_v5 = vpop.f32.mrf.mxu0 }
 0x812   : > { %v3067_v7 = vpop.f32.mrf.mxu1 }
 0x813   : > { %v4743_v50 = vpack.i.bf16 %v3067_v7, %v3041_v5 }
 0x815   : > { %4744 = vrot.lane.b32.xlu1 %v4743_v50, %s5224_s0 }
 0x81d   : > { %4754 = vrot.lane.b32.xlu1 %v4753_v23, %s5225_s19 }
 0x824   : > { %v3145_v62 = vpop.f32.mrf.mxu0 }
 0x825   : > { %4759 = vrot.lane.b32.xlu1 %v4758_v14, %s5226_s29  ;;  %v3361_v14 = vld [vmem:[%s5493_s14 + $0x68] sm:$0xff] }
 0x826   : > { %3370 = vmatpush.msra.mxu0 %v3361_v14 }
 0x82c   : > { %v3171_v29 = vpop.f32.mrf.mxu1 }
 0x82d   : > { %v3093_v60 = vpop.f32.mrf.mxu2  ;;  %3306 = vrot.lane.b32.xlu1 %v3145_v62, %s5224_s0 }
 0x82e   : > { %3302 = vrot.lane.b32.xlu2 %v3093_v60, %s5224_s0  ;;  %v6853_v60 = vld [vmem:[#allocation29_spill] sm:$0xff] }
 0x835   : > { %3308 = vrot.lane.b32.xlu1 %v3171_v29, %s5224_s0 }
 0x836   : > { %3274 = vrot.lane.b32.xlu2 %v6201_v24, %s5225_s19  ;;  %v3360_v24 = vld [vmem:[%s5493_s14 + $0x60] sm:$0xff] }
 0x837   : > { %3371 = vmatpush.msra.mxu0 %v3360_v24 }
 0x839   : > { %3372 = vmatpush.msra.mxu0 %v3359_v22 }
 0x83e   : > { %3276 = vrot.lane.b32.xlu2 %v6215_v48, %s5225_s19  ;;  %v3358_v48 = vld [vmem:[%s5493_s14 + $0x50] sm:$0xff] }
 0x83f   : > { %3373 = vmatpush.msra.mxu0 %v3358_v48  ;;  %v6854_v48 = vld [vmem:[#allocation34_spill] sm:$0xff] }
 0x846   : > { %3246 = vrot.lane.b32.xlu2 %v6113_v1, %s5226_s29  ;;  %v3357_v1 = vld [vmem:[%s5493_s14 + $0x48] sm:$0xff] }
 0x847   : > { %3374 = vmatpush.msra.mxu0 %v3357_v1 }
 0x849   : > { %3375 = vmatpush.msra.mxu0 %v3356_v38 }
 0x84b   : > { %3376 = vmatpush.msra.mxu0 %v3355_v3 }
 0x84d   : > { %3377 = vmatpush.msra.mxu0 %v3354_v49 }
 0x84e   : > { %3248 = vrot.lane.b32.xlu2 %v6115_v39, %s5226_s29  ;;  %v3353_v39 = vld [vmem:[%s5493_s14 + $0x28] sm:$0xff]  ;;  %s6866_s29 = sld [smem:[#allocation53_spill]] (!%p4556_p6) }
 0x84f   : > { %3378 = vmatpush.msra.mxu0 %v3353_v39 }
 0x851   : > { %3379 = vmatpush.msra.mxu0 %v3352_v59 }
 0x853   : > { %3380 = vmatpush.msra.mxu0 %v3351_v56  ;;  %v6855_v56 = vld [vmem:[#allocation35_spill] sm:$0xff] }
 0x855   : > { %3381 = vmatpush.msra.mxu0 %v3350_v8 }
 0x857   : > { %3382 = vmatpush.msra.mxu0 %v3349_v61 }
 0x859   : > { %3383 = vmatpush.msra.mxu0 %v3348_v37 }
 0x869   : > { %v3119_v9 = vpop.f32.mrf.mxu3 }
 0x86a   : > { %3304 = vrot.lane.b32.xlu0 %v3119_v9, %s5224_s0 }
 0x871   : > { %v3197_v6 = vpop.f32.mrf.mxu2 }
 0x872   : > { %3278 = vrot.lane.b32.xlu0 %v6217_v30, %s5225_s19  ;;  %3310 = vrot.lane.b32.xlu1 %v3197_v6, %s5224_s0  ;;  %v3331_v30 = vsel %vm3330_vm2, %v3322_v11, %v4741_v52  ;;  %v4771_v6 = vld [vmem:[%s6857_s15] ss:$0 sm:$0xff] }
 0x87a   : > { %3280 = vrot.lane.b32.xlu0 %v6229_v43, %s5225_s19  ;;  %v4742_v43 = vunpack.i.h.bf16 %v4740_v16  ;;  %v4947_v16 = vld [vmem:[#allocation2 + $0x30] sm:$0xff] }
 0x87b   : > { %v3223_v27 = vpop.f32.mrf.mxu3 }
 0x87c   : > { %3312 = vrot.lane.b32.xlu1 %v3223_v27, %s5224_s0  ;;  %v3332_v20 = vsel %vm3330_vm2, %v3323_v63, %v4742_v43 }
 0x887   : > { %v4745_v13 = vpop.permute.xlu1 %4744 }
 0x888   : > { %v4746_v31 = vunpack.i.l.bf16 %v4745_v13  ;;  %v4747_v0 = vunpack.i.h.bf16 %v4745_v13  ;;  %v3303_v19 = vpop.permute.xlu2 %3302 }
 0x88a   : > { %v3340_v26 = vsel %vm3339_vm3, %v3331_v30, %v4746_v31  ;;  %v3341_v25 = vsel %vm3339_vm3, %v3332_v20, %v4747_v0  ;;  %v5227_v20 = vmov 128.0  }
 0x88b   : > { %3384 = vmatmul.f32.vlgmr.msra.gmra.mxu0 %v3340_v26  ;;  %v4949_v26 = vld [vmem:[#allocation2 + $0x18] sm:$0xff]  ;;  %4905 = vrcp.f32 %v5227_v20  ;;  %v3608_v20 = vld [vmem:[%s5499_s21] sm:$0xff] }
 0x88f   : > { %v4755_v42 = vpop.permute.xlu1 %4754 }
 0x890   : > { %v4756_v46 = vunpack.i.l.bf16 %v4755_v42  ;;  %v4757_v47 = vunpack.i.h.bf16 %v4755_v42  ;;  %v3275_v12 = vpop.permute.xlu2 %3274 }
 0x892   : > { %v3333_v2 = vsel %vm3330_vm2, %v3324_v32, %v4756_v46  ;;  %v3334_v28 = vsel %vm3330_vm2, %v3325_v41, %v4757_v47  ;;  %v4906_v46 = vpop.eup %4905 }
 0x893   : > { %3387 = vmatmul.f32.gmra.mxu0 %v3341_v25  ;;  %v3342_v54 = vsel %vm3339_vm3, %v3333_v2, %v3303_v19  ;;  %v4952_v2 = vld [vmem:[#allocation2 + $0x20] sm:$0xff]  ;;  %vm3440_vm4 = vweird.f32 %v4906_v46 }
 0x897   : > { %v4760_v18 = vpop.permute.xlu1 %4759 }
 0x898   : > { %v4761_v36 = vunpack.i.l.bf16 %v4760_v18  ;;  %v3277_v7 = vpop.permute.xlu2 %3276  ;;  %v4762_v23 = vunpack.i.h.bf16 %v4760_v18 }
 0x89a   : > { %v3326_v5 = vsel %vm1176_vm0, %v6852_v53, %v4761_v36  ;;  %v3327_v29 = vsel %vm1176_vm0, %v6853_v60, %v4762_v23  ;;  %v4954_v60 = vld [vmem:[#allocation2 + $0x38] sm:$0xff] }
 0x89b   : > { %3390 = vmatmul.f32.gmra.mxu0 %v3342_v54  ;;  %v3335_v50 = vsel %vm3330_vm2, %v3326_v5, %v3275_v12  ;;  %v3336_v58 = vsel %vm3330_vm2, %v3327_v29, %v3277_v7  ;;  %v3436_v54 = vmul.f32 128.0, %v4906_v46  ;;  %v4953_v12 = vld [vmem:[#allocation2 + $0x28] sm:$0xff] }
 0x89d   : > { %v3437_v18 = vsub.f32 1.0, %v3436_v54 }
 0x89f   : > { %v3307_v51 = vpop.permute.xlu1 %3306  ;;  %v3438_v41 = vmul.f32 %v4906_v46, %v3437_v18 }
 0x8a0   : > { %v3344_v62 = vsel %vm3339_vm3, %v3335_v50, %v3307_v51  ;;  %v3247_v14 = vpop.permute.xlu2 %3246 }
 0x8a1   : > { %v3328_v1 = vsel %vm1176_vm0, %v6854_v48, %v3247_v14  ;;  %v3623_v48 = vld [vmem:[%s5499_s21 + $0x78] sm:$0xff] }
 0x8a2   : > { %3628 = vmatpush.msra.mxu1 %v3623_v48 }
 0x8a7   : > { %v3309_v15 = vpop.permute.xlu1 %3308 }
 0x8a8   : > { %v3345_v22 = vsel %vm3339_vm3, %v3336_v58, %v3309_v15  ;;  %v3249_v39 = vpop.permute.xlu2 %3248 }
 0x8a9   : > { %v3329_v8 = vsel %vm1176_vm0, %v6855_v56, %v3249_v39 }
 0x8dc   : > { %v3305_v44 = vpop.permute.xlu0 %3304 }
 0x8dd   : > { %v3343_v4 = vsel %vm3339_vm3, %v3334_v28, %v3305_v44  ;;  %v3439_v44 = vadd.f32 %v4906_v46, %v3438_v41 }
 0x8de   : > { %3393 = vmatmul.f32.gmra.mxu0 %v3343_v4 }
 0x8df   : > { %v6376_v28 = vsel %vm3440_vm4, %v4906_v46, %v3439_v44 }
 0x8e4   : > { %v3279_v24 = vpop.permute.xlu0 %3278  ;;  %v3311_v3 = vpop.permute.xlu1 %3310 }
 0x8e5   : > { %v3337_v38 = vsel %vm3330_vm2, %v3328_v1, %v3279_v24  ;;  %v3622_v1 = vld [vmem:[%s5499_s21 + $0x70] sm:$0xff] }
 0x8e6   : > { %3396 = vmatmul.f32.gmra.mxu0 %v3344_v62  ;;  %v3346_v49 = vsel %vm3339_vm3, %v3337_v38, %v3311_v3  ;;  %3629 = vmatpush.msra.mxu1 %v3622_v1 }
 0x8ec   : > { %v3281_v59 = vpop.permute.xlu0 %3280 }
 0x8ed   : > { %v3338_v61 = vsel %vm3330_vm2, %v3329_v8, %v3281_v59  ;;  %v3621_v8 = vld [vmem:[%s5499_s21 + $0x68] sm:$0xff] }
 0x8ee   : > { %3399 = vmatmul.f32.gmra.mxu0 %v3345_v22  ;;  %v3313_v37 = vpop.permute.xlu1 %3312  ;;  %3630 = vmatpush.msra.mxu1 %v3621_v8 }
 0x8ef   : > { %v3347_v9 = vsel %vm3339_vm3, %v3338_v61, %v3313_v37  ;;  %v3620_v37 = vld [vmem:[%s5499_s21 + $0x60] sm:$0xff] }
 0x8f0   : > { %3631 = vmatpush.msra.mxu1 %v3620_v37 }
 0x8f6   : > { %3402 = vmatmul.f32.gmra.mxu0 %v3346_v49 }
 0x8fe   : > { %3405 = vmatmul.f32.gmra.mxu0 %v3347_v9 }
 0x908   : > { %v3385_v57 = vpop.f32.mrf.mxu0 }
 0x909   : > { %v3386_v27 = vadd.f32 %v4771_v6, %v3385_v57 }
 0x90b   : > { %v3411_v21 = vadd.f32 %v4947_v16, %v3386_v27  ;;  %v3618_v27 = vld [vmem:[%s5499_s21 + $0x50] sm:$0xff] }
 0x90d   : > { %3419 = vadd.xlane.f32.xlu2 %v3411_v21 }
 0x910   : > { %v3388_v52 = vpop.f32.mrf.mxu0 }
 0x911   : > { %v3389_v13 = vadd.f32 %v4771_v6, %v3388_v52 }
 0x913   : > { %v3412_v11 = vadd.f32 %v4948_v33, %v3389_v13  ;;  %v3616_v13 = vld [vmem:[%s5499_s21 + $0x40] sm:$0xff] }
 0x915   : > { %3421 = vadd.xlane.f32.xlu0 %v3412_v11 }
 0x918   : > { %v3391_v31 = vpop.f32.mrf.mxu0 }
 0x919   : > { %v3392_v30 = vadd.f32 %v4771_v6, %v3391_v31 }
 0x91b   : > { %v3413_v34 = vadd.f32 %v4949_v26, %v3392_v30  ;;  %v3614_v30 = vld [vmem:[%s5499_s21 + $0x30] sm:$0xff] }
 0x91d   : > { %3423 = vadd.xlane.f32.xlu1 %v3413_v34 }
 0x95b   : > { %v3394_v43 = vpop.f32.mrf.mxu0 }
 0x95c   : > { %v3395_v0 = vadd.f32 %v4771_v6, %v3394_v43 }
 0x95e   : > { %v3414_v42 = vadd.f32 %v4950_v40, %v3395_v0  ;;  %v3612_v0 = vld [vmem:[%s5499_s21 + $0x20] sm:$0xff] }
 0x960   : > { %3425 = vadd.xlane.f32.xlu2 %v3414_v42 }
 0x963   : > { %v3397_v55 = vpop.f32.mrf.mxu0 }
 0x964   : > { %v3398_v63 = vadd.f32 %v4771_v6, %v3397_v55  ;;  %v3610_v55 = vld [vmem:[%s5499_s21 + $0x10] sm:$0xff] }
 0x966   : > { %v3415_v25 = vadd.f32 %v4951_v17, %v3398_v63  ;;  %v3609_v63 = vld [vmem:[%s5499_s21 + $0x8] sm:$0xff] }
 0x968   : > { %3427 = vadd.xlane.f32.xlu0 %v3415_v25 }
 0x96b   : > { %v3400_v45 = vpop.f32.mrf.mxu0 }
 0x96c   : > { %v3401_v32 = vadd.f32 %v4771_v6, %v3400_v45 }
 0x96e   : > { %v3416_v19 = vadd.f32 %v4952_v2, %v3401_v32 }
 0x970   : > { %3429 = vadd.xlane.f32.xlu1 %v3416_v19 }
 0x973   : > { %v3403_v35 = vpop.f32.mrf.mxu0 }
 0x974   : > { %v3404_v47 = vadd.f32 %v4771_v6, %v3403_v35 }
 0x976   : > { %v6373_v10 = vadd.f32 %v4953_v12, %v3404_v47 }
 0x978   : > { %3431 = vadd.xlane.f32.xlu0 %v6373_v10 }
 0x97b   : > { %v3406_v5 = vpop.f32.mrf.mxu0 }
 0x97c   : > { %v3407_v50 = vadd.f32 %v4771_v6, %v3406_v5  ;;  %v3619_v6 = vld [vmem:[%s5499_s21 + $0x58] sm:$0xff] }
 0x97d   : > { %3632 = vmatpush.msra.mxu1 %v3619_v6 }
 0x97e   : > { %v6386_v29 = vadd.f32 %v4954_v60, %v3407_v50 }
 0x97f   : > { %3633 = vmatpush.msra.mxu1 %v3618_v27 }
 0x980   : > { %v3420_v36 = vpop.xlane.xlu2 %3419 }
 0x981   : > { %v3442_v4 = vmul.f32 %v6376_v28, %v3420_v36 }
 0x983   : > { %v6379_v51 = vsub.f32 %v3411_v21, %v3442_v4  ;;  %v3617_v21 = vld [vmem:[%s5499_s21 + $0x48] sm:$0xff] }
 0x984   : > { %3634 = vmatpush.msra.mxu1 %v3617_v21 }
 0x985   : > { %v3458_v53 = vmul.f32 %v6379_v51, %v6379_v51 }
 0x986   : > { %3635 = vmatpush.msra.mxu1 %v3616_v13 }
 0x987   : > { %3466 = vadd.xlane.f32.xlu2 %v3458_v53 }
 0x988   : > { %v3422_v7 = vpop.xlane.xlu0 %3421 }
 0x989   : > { %v3443_v23 = vmul.f32 %v6376_v28, %v3422_v7 }
 0x98b   : > { %v6384_v62 = vsub.f32 %v3412_v11, %v3443_v23  ;;  %v3615_v11 = vld [vmem:[%s5499_s21 + $0x38] sm:$0xff]  ;;  %v6447_v23 = vld [vmem:[%s912_s22] ss:$0 sm:$0xff] }
 0x98c   : > { %3636 = vmatpush.msra.mxu1 %v3615_v11 }
 0x98d   : > { %v3459_v15 = vmul.f32 %v6384_v62, %v6384_v62 }
 0x98e   : > { %3637 = vmatpush.msra.mxu1 %v3614_v30 }
 0x98f   : > { %3433 = vadd.xlane.f32.xlu2 %v6386_v29  ;;  %3468 = vadd.xlane.f32.xlu1 %v3459_v15 }
 0x990   : > { %v3424_v58 = vpop.xlane.xlu1 %3423 }
 0x991   : > { %v3444_v14 = vmul.f32 %v6376_v28, %v3424_v58  ;;  %v6455_v58 = vld [vmem:[%s915_s20] ss:$0 sm:$0xff] }
 0x993   : > { %v6392_v24 = vsub.f32 %v3413_v34, %v3444_v14  ;;  %v3613_v34 = vld [vmem:[%s5499_s21 + $0x28] sm:$0xff] }
 0x994   : > { %3638 = vmatpush.msra.mxu1 %v3613_v34 }
 0x995   : > { %v3460_v22 = vmul.f32 %v6392_v24, %v6392_v24 }
 0x996   : > { %3639 = vmatpush.msra.mxu1 %v3612_v0 }
 0x997   : > { %3470 = vadd.xlane.f32.xlu0 %v3460_v22 }
 0x9d3   : > { %v3426_v38 = vpop.xlane.xlu2 %3425 }
 0x9d4   : > { %v3445_v3 = vmul.f32 %v6376_v28, %v3426_v38 }
 0x9d6   : > { %v6399_v49 = vsub.f32 %v3414_v42, %v3445_v3  ;;  %v3611_v42 = vld [vmem:[%s5499_s21 + $0x18] sm:$0xff] }
 0x9d7   : > { %3640 = vmatpush.msra.mxu1 %v3611_v42  ;;  %v3691_v42 = vld [vmem:[%s5501_s18 + $0x70] sm:$0xff] }
 0x9d8   : > { %v3461_v39 = vmul.f32 %v6399_v49, %v6399_v49 }
 0x9d9   : > { %3641 = vmatpush.msra.mxu1 %v3610_v55 }
 0x9da   : > { %3472 = vadd.xlane.f32.xlu1 %v3461_v39 }
 0x9db   : > { %v3428_v59 = vpop.xlane.xlu0 %3427  ;;  %3642 = vmatpush.msra.mxu1 %v3609_v63 }
 0x9dc   : > { %v3446_v56 = vmul.f32 %v6376_v28, %v3428_v59 }
 0x9dd   : > { %3643 = vmatpush.msra.mxu1 %v3608_v20 }
 0x9de   : > { %v6405_v61 = vsub.f32 %v3415_v25, %v3446_v56 }
 0x9e0   : > { %v3462_v9 = vmul.f32 %v6405_v61, %v6405_v61 }
 0x9e2   : > { %3474 = vadd.xlane.f32.xlu2 %v3462_v9 }
 0x9e3   : > { %v3430_v57 = vpop.xlane.xlu1 %3429 }
 0x9e4   : > { %v3447_v16 = vmul.f32 %v6376_v28, %v3430_v57 }
 0x9e6   : > { %v6414_v52 = vsub.f32 %v3416_v19, %v3447_v16 }
 0x9e8   : > { %v3463_v33 = vmul.f32 %v6414_v52, %v6414_v52 }
 0x9ea   : > { %3476 = vadd.xlane.f32.xlu0 %v3463_v33 }
 0x9eb   : > { %v3432_v31 = vpop.xlane.xlu0 %3431 }
 0x9ec   : > { %v3448_v26 = vmul.f32 %v6376_v28, %v3432_v31 }
 0x9ee   : > { %v6424_v43 = vsub.f32 %v6373_v10, %v3448_v26 }
 0x9f0   : > { %v3464_v40 = vmul.f32 %v6424_v43, %v6424_v43 }
 0x9f2   : > { %3478 = vadd.xlane.f32.xlu1 %v3464_v40  ;;  %v3692_v40 = vld [vmem:[%s5501_s18 + $0x78] sm:$0xff] }
 0x9f3   : > { %3697 = vmatpush.msra.mxu2 %v3692_v40 }
 0x9f5   : > { %3698 = vmatpush.msra.mxu2 %v3691_v42 }
 0x9fa   : > { %v3467_v17 = vpop.xlane.xlu2 %3466 }
 0x9fb   : > { %v3482_v25 = vmul.f32 %v3467_v17, %v6376_v28 }
 0x9fd   : > { %v3490_v46 = vadd.f32 1e-05, %v3482_v25  ;;  %v3690_v25 = vld [vmem:[%s5501_s18 + $0x68] sm:$0xff] }
 0x9fe   : > { %3699 = vmatpush.msra.mxu2 %v3690_v25 }
 0x9ff   : > { %4907 = vrsqrt.f32 %v3490_v46  ;;  %vm3504_vm6 = vweird.f32 %v3490_v46 }
 0xa02   : > { %v3434_v45 = vpop.xlane.xlu2 %3433  ;;  %v3469_v32 = vpop.xlane.xlu1 %3468 }
 0xa03   : > { %v3449_v2 = vmul.f32 %v6376_v28, %v3434_v45  ;;  %v3483_v19 = vmul.f32 %v3469_v32, %v6376_v28 }
 0xa05   : > { %v4908_v54 = vpop.eup %4907  ;;  %v6437_v18 = vsub.f32 %v6386_v29, %v3449_v2  ;;  %v3491_v35 = vadd.f32 1e-05, %v3483_v19  ;;  %v3689_v19 = vld [vmem:[%s5501_s18 + $0x60] sm:$0xff] }
 0xa06   : > { %v3499_v47 = vmul.f32 %v4908_v54, %v3490_v46  ;;  %vm3505_vm5 = vweird.f32 %v4908_v54  ;;  %3700 = vmatpush.msra.mxu2 %v3689_v19 }
 0xa07   : > { %4909 = vrsqrt.f32 %v3491_v35  ;;  %v3465_v12 = vmul.f32 %v6437_v18, %v6437_v18  ;;  %vm3506_vm7 = vmor %vm3504_vm6, %vm3505_vm5  ;;  %vm3514_vm9 = vweird.f32 %v3491_v35 }
 0xa08   : > { %v3500_v10 = vmul.f32 %v4908_v54, %v3499_v47  ;;  %v3688_v47 = vld [vmem:[%s5501_s18 + $0x58] sm:$0xff] }
 0xa09   : > { %3480 = vadd.xlane.f32.xlu2 %v3465_v12  ;;  %3701 = vmatpush.msra.mxu2 %v3688_v47 }
 0xa0a   : > { %v3501_v41 = vmul.f32 0.5, %v3500_v10  ;;  %v3471_v44 = vpop.xlane.xlu0 %3470 }
 0xa0b   : > { %v3484_v36 = vmul.f32 %v3471_v44, %v6376_v28  ;;  %v3687_v44 = vld [vmem:[%s5501_s18 + $0x50] sm:$0xff] }
 0xa0c   : > { %v3502_v4 = vsub.f32 1.5, %v3501_v41  ;;  %3702 = vmatpush.msra.mxu2 %v3687_v44 }
 0xa0d   : > { %v4910_v53 = vpop.eup %4909  ;;  %v3492_v5 = vadd.f32 1e-05, %v3484_v36 }
 0xa0e   : > { %v3503_v7 = vmul.f32 %v4908_v54, %v3502_v4  ;;  %v3509_v50 = vmul.f32 %v4910_v53, %v3491_v35  ;;  %vm3515_vm8 = vweird.f32 %v4910_v53 }
 0xa0f   : > { %4911 = vrsqrt.f32 %v3492_v5  ;;  %vm3516_vm10 = vmor %vm3514_vm9, %vm3515_vm8  ;;  %vm3524_vm12 = vweird.f32 %v3492_v5 }
 0xa10   : > { %v3507_v60 = vsel %vm3506_vm7, %v4908_v54, %v3503_v7  ;;  %v3510_v29 = vmul.f32 %v4910_v53, %v3509_v50 }
 0xa11   : > { %v3578_v15 = vmul.f32 %v3507_v60, %v6379_v51 }
 0xa12   : > { %v3511_v14 = vmul.f32 0.5, %v3510_v29 }
 0xa13   : > { %v3589_v22 = vmul.f32 %v6447_v23, %v3578_v15  ;;  %v3685_v15 = vld [vmem:[%s5501_s18 + $0x40] sm:$0xff] }
 0xa14   : > { %v3512_v48 = vsub.f32 1.5, %v3511_v14 }
 0xa15   : > { %v4912_v1 = vpop.eup %4911  ;;  %v6459_v38 = vadd.f32 %v6455_v58, %v3589_v22 }
 0xa16   : > { %v3513_v3 = vmul.f32 %v4910_v53, %v3512_v48  ;;  %v3519_v39 = vmul.f32 %v4912_v1, %v3492_v5  ;;  %vm3525_vm11 = vweird.f32 %v4912_v1  ;;  %v3686_v5 = vld [vmem:[%s5501_s18 + $0x48] sm:$0xff]  ;;  %v3684_v48 = vld [vmem:[%s5501_s18 + $0x38] sm:$0xff] }
 0xa17   : > { %3644 = vmatmul.f32.vlgmr.msra.gmra.mxu1 %v6459_v38  ;;  %vm3526_vm13 = vmor %vm3524_vm12, %vm3525_vm11  ;;  %3703 = vmatpush.msra.mxu2 %v3686_v5 }
 0xa18   : > { %v3520_v51 = vmul.f32 %v4912_v1, %v3519_v39  ;;  %v3517_v59 = vsel %vm3516_vm10, %v4910_v53, %v3513_v3  ;;  %v3683_v39 = vld [vmem:[%s5501_s18 + $0x30] sm:$0xff] }
 0xa19   : > { %v3579_v56 = vmul.f32 %v3517_v59, %v6384_v62  ;;  %3704 = vmatpush.msra.mxu2 %v3685_v15  ;;  %v3758_v15 = vld [vmem:[%s6861_s6 + $0x60] sm:$0xff] }
 0xa1a   : > { %v3521_v8 = vmul.f32 0.5, %v3520_v51 }
 0xa1b   : > { %v3590_v37 = vmul.f32 %v6447_v23, %v3579_v56  ;;  %3705 = vmatpush.msra.mxu2 %v3684_v48  ;;  %v3682_v56 = vld [vmem:[%s5501_s18 + $0x28] sm:$0xff]  ;;  %v3757_v48 = vld [vmem:[%s6861_s6 + $0x58] sm:$0xff] }
 0xa1c   : > { %v3522_v9 = vsub.f32 1.5, %v3521_v8 }
 0xa1d   : > { %v6465_v6 = vadd.f32 %v6455_v58, %v3590_v37  ;;  %3706 = vmatpush.msra.mxu2 %v3683_v39  ;;  %v3755_v39 = vld [vmem:[%s6861_s6 + $0x48] sm:$0xff] }
 0xa1e   : > { %v3523_v57 = vmul.f32 %v4912_v1, %v3522_v9 }
 0xa1f   : > { %3647 = vmatmul.f32.gmra.mxu1 %v6465_v6  ;;  %3707 = vmatpush.msra.mxu2 %v3682_v56 }
 0xa20   : > { %v3527_v27 = vsel %vm3526_vm13, %v4912_v1, %v3523_v57 }
 0xa21   : > { %v3580_v16 = vmul.f32 %v3527_v27, %v6392_v24  ;;  %v3680_v27 = vld [vmem:[%s5501_s18 + $0x18] sm:$0xff] }
 0xa23   : > { %v3591_v62 = vmul.f32 %v6447_v23, %v3580_v16 }
 0xa25   : > { %v6471_v21 = vadd.f32 %v6455_v58, %v3591_v62 }
 0xa27   : > { %3650 = vmatmul.f32.gmra.mxu1 %v6471_v21 }
 0xa4d   : > { %v3473_v13 = vpop.xlane.xlu1 %3472 }
 0xa4e   : > { %v3485_v33 = vmul.f32 %v3473_v13, %v6376_v28 }
 0xa50   : > { %v3493_v11 = vadd.f32 1e-05, %v3485_v33 }
 0xa52   : > { %4913 = vrsqrt.f32 %v3493_v11  ;;  %vm3534_vm15 = vweird.f32 %v3493_v11 }
 0xa55   : > { %v3475_v31 = vpop.xlane.xlu2 %3474 }
 0xa56   : > { %v3486_v30 = vmul.f32 %v3475_v31, %v6376_v28 }
 0xa58   : > { %v4914_v26 = vpop.eup %4913  ;;  %v3494_v34 = vadd.f32 1e-05, %v3486_v30 }
 0xa59   : > { %v3529_v24 = vmul.f32 %v4914_v26, %v3493_v11  ;;  %vm3535_vm14 = vweird.f32 %v4914_v26  ;;  %v3679_v11 = vld [vmem:[%s5501_s18 + $0x10] sm:$0xff] }
 0xa5a   : > { %4915 = vrsqrt.f32 %v3494_v34  ;;  %vm3536_vm0 = vmor %vm3534_vm15, %vm3535_vm14  ;;  %vm3544_vm2 = vweird.f32 %v3494_v34 }
 0xa5b   : > { %v3530_v0 = vmul.f32 %v4914_v26, %v3529_v24 }
 0xa5d   : > { %v3531_v55 = vmul.f32 0.5, %v3530_v0  ;;  %v3477_v63 = vpop.xlane.xlu0 %3476 }
 0xa5e   : > { %v3487_v20 = vmul.f32 %v3477_v63, %v6376_v28 }
 0xa5f   : > { %v3532_v17 = vsub.f32 1.5, %v3531_v55 }
 0xa60   : > { %v4916_v46 = vpop.eup %4915  ;;  %v3495_v45 = vadd.f32 1e-05, %v3487_v20 }
 0xa61   : > { %v3533_v32 = vmul.f32 %v4914_v26, %v3532_v17  ;;  %v3539_v2 = vmul.f32 %v4916_v46, %v3494_v34  ;;  %vm3545_vm1 = vweird.f32 %v4916_v46  ;;  %v3677_v34 = vld [vmem:[%s5501_s18] sm:$0xff] }
 0xa62   : > { %4917 = vrsqrt.f32 %v3495_v45  ;;  %vm3546_vm3 = vmor %vm3544_vm2, %vm3545_vm1  ;;  %vm3554_vm5 = vweird.f32 %v3495_v45 }
 0xa63   : > { %v3537_v54 = vsel %vm3536_vm0, %v4914_v26, %v3533_v32  ;;  %v3540_v35 = vmul.f32 %v4916_v46, %v3539_v2  ;;  %v3678_v26 = vld [vmem:[%s5501_s18 + $0x8] sm:$0xff] }
 0xa64   : > { %v3581_v12 = vmul.f32 %v3537_v54, %v6399_v49 }
 0xa65   : > { %v3541_v10 = vmul.f32 0.5, %v3540_v35  ;;  %v3479_v41 = vpop.xlane.xlu1 %3478 }
 0xa66   : > { %v3488_v36 = vmul.f32 %v3479_v41, %v6376_v28  ;;  %v3592_v4 = vmul.f32 %v6447_v23, %v3581_v12 }
 0xa67   : > { %v3542_v53 = vsub.f32 1.5, %v3541_v10 }
 0xa68   : > { %v4918_v7 = vpop.eup %4917  ;;  %v3496_v50 = vadd.f32 1e-05, %v3488_v36  ;;  %v6488_v60 = vadd.f32 %v6455_v58, %v3592_v4 }
 0xa69   : > { %v3543_v49 = vmul.f32 %v4916_v46, %v3542_v53  ;;  %v3549_v29 = vmul.f32 %v4918_v7, %v3495_v45  ;;  %vm3555_vm4 = vweird.f32 %v4918_v7 }
 0xa6a   : > { %4919 = vrsqrt.f32 %v3496_v50  ;;  %3653 = vmatmul.f32.gmra.mxu1 %v6488_v60  ;;  %vm3556_vm6 = vmor %vm3554_vm5, %vm3555_vm4  ;;  %vm3564_vm8 = vweird.f32 %v3496_v50 }
 0xa6b   : > { %v3547_v14 = vsel %vm3546_vm3, %v4916_v46, %v3543_v49  ;;  %v3550_v22 = vmul.f32 %v4918_v7, %v3549_v29  ;;  %v3760_v49 = vld [vmem:[%s6861_s6 + $0x70] sm:$0xff]  ;;  %v3759_v29 = vld [vmem:[%s6861_s6 + $0x68] sm:$0xff] }
 0xa6c   : > { %v3582_v1 = vmul.f32 %v3547_v14, %v6405_v61  ;;  %v3681_v61 = vld [vmem:[%s5501_s18 + $0x20] sm:$0xff] }
 0xa6d   : > { %v3551_v3 = vmul.f32 0.5, %v3550_v22  ;;  %3708 = vmatpush.msra.mxu2 %v3681_v61 }
 0xa6e   : > { %v3593_v51 = vmul.f32 %v6447_v23, %v3582_v1 }
 0xa6f   : > { %v3552_v59 = vsub.f32 1.5, %v3551_v3  ;;  %3709 = vmatpush.msra.mxu2 %v3680_v27  ;;  %v3756_v3 = vld [vmem:[%s6861_s6 + $0x50] sm:$0xff]  ;;  %v3751_v27 = vld [vmem:[%s6861_s6 + $0x28] sm:$0xff] }
 0xa70   : > { %v4920_v8 = vpop.eup %4919  ;;  %v6498_v37 = vadd.f32 %v6455_v58, %v3593_v51  ;;  %v3754_v51 = vld [vmem:[%s6861_s6 + $0x40] sm:$0xff] }
 0xa71   : > { %v3553_v9 = vmul.f32 %v4918_v7, %v3552_v59  ;;  %v3559_v57 = vmul.f32 %v4920_v8, %v3496_v50  ;;  %3710 = vmatpush.msra.mxu2 %v3679_v11  ;;  %vm3565_vm7 = vweird.f32 %v4920_v8  ;;  %v3761_v50 = vld [vmem:[%s6861_s6 + $0x78] sm:$0xff]  ;;  %v3748_v11 = vld [vmem:[%s6861_s6 + $0x10] sm:$0xff] }
 0xa72   : > { %3656 = vmatmul.f32.gmra.mxu1 %v6498_v37  ;;  %vm3566_vm9 = vmor %vm3564_vm8, %vm3565_vm7  ;;  %3766 = vmatpush.msrb.mxu3 %v3761_v50 }
 0xa73   : > { %v3557_v16 = vsel %vm3556_vm6, %v4918_v7, %v3553_v9  ;;  %v3560_v62 = vmul.f32 %v4920_v8, %v3559_v57  ;;  %3711 = vmatpush.msra.mxu2 %v3678_v26  ;;  %v3752_v57 = vld [vmem:[%s6861_s6 + $0x30] sm:$0xff]  ;;  %v3746_v26 = vld [vmem:[%s6861_s6] sm:$0xff] }
 0xa74   : > { %v3583_v13 = vmul.f32 %v3557_v16, %v6414_v52  ;;  %3767 = vmatpush.msrb.mxu3 %v3760_v49 }
 0xa75   : > { %v3561_v33 = vmul.f32 0.5, %v3560_v62  ;;  %3712 = vmatpush.msra.mxu2 %v3677_v34  ;;  %v3750_v62 = vld [vmem:[%s6861_s6 + $0x20] sm:$0xff] }
 0xa76   : > { %v3594_v31 = vmul.f32 %v6447_v23, %v3583_v13  ;;  %3768 = vmatpush.msrb.mxu3 %v3759_v29  ;;  %v3749_v13 = vld [vmem:[%s6861_s6 + $0x18] sm:$0xff] }
 0xa77   : > { %v3562_v30 = vsub.f32 1.5, %v3561_v33 }
 0xa78   : > { %v6509_v24 = vadd.f32 %v6455_v58, %v3594_v31  ;;  %3769 = vmatpush.msrb.mxu3 %v3758_v15  ;;  %v4776_v15 = vld [vmem:[%s924_s9] ss:$0 sm:$0xff]  ;;  %s6864_s9 = sld [smem:[#allocation52_spill]] (!%p4556_p6) }
 0xa79   : > { %v3563_v0 = vmul.f32 %v4920_v8, %v3562_v30  ;;  %v3747_v30 = vld [vmem:[%s6861_s6 + $0x8] sm:$0xff] }
 0xa7a   : > { %3659 = vmatmul.f32.gmra.mxu1 %v6509_v24  ;;  %3770 = vmatpush.msrb.mxu3 %v3757_v48 }
 0xa7b   : > { %v3567_v52 = vsel %vm3566_vm9, %v4920_v8, %v3563_v0  ;;  %v3753_v8 = vld [vmem:[%s6861_s6 + $0x38] sm:$0xff] }
 0xa7c   : > { %v3481_v40 = vpop.xlane.xlu2 %3480  ;;  %v3584_v42 = vmul.f32 %v3567_v52, %v6424_v43  ;;  %v6524_v43 = vld [vmem:[%s918_s3] ss:$0 sm:$0xff]  ;;  %3771 = vmatpush.msrb.mxu3 %v3756_v3 }
 0xa7d   : > { %v3489_v55 = vmul.f32 %v3481_v40, %v6376_v28 }
 0xa7e   : > { %v3595_v63 = vmul.f32 %v6447_v23, %v3584_v42  ;;  %3772 = vmatpush.msrb.mxu3 %v3755_v39 }
 0xa7f   : > { %v3497_v20 = vadd.f32 1e-05, %v3489_v55  ;;  %v4775_v55 = vld [vmem:[%s921_s7] ss:$0 sm:$0xff] }
 0xa80   : > { %v6516_v17 = vadd.f32 %v6455_v58, %v3595_v63  ;;  %3773 = vmatpush.msrb.mxu3 %v3754_v51 }
 0xa81   : > { %4921 = vrsqrt.f32 %v3497_v20  ;;  %vm3574_vm11 = vweird.f32 %v3497_v20 }
 0xa82   : > { %3662 = vmatmul.f32.gmra.mxu1 %v6516_v17  ;;  %3774 = vmatpush.msrb.mxu3 %v3753_v8 }
 0xa84   : > { %3775 = vmatpush.msrb.mxu3 %v3752_v57 }
 0xa86   : > { %3776 = vmatpush.msrb.mxu3 %v3751_v27 }
 0xa87   : > { %v4922_v25 = vpop.eup %4921 }
 0xa88   : > { %v3569_v46 = vmul.f32 %v4922_v25, %v3497_v20  ;;  %vm3575_vm10 = vweird.f32 %v4922_v25  ;;  %3777 = vmatpush.msrb.mxu3 %v3750_v62 }
 0xa89   : > { %vm3576_vm12 = vmor %vm3574_vm11, %vm3575_vm10 }
 0xa8a   : > { %v3570_v45 = vmul.f32 %v4922_v25, %v3569_v46  ;;  %3778 = vmatpush.msrb.mxu3 %v3749_v13 }
 0xa8c   : > { %v3571_v32 = vmul.f32 0.5, %v3570_v45  ;;  %3779 = vmatpush.msrb.mxu3 %v3748_v11 }
 0xa8e   : > { %v3572_v2 = vsub.f32 1.5, %v3571_v32  ;;  %3780 = vmatpush.msrb.mxu3 %v3747_v30 }
 0xa90   : > { %v3573_v19 = vmul.f32 %v4922_v25, %v3572_v2  ;;  %3781 = vmatpush.msrb.mxu3 %v3746_v26 }
 0xa92   : > { %v3577_v54 = vsel %vm3576_vm12, %v4922_v25, %v3573_v19 }
 0xa93   : > { %v3585_v35 = vmul.f32 %v3577_v54, %v6437_v18 }
 0xa94   : > { %v3645_v47 = vpop.f32.mrf.mxu1 }
 0xa95   : > { %v3646_v12 = vadd.f32 %v6524_v43, %v3645_v47  ;;  %v3596_v10 = vmul.f32 %v6447_v23, %v3585_v35 }
 0xa97   : > { %v3669_v41 = vmax.f32 %v3646_v12, 0.0  ;;  %v6530_v44 = vadd.f32 %v6455_v58, %v3596_v10 }
 0xa99   : > { %3665 = vmatmul.f32.gmra.mxu1 %v6530_v44  ;;  %3713 = vmatmul.f32.vlgmr.msra.gmra.mxu2 %v3669_v41 }
 0xa9c   : > { %v3648_v36 = vpop.f32.mrf.mxu1 }
 0xa9d   : > { %v3649_v4 = vadd.f32 %v6524_v43, %v3648_v36 }
 0xa9f   : > { %v3670_v18 = vmax.f32 %v3649_v4, 0.0 }
 0xaa1   : > { %3716 = vmatmul.f32.gmra.mxu2 %v3670_v18 }
 0xaa4   : > { %v3651_v53 = vpop.f32.mrf.mxu1 }
 0xaa5   : > { %v3652_v5 = vadd.f32 %v6524_v43, %v3651_v53 }
 0xaa7   : > { %v3671_v7 = vmax.f32 %v3652_v5, 0.0 }
 0xaa9   : > { %3719 = vmatmul.f32.gmra.mxu2 %v3671_v7 }
 0xae7   : > { %v3654_v14 = vpop.f32.mrf.mxu1 }
 0xae8   : > { %v3655_v22 = vadd.f32 %v6524_v43, %v3654_v14 }
 0xaea   : > { %v3672_v1 = vmax.f32 %v3655_v22, 0.0 }
 0xaec   : > { %3722 = vmatmul.f32.gmra.mxu2 %v3672_v1 }
 0xaef   : > { %v3657_v59 = vpop.f32.mrf.mxu1 }
 0xaf0   : > { %v3658_v56 = vadd.f32 %v6524_v43, %v3657_v59 }
 0xaf2   : > { %v3673_v9 = vmax.f32 %v3658_v56, 0.0 }
 0xaf4   : > { %3725 = vmatmul.f32.gmra.mxu2 %v3673_v9 }
 0xaf7   : > { %v3660_v61 = vpop.f32.mrf.mxu1 }
 0xaf8   : > { %v3661_v16 = vadd.f32 %v6524_v43, %v3660_v61 }
 0xafa   : > { %v3674_v33 = vmax.f32 %v3661_v16, 0.0 }
 0xafc   : > { %3728 = vmatmul.f32.gmra.mxu2 %v3674_v33 }
 0xaff   : > { %v3663_v31 = vpop.f32.mrf.mxu1 }
 0xb00   : > { %v3664_v34 = vadd.f32 %v6524_v43, %v3663_v31 }
 0xb02   : > { %v3675_v0 = vmax.f32 %v3664_v34, 0.0 }
 0xb04   : > { %3731 = vmatmul.f32.gmra.mxu2 %v3675_v0 }
 0xb16   : > { %v3666_v52 = vpop.f32.mrf.mxu1 }
 0xb17   : > { %v3667_v40 = vadd.f32 %v6524_v43, %v3666_v52 }
 0xb19   : > { %v3676_v42 = vmax.f32 %v3667_v40, 0.0 }
 0xb1b   : > { %3734 = vmatmul.f32.gmra.mxu2 %v3676_v42 }
 0xb1c   : > { %v3714_v63 = vpop.f32.mrf.mxu2 }
 0xb1d   : > { %v3715_v20 = vadd.f32 %v4775_v55, %v3714_v63 }
 0xb1f   : > { %v3738_v25 = vmax.f32 %v3715_v20, 0.0 }
 0xb21   : > { %3782 = vmatmul.f32.vlgmr.msrb.gmra.mxu3 %v3738_v25 }
 0xb24   : > { %v3717_v46 = vpop.f32.mrf.mxu2 }
 0xb25   : > { %v3718_v45 = vadd.f32 %v4775_v55, %v3717_v46 }
 0xb27   : > { %v3739_v32 = vmax.f32 %v3718_v45, 0.0 }
 0xb29   : > { %3785 = vmatmul.f32.gmra.mxu3 %v3739_v32 }
 0xb2c   : > { %v3720_v2 = vpop.f32.mrf.mxu2 }
 0xb2d   : > { %v3721_v19 = vadd.f32 %v4775_v55, %v3720_v2 }
 0xb2f   : > { %v3740_v54 = vmax.f32 %v3721_v19, 0.0 }
 0xb31   : > { %3788 = vmatmul.f32.gmra.mxu3 %v3740_v54 }
 0xb6f   : > { %v3723_v43 = vpop.f32.mrf.mxu2 }
 0xb70   : > { %v3724_v35 = vadd.f32 %v4775_v55, %v3723_v43 }
 0xb72   : > { %v3741_v47 = vmax.f32 %v3724_v35, 0.0 }
 0xb74   : > { %3791 = vmatmul.f32.gmra.mxu3 %v3741_v47 }
 0xb77   : > { %v3726_v12 = vpop.f32.mrf.mxu2 }
 0xb78   : > { %v3727_v10 = vadd.f32 %v4775_v55, %v3726_v12 }
 0xb7a   : > { %v3742_v41 = vmax.f32 %v3727_v10, 0.0 }
 0xb7c   : > { %3794 = vmatmul.f32.gmra.mxu3 %v3742_v41 }
 0xb7f   : > { %v3729_v36 = vpop.f32.mrf.mxu2 }
 0xb80   : > { %v3730_v4 = vadd.f32 %v4775_v55, %v3729_v36 }
 0xb82   : > { %v3743_v18 = vmax.f32 %v3730_v4, 0.0 }
 0xb84   : > { %3797 = vmatmul.f32.gmra.mxu3 %v3743_v18 }
 0xb87   : > { %v3732_v53 = vpop.f32.mrf.mxu2 }
 0xb88   : > { %v3733_v5 = vadd.f32 %v4775_v55, %v3732_v53 }
 0xb8a   : > { %v3744_v7 = vmax.f32 %v3733_v5, 0.0 }
 0xb8c   : > { %3800 = vmatmul.f32.gmra.mxu3 %v3744_v7 }
 0xb9e   : > { %v3735_v50 = vpop.f32.mrf.mxu2 }
 0xb9f   : > { %v3736_v49 = vadd.f32 %v4775_v55, %v3735_v50 }
 0xba1   : > { %v3745_v29 = vmax.f32 %v3736_v49, 0.0 }
 0xba3   : > { %3803 = vmatmul.f32.gmra.mxu3 %v3745_v29 }
 0xba4   : > { %v3783_v14 = vpop.f32.mrf.mxu3 }
 0xba5   : > { %v3784_v22 = vadd.f32 %v4776_v15, %v3783_v14 }
 0xba7   : > { %v3807_v48 = vadd.f32 %v3784_v22, %v6459_v38 }
 0xba9   : > { %3815 = vadd.xlane.f32.xlu0 %v3807_v48 }
 0xbac   : > { %v3786_v1 = vpop.f32.mrf.mxu3 }
 0xbad   : > { %v3787_v3 = vadd.f32 %v4776_v15, %v3786_v1 }
 0xbaf   : > { %v3808_v39 = vadd.f32 %v3787_v3, %v6465_v6 }
 0xbb1   : > { %3817 = vadd.xlane.f32.xlu1 %v3808_v39 }
 0xbb4   : > { %v3789_v51 = vpop.f32.mrf.mxu3 }
 0xbb5   : > { %v3790_v59 = vadd.f32 %v4776_v15, %v3789_v51 }
 0xbb7   : > { %v3809_v56 = vadd.f32 %v3790_v59, %v6471_v21 }
 0xbb9   : > { %3819 = vadd.xlane.f32.xlu2 %v3809_v56 }
 0xbf7   : > { %v3792_v8 = vpop.f32.mrf.mxu3 }
 0xbf8   : > { %v3793_v9 = vadd.f32 %v4776_v15, %v3792_v8 }
 0xbfa   : > { %v3810_v57 = vadd.f32 %v3793_v9, %v6488_v60 }
 0xbfc   : > { %3821 = vadd.xlane.f32.xlu0 %v3810_v57 }
 0xbff   : > { %v3795_v61 = vpop.f32.mrf.mxu3 }
 0xc00   : > { %v3796_v27 = vadd.f32 %v4776_v15, %v3795_v61 }
 0xc02   : > { %v3811_v38 = vadd.f32 %v3796_v27, %v6498_v37 }
 0xc04   : > { %3823 = vadd.xlane.f32.xlu1 %v3811_v38 }
 0xc07   : > { %v3798_v16 = vpop.f32.mrf.mxu3 }
 0xc08   : > { %v3799_v62 = vadd.f32 %v4776_v15, %v3798_v16 }
 0xc0a   : > { %v3812_v6 = vadd.f32 %v3799_v62, %v6509_v24 }
 0xc0c   : > { %3825 = vadd.xlane.f32.xlu2 %v3812_v6 }
 0xc0f   : > { %v3801_v13 = vpop.f32.mrf.mxu3 }
 0xc10   : > { %v3802_v33 = vadd.f32 %v4776_v15, %v3801_v13 }
 0xc12   : > { %v3813_v21 = vadd.f32 %v3802_v33, %v6516_v17 }
 0xc14   : > { %3827 = vadd.xlane.f32.xlu0 %v3813_v21 }
 0xc1c   : > { %v3816_v11 = vpop.xlane.xlu0 %3815 }
 0xc1d   : > { %v3831_v31 = vmul.f32 %v3816_v11, %v6376_v28 }
 0xc1f   : > { %v6574_v60 = vsub.f32 %v3807_v48, %v3831_v31 }
 0xc21   : > { %v3847_v30 = vmul.f32 %v6574_v60, %v6574_v60 }
 0xc23   : > { %3855 = vadd.xlane.f32.xlu2 %v3847_v30 }
 0xc24   : > { %v3818_v37 = vpop.xlane.xlu1 %3817 }
 0xc25   : > { %v3832_v26 = vmul.f32 %v3818_v37, %v6376_v28 }
 0xc26   : > { %v3804_v34 = vpop.f32.mrf.mxu3 }
 0xc27   : > { %v6579_v24 = vsub.f32 %v3808_v39, %v3832_v26  ;;  %v3805_v0 = vadd.f32 %v4776_v15, %v3804_v34 }
 0xc29   : > { %v3814_v52 = vadd.f32 %v3805_v0, %v6530_v44  ;;  %v3848_v17 = vmul.f32 %v6579_v24, %v6579_v24 }
 0xc2b   : > { %3829 = vadd.xlane.f32.xlu1 %v3814_v52  ;;  %3857 = vadd.xlane.f32.xlu0 %v3848_v17 }
 0xc2c   : > { %v3820_v40 = vpop.xlane.xlu2 %3819 }
 0xc2d   : > { %v3833_v42 = vmul.f32 %v3820_v40, %v6376_v28 }
 0xc2f   : > { %v6585_v55 = vsub.f32 %v3809_v56, %v3833_v42 }
 0xc31   : > { %v3849_v63 = vmul.f32 %v6585_v55, %v6585_v55 }
 0xc33   : > { %3859 = vadd.xlane.f32.xlu1 %v3849_v63 }
 0xc6f   : > { %v3822_v20 = vpop.xlane.xlu0 %3821 }
 0xc70   : > { %v3834_v25 = vmul.f32 %v3822_v20, %v6376_v28 }
 0xc72   : > { %v6590_v46 = vsub.f32 %v3810_v57, %v3834_v25 }
 0xc74   : > { %v3850_v44 = vmul.f32 %v6590_v46, %v6590_v46 }
 0xc76   : > { %3861 = vadd.xlane.f32.xlu2 %v3850_v44 }
 0xc77   : > { %v3824_v45 = vpop.xlane.xlu1 %3823 }
 0xc78   : > { %v3835_v32 = vmul.f32 %v3824_v45, %v6376_v28 }
 0xc7a   : > { %v6595_v2 = vsub.f32 %v3811_v38, %v3835_v32 }
 0xc7c   : > { %v3851_v19 = vmul.f32 %v6595_v2, %v6595_v2 }
 0xc7e   : > { %3863 = vadd.xlane.f32.xlu0 %v3851_v19 }
 0xc7f   : > { %v3826_v54 = vpop.xlane.xlu2 %3825 }
 0xc80   : > { %v3836_v43 = vmul.f32 %v3826_v54, %v6376_v28 }
 0xc82   : > { %v6600_v35 = vsub.f32 %v3812_v6, %v3836_v43 }
 0xc84   : > { %v3852_v47 = vmul.f32 %v6600_v35, %v6600_v35 }
 0xc86   : > { %3865 = vadd.xlane.f32.xlu1 %v3852_v47 }
 0xc87   : > { %v3828_v12 = vpop.xlane.xlu0 %3827 }
 0xc88   : > { %v3837_v10 = vmul.f32 %v3828_v12, %v6376_v28 }
 0xc8a   : > { %v6605_v41 = vsub.f32 %v3813_v21, %v3837_v10 }
 0xc8c   : > { %v3853_v36 = vmul.f32 %v6605_v41, %v6605_v41 }
 0xc8e   : > { %3867 = vadd.xlane.f32.xlu2 %v3853_v36 }
 0xc96   : > { %v3856_v4 = vpop.xlane.xlu2 %3855 }
 0xc97   : > { %v3871_v18 = vmul.f32 %v3856_v4, %v6376_v28 }
 0xc99   : > { %v3879_v53 = vadd.f32 1e-05, %v3871_v18 }
 0xc9b   : > { %4923 = vrsqrt.f32 %v3879_v53  ;;  %vm3893_vm14 = vweird.f32 %v3879_v53 }
 0xc9e   : > { %v3858_v5 = vpop.xlane.xlu0 %3857  ;;  %v3830_v7 = vpop.xlane.xlu1 %3829 }
 0xc9f   : > { %v3872_v50 = vmul.f32 %v3858_v5, %v6376_v28  ;;  %v3838_v49 = vmul.f32 %v3830_v7, %v6376_v28 }
 0xca1   : > { %v4924_v29 = vpop.eup %4923  ;;  %v3880_v15 = vadd.f32 1e-05, %v3872_v50  ;;  %v6612_v14 = vsub.f32 %v3814_v52, %v3838_v49 }
 0xca2   : > { %v3888_v22 = vmul.f32 %v4924_v29, %v3879_v53  ;;  %vm3894_vm13 = vweird.f32 %v4924_v29 }
 0xca3   : > { %4925 = vrsqrt.f32 %v3880_v15  ;;  %v3854_v48 = vmul.f32 %v6612_v14, %v6612_v14  ;;  %vm3895_vm15 = vmor %vm3893_vm14, %vm3894_vm13  ;;  %vm3903_vm1 = vweird.f32 %v3880_v15 }
 0xca4   : > { %v3889_v1 = vmul.f32 %v4924_v29, %v3888_v22 }
 0xca5   : > { %3869 = vadd.xlane.f32.xlu0 %v3854_v48 }
 0xca6   : > { %v3890_v3 = vmul.f32 0.5, %v3889_v1  ;;  %v3860_v39 = vpop.xlane.xlu1 %3859 }
 0xca7   : > { %v3873_v51 = vmul.f32 %v3860_v39, %v6376_v28 }
 0xca8   : > { %v3891_v59 = vsub.f32 1.5, %v3890_v3 }
 0xca9   : > { %v4926_v56 = vpop.eup %4925  ;;  %v3881_v8 = vadd.f32 1e-05, %v3873_v51 }
 0xcaa   : > { %v3892_v9 = vmul.f32 %v4924_v29, %v3891_v59  ;;  %v3898_v57 = vmul.f32 %v4926_v56, %v3880_v15  ;;  %vm3904_vm0 = vweird.f32 %v4926_v56 }
 0xcab   : > { %4927 = vrsqrt.f32 %v3881_v8  ;;  %vm3905_vm2 = vmor %vm3903_vm1, %vm3904_vm0  ;;  %vm3913_vm4 = vweird.f32 %v3881_v8 }
 0xcac   : > { %v3896_v61 = vsel %vm3895_vm15, %v4924_v29, %v3892_v9  ;;  %v3899_v27 = vmul.f32 %v4926_v56, %v3898_v57 }
 0xcad   : > { %v3967_v38 = vmul.f32 %v3896_v61, %v6574_v60 }
 0xcae   : > { %v3900_v16 = vmul.f32 0.5, %v3899_v27 }
 0xcaf   : > { %v3975_v62 = vmul.f32 %v6447_v23, %v3967_v38 }
 0xcb0   : > { %v3901_v6 = vsub.f32 1.5, %v3900_v16 }
 0xcb1   : > { %v4928_v13 = vpop.eup %4927  ;;  %v6620_v33 = vadd.f32 %v6455_v58, %v3975_v62 }
 0xcb2   : > { %v3902_v21 = vmul.f32 %v4926_v56, %v3901_v6  ;;  %v3908_v11 = vmul.f32 %v4928_v13, %v3881_v8  ;;  %vm3914_vm3 = vweird.f32 %v4928_v13 }
 0xcb3   : > { %3991 = vst [vmem:[#allocation2 + $0x30] sm:$0xff] %v6620_v33  ;;  %vm3915_vm5 = vmor %vm3913_vm4, %vm3914_vm3 }
 0xcb4   : > { %v3906_v31 = vsel %vm3905_vm2, %v4926_v56, %v3902_v21  ;;  %v3909_v30 = vmul.f32 %v4928_v13, %v3908_v11 }
 0xcb5   : > { %v3968_v37 = vmul.f32 %v3906_v31, %v6579_v24 }
 0xcb6   : > { %v3910_v60 = vmul.f32 0.5, %v3909_v30 }
 0xcb7   : > { %v3976_v26 = vmul.f32 %v6447_v23, %v3968_v37 }
 0xcb8   : > { %v3911_v34 = vsub.f32 1.5, %v3910_v60 }
 0xcb9   : > { %v6626_v0 = vadd.f32 %v6455_v58, %v3976_v26 }
 0xcba   : > { %v3912_v52 = vmul.f32 %v4928_v13, %v3911_v34 }
 0xcbb   : > { %3992 = vst [vmem:[#allocation2] sm:$0xff] %v6626_v0 }
 0xcbc   : > { %v3916_v17 = vsel %vm3915_vm5, %v4928_v13, %v3912_v52 }
 0xcbd   : > { %v3969_v40 = vmul.f32 %v3916_v17, %v6585_v55 }
 0xcbf   : > { %v3977_v42 = vmul.f32 %v6447_v23, %v3969_v40 }
 0xcc1   : > { %v6632_v24 = vadd.f32 %v6455_v58, %v3977_v42 }
 0xcc3   : > { %3993 = vst [vmem:[#allocation2 + $0x18] sm:$0xff] %v6632_v24 }
 0xce9   : > { %v3862_v63 = vpop.xlane.xlu2 %3861 }
 0xcea   : > { %v3874_v20 = vmul.f32 %v3862_v63, %v6376_v28 }
 0xcec   : > { %v3882_v25 = vadd.f32 1e-05, %v3874_v20 }
 0xcee   : > { %4929 = vrsqrt.f32 %v3882_v25  ;;  %vm3923_vm7 = vweird.f32 %v3882_v25 }
 0xcf1   : > { %v3864_v44 = vpop.xlane.xlu0 %3863 }
 0xcf2   : > { %v3875_v45 = vmul.f32 %v3864_v44, %v6376_v28 }
 0xcf4   : > { %v4930_v32 = vpop.eup %4929  ;;  %v3883_v19 = vadd.f32 1e-05, %v3875_v45 }
 0xcf5   : > { %v3918_v54 = vmul.f32 %v4930_v32, %v3882_v25  ;;  %vm3924_vm6 = vweird.f32 %v4930_v32 }
 0xcf6   : > { %4931 = vrsqrt.f32 %v3883_v19  ;;  %vm3925_vm8 = vmor %vm3923_vm7, %vm3924_vm6  ;;  %vm3933_vm10 = vweird.f32 %v3883_v19 }
 0xcf7   : > { %v3919_v55 = vmul.f32 %v4930_v32, %v3918_v54 }
 0xcf9   : > { %v3920_v43 = vmul.f32 0.5, %v3919_v55  ;;  %v3866_v47 = vpop.xlane.xlu1 %3865 }
 0xcfa   : > { %v3876_v12 = vmul.f32 %v3866_v47, %v6376_v28 }
 0xcfb   : > { %v3921_v10 = vsub.f32 1.5, %v3920_v43 }
 0xcfc   : > { %v4932_v36 = vpop.eup %4931  ;;  %v3884_v4 = vadd.f32 1e-05, %v3876_v12 }
 0xcfd   : > { %v3922_v18 = vmul.f32 %v4930_v32, %v3921_v10  ;;  %v3928_v53 = vmul.f32 %v4932_v36, %v3883_v19  ;;  %vm3934_vm9 = vweird.f32 %v4932_v36 }
 0xcfe   : > { %4933 = vrsqrt.f32 %v3884_v4  ;;  %vm3935_vm11 = vmor %vm3933_vm10, %vm3934_vm9  ;;  %vm3943_vm13 = vweird.f32 %v3884_v4 }
 0xcff   : > { %v3926_v5 = vsel %vm3925_vm8, %v4930_v32, %v3922_v18  ;;  %v3929_v7 = vmul.f32 %v4932_v36, %v3928_v53 }
 0xd00   : > { %v3970_v50 = vmul.f32 %v3926_v5, %v6590_v46 }
 0xd01   : > { %v3930_v49 = vmul.f32 0.5, %v3929_v7  ;;  %v3868_v29 = vpop.xlane.xlu2 %3867 }
 0xd02   : > { %v3978_v15 = vmul.f32 %v6447_v23, %v3970_v50  ;;  %v3877_v22 = vmul.f32 %v3868_v29, %v6376_v28 }
 0xd03   : > { %v3931_v48 = vsub.f32 1.5, %v3930_v49 }
 0xd04   : > { %v4934_v1 = vpop.eup %4933  ;;  %v6642_v3 = vadd.f32 %v6455_v58, %v3978_v15  ;;  %v3885_v39 = vadd.f32 1e-05, %v3877_v22 }
 0xd05   : > { %v3932_v51 = vmul.f32 %v4932_v36, %v3931_v48  ;;  %v3938_v59 = vmul.f32 %v4934_v1, %v3884_v4  ;;  %vm3944_vm12 = vweird.f32 %v4934_v1 }
 0xd06   : > { %3994 = vst [vmem:[#allocation2 + $0x10] sm:$0xff] %v6642_v3  ;;  %4935 = vrsqrt.f32 %v3885_v39  ;;  %vm3945_vm14 = vmor %vm3943_vm13, %vm3944_vm12  ;;  %vm3953_vm0 = vweird.f32 %v3885_v39 }
 0xd07   : > { %v3936_v46 = vsel %vm3935_vm11, %v4932_v36, %v3932_v51  ;;  %v3939_v56 = vmul.f32 %v4934_v1, %v3938_v59 }
 0xd08   : > { %v3971_v8 = vmul.f32 %v3936_v46, %v6595_v2 }
 0xd09   : > { %v3940_v9 = vmul.f32 0.5, %v3939_v56 }
 0xd0a   : > { %v3979_v57 = vmul.f32 %v6447_v23, %v3971_v8 }
 0xd0b   : > { %v3941_v61 = vsub.f32 1.5, %v3940_v9 }
 0xd0c   : > { %v4936_v27 = vpop.eup %4935  ;;  %v6648_v38 = vadd.f32 %v6455_v58, %v3979_v57 }
 0xd0d   : > { %v3942_v16 = vmul.f32 %v4934_v1, %v3941_v61  ;;  %v3948_v62 = vmul.f32 %v4936_v27, %v3885_v39  ;;  %vm3954_vm15 = vweird.f32 %v4936_v27 }
 0xd0e   : > { %3995 = vst [vmem:[#allocation2 + $0x8] sm:$0xff] %v6648_v38  ;;  %vm3955_vm1 = vmor %vm3953_vm0, %vm3954_vm15 }
 0xd0f   : > { %v3946_v6 = vsel %vm3945_vm14, %v4934_v1, %v3942_v16  ;;  %v3949_v13 = vmul.f32 %v4936_v27, %v3948_v62 }
 0xd10   : > { %v3972_v21 = vmul.f32 %v3946_v6, %v6600_v35 }
 0xd11   : > { %v3950_v2 = vmul.f32 0.5, %v3949_v13 }
 0xd12   : > { %v3980_v11 = vmul.f32 %v6447_v23, %v3972_v21 }
 0xd13   : > { %v3951_v31 = vsub.f32 1.5, %v3950_v2 }
 0xd14   : > { %v3988_v30 = vadd.f32 %v6455_v58, %v3980_v11 }
 0xd15   : > { %v3952_v37 = vmul.f32 %v4936_v27, %v3951_v31 }
 0xd16   : > { %3996 = vst [vmem:[#allocation2 + $0x20] sm:$0xff] %v3988_v30 }
 0xd17   : > { %v3956_v60 = vsel %vm3955_vm1, %v4936_v27, %v3952_v37 }
 0xd18   : > { %v3973_v26 = vmul.f32 %v3956_v60, %v6605_v41  ;;  %v3870_v34 = vpop.xlane.xlu0 %3869 }
 0xd19   : > { %v3878_v52 = vmul.f32 %v3870_v34, %v6376_v28 }
 0xd1a   : > { %v3981_v17 = vmul.f32 %v6447_v23, %v3973_v26 }
 0xd1b   : > { %v3886_v35 = vadd.f32 1e-05, %v3878_v52 }
 0xd1c   : > { %v3989_v40 = vadd.f32 %v6455_v58, %v3981_v17 }
 0xd1d   : > { %4937 = vrsqrt.f32 %v3886_v35  ;;  %vm3963_vm3 = vweird.f32 %v3886_v35 }
 0xd1e   : > { %3997 = vst [vmem:[#allocation2 + $0x28] sm:$0xff] %v3989_v40 }
 0xd23   : > { %v4938_v42 = vpop.eup %4937 }
 0xd24   : > { %v3958_v63 = vmul.f32 %v4938_v42, %v3886_v35  ;;  %vm3964_vm2 = vweird.f32 %v4938_v42 }
 0xd25   : > { %vm3965_vm4 = vmor %vm3963_vm3, %vm3964_vm2 }
 0xd26   : > { %v3959_v20 = vmul.f32 %v4938_v42, %v3958_v63 }
 0xd28   : > { %v3960_v25 = vmul.f32 0.5, %v3959_v20 }
 0xd2a   : > { %v3961_v44 = vsub.f32 1.5, %v3960_v25 }
 0xd2c   : > { %v3962_v45 = vmul.f32 %v4938_v42, %v3961_v44 }
 0xd2e   : > { %v3966_v41 = vsel %vm3965_vm4, %v4938_v42, %v3962_v45 }
 0xd2f   : > { %v3974_v32 = vmul.f32 %v3966_v41, %v6612_v14 }
 0xd31   : > { %v3982_v28 = vmul.f32 %v6447_v23, %v3974_v32  ;;  %4002 = sbr.rel (%p4556_p6) target bundleno = 3673 (0xe59), region = 124 }
 0xd33   : > { %v3990_v19 = vadd.f32 %v6455_v58, %v3982_v28 }
 0xd35   : > { %3998 = vst [vmem:[#allocation2 + $0x38] sm:$0xff] %v3990_v19 }
 0xd36   : > { %v4081_v54 = vld [vmem:[#allocation11 + $0x78] sm:$0xff]  ;;  %v4080_v55 = vld [vmem:[#allocation11 + $0x70] sm:$0xff]  ;;  %v4079_v43 = vld [vmem:[#allocation11 + $0x68] sm:$0xff]  ;;  %v4003_v12 = vrot.slane %v6620_v33, 4  ;;  %v4009_v10 = vrot.slane %v6626_v0, 4  ;;  %v4015_v14 = vrot.slane %v6632_v24, 4 }
 0xd37   : > { %4109 = vmatpush.msra.mxu0 %v4081_v54  ;;  %v4078_v47 = vld [vmem:[#allocation11 + $0x60] sm:$0xff]  ;;  %v4021_v23 = vrot.slane %v6642_v3, 4  ;;  %v4077_v58 = vld [vmem:[#allocation11 + $0x58] sm:$0xff]  ;;  %v4027_v36 = vrot.slane %v6648_v38, 4  ;;  %v4144_v18 = vld [vmem:[%s6864_s9 + $0x70] sm:$0xff]  ;;  %v4033_v53 = vrot.slane %v3988_v30, 4 }
 0xd38   : > { %v4145_v4 = vld [vmem:[%s6864_s9 + $0x78] sm:$0xff]  ;;  %v4039_v5 = vrot.slane %v3989_v40, 4  ;;  %v4076_v7 = vld [vmem:[#allocation11 + $0x50] sm:$0xff]  ;;  %v4004_v50 = vadd.f32 %v4003_v12, %v6620_v33  ;;  %v4045_v49 = vrot.slane %v3990_v19, 4  ;;  %v4143_v29 = vld [vmem:[%s6864_s9 + $0x68] sm:$0xff]  ;;  %v4010_v15 = vadd.f32 %v4009_v10, %v6626_v0 }
 0xd39   : > { %4110 = vmatpush.msra.mxu0 %v4080_v55  ;;  %4150 = vmatpush.msra.mxu1 %v4145_v4  ;;  %v4016_v22 = vadd.f32 %v4015_v14, %v6632_v24  ;;  %v4022_v48 = vadd.f32 %v4021_v23, %v6642_v3  ;;  %v4075_v1 = vld [vmem:[#allocation11 + $0x48] sm:$0xff]  ;;  %v4028_v39 = vadd.f32 %v4027_v36, %v6648_v38  ;;  %v4142_v33 = vld [vmem:[%s6864_s9 + $0x60] sm:$0xff]  ;;  %v4141_v0 = vld [vmem:[%s6864_s9 + $0x58] sm:$0xff]  ;;  %v5228_v57 = vmov 8.0  }
 0xd3a   : > { %v4034_v51 = vadd.f32 %v4033_v53, %v3988_v30  ;;  %v4040_v59 = vadd.f32 %v4039_v5, %v3989_v40  ;;  %v4074_v46 = vld [vmem:[#allocation11 + $0x40] sm:$0xff]  ;;  %v4005_v56 = vrot.slane %v4004_v50, 2  ;;  %v4046_v8 = vadd.f32 %v4045_v49, %v3990_v19  ;;  %v4073_v61 = vld [vmem:[#allocation11 + $0x38] sm:$0xff]  ;;  %v4140_v38 = vld [vmem:[%s6864_s9 + $0x50] sm:$0xff] }
 0xd3b   : > { %4111 = vmatpush.msra.mxu0 %v4079_v43  ;;  %4151 = vmatpush.msra.mxu1 %v4144_v18  ;;  %v4011_v24 = vrot.slane %v4010_v15, 2  ;;  %v4017_v3 = vrot.slane %v4016_v22, 2  ;;  %v4023_v9 = vrot.slane %v4022_v48, 2  ;;  %4957 = vrcp.f32 %v5228_v57  ;;  %v4072_v6 = vld [vmem:[#allocation11 + $0x30] sm:$0xff]  ;;  %v4139_v2 = vld [vmem:[%s6864_s9 + $0x48] sm:$0xff]  ;;  %v4138_v26 = vld [vmem:[%s6864_s9 + $0x40] sm:$0xff] }
 0xd3c   : > { %v4029_v27 = vrot.slane %v4028_v39, 2  ;;  %v4035_v16 = vrot.slane %v4034_v51, 2  ;;  %v4041_v62 = vrot.slane %v4040_v59, 2  ;;  %v4006_v13 = vadd.f32 %v4005_v56, %v4004_v50  ;;  %v4071_v37 = vld [vmem:[#allocation11 + $0x28] sm:$0xff]  ;;  %v4070_v35 = vld [vmem:[#allocation11 + $0x20] sm:$0xff]  ;;  %v4137_v20 = vld [vmem:[%s6864_s9 + $0x38] sm:$0xff] }
 0xd3d   : > { %4112 = vmatpush.msra.mxu0 %v4078_v47  ;;  %4152 = vmatpush.msra.mxu1 %v4143_v29  ;;  %v4047_v21 = vrot.slane %v4046_v8, 2  ;;  %v4012_v11 = vadd.f32 %v4011_v24, %v4010_v15  ;;  %v4018_v31 = vadd.f32 %v4017_v3, %v4016_v22  ;;  %v4024_v30 = vadd.f32 %v4023_v9, %v4022_v48  ;;  %v4069_v41 = vld [vmem:[#allocation11 + $0x18] sm:$0xff]  ;;  %v4136_v19 = vld [vmem:[%s6864_s9 + $0x30] sm:$0xff]  ;;  %v4135_v14 = vld [vmem:[%s6864_s9 + $0x28] sm:$0xff] }
 0xd3e   : > { %v4030_v60 = vadd.f32 %v4029_v27, %v4028_v39  ;;  %v4036_v52 = vadd.f32 %v4035_v16, %v4034_v51  ;;  %v4042_v17 = vadd.f32 %v4041_v62, %v4040_v59  ;;  %v4007_v40 = vrot.slane %v4006_v13, 1  ;;  %v4068_v43 = vld [vmem:[#allocation11 + $0x10] sm:$0xff]  ;;  %v4067_v4 = vld [vmem:[#allocation11 + $0x8] sm:$0xff]  ;;  %v4134_v50 = vld [vmem:[%s6864_s9 + $0x20] sm:$0xff] }
 0xd3f   : > { %4113 = vmatpush.msra.mxu0 %v4077_v58  ;;  %4153 = vmatpush.msra.mxu1 %v4142_v33  ;;  %v4048_v42 = vadd.f32 %v4047_v21, %v4046_v8  ;;  %v4013_v25 = vrot.slane %v4012_v11, 1  ;;  %v4019_v44 = vrot.slane %v4018_v31, 1  ;;  %v4025_v45 = vrot.slane %v4024_v30, 1  ;;  %v4066_v49 = vld [vmem:[#allocation11] sm:$0xff]  ;;  %v4133_v33 = vld [vmem:[%s6864_s9 + $0x18] sm:$0xff]  ;;  %v4132_v27 = vld [vmem:[%s6864_s9 + $0x10] sm:$0xff] }
 0xd40   : > { %v4031_v32 = vrot.slane %v4030_v60, 1  ;;  %v4037_v54 = vrot.slane %v4036_v52, 1  ;;  %v4043_v55 = vrot.slane %v4042_v17, 1  ;;  %v4008_v47 = vadd.f32 %v4007_v40, %v4006_v13  ;;  %v4130_v16 = vld [vmem:[%s6864_s9] sm:$0xff] }
 0xd41   : > { %4114 = vmatpush.msra.mxu0 %v4076_v7  ;;  %4154 = vmatpush.msra.mxu1 %v4141_v0  ;;  %v4958_v34 = vpop.eup %4957  ;;  %v4049_v12 = vrot.slane %v4048_v42, 1  ;;  %v4014_v23 = vadd.f32 %v4013_v25, %v4012_v11  ;;  %v4020_v58 = vadd.f32 %v4019_v44, %v4018_v31  ;;  %v4026_v36 = vadd.f32 %v4025_v45, %v4024_v30  ;;  %v4955_v62 = vld [vmem:[%s6865_s10] ss:$0 sm:$0xff] }
 0xd42   : > { %v4052_v63 = vmul.f32 8.0, %v4958_v34  ;;  %vm4056_vm5 = vweird.f32 %v4958_v34  ;;  %v4032_v18 = vadd.f32 %v4031_v32, %v4030_v60  ;;  %v4038_v5 = vadd.f32 %v4037_v54, %v4036_v52 }
 0xd43   : > { %4115 = vmatpush.msra.mxu0 %v4075_v1  ;;  %4155 = vmatpush.msra.mxu1 %v4140_v38  ;;  %v4044_v7 = vadd.f32 %v4043_v55, %v4042_v17  ;;  %v4050_v29 = vadd.f32 %v4049_v12, %v4048_v42  ;;  %vm4094_vm6 = vcmask 1041409   ;;  %vm4096_vm7 = vcmask 1042434   ;;  %v4131_v38 = vld [vmem:[%s6864_s9 + $0x8] sm:$0xff] }
 0xd44   : > { %v4053_v28 = vsub.f32 1.0, %v4052_v63  ;;  %vm4098_vm8 = vcmask 1043459   ;;  %vm4100_vm9 = vcmask 1044484   ;;  %vm4102_vm10 = vcmask 1045509  }
 0xd45   : > { %4116 = vmatpush.msra.mxu0 %v4074_v46  ;;  %4156 = vmatpush.msra.mxu1 %v4139_v2  ;;  %vm4104_vm11 = vcmask 1046534   ;;  %vm4106_vm12 = vcmask 1047559   ;;  %v4956_v2 = vld [vmem:[%s6866_s29] ss:$0 sm:$0xff]  ;;  %vm4170_vm13 = vcmask 15360  }
 0xd46   : > { %v4054_v10 = vmul.f32 %v4958_v34, %v4053_v28 }
 0xd47   : > { %4117 = vmatpush.msra.mxu0 %v4073_v61  ;;  %4157 = vmatpush.msra.mxu1 %v4138_v26 }
 0xd48   : > { %v4055_v53 = vadd.f32 %v4958_v34, %v4054_v10 }
 0xd49   : > { %4118 = vmatpush.msra.mxu0 %v4072_v6  ;;  %4158 = vmatpush.msra.mxu1 %v4137_v20 }
 0xd4a   : > { %v4057_v15 = vsel %vm4056_vm5, %v4958_v34, %v4055_v53 }
 0xd4b   : > { %4119 = vmatpush.msra.mxu0 %v4071_v37  ;;  %4159 = vmatpush.msra.mxu1 %v4136_v19  ;;  %v4058_v22 = vmul.f32 %v4057_v15, %v4008_v47  ;;  %v4059_v48 = vmul.f32 %v4057_v15, %v4014_v23  ;;  %v4060_v1 = vmul.f32 %v4057_v15, %v4020_v58 }
 0xd4c   : > { %v4061_v39 = vmul.f32 %v4057_v15, %v4026_v36  ;;  %v4062_v51 = vmul.f32 %v4057_v15, %v4032_v18  ;;  %v4063_v59 = vmul.f32 %v4057_v15, %v4038_v5  ;;  %v4064_v56 = vmul.f32 %v4057_v15, %v4044_v7 }
 0xd4d   : > { %4120 = vmatpush.msra.mxu0 %v4070_v35  ;;  %4160 = vmatpush.msra.mxu1 %v4135_v14  ;;  %v4095_v46 = vsel %vm4094_vm6, %v4059_v48, %v4058_v22  ;;  %v4065_v0 = vmul.f32 %v4057_v15, %v4050_v29 }
 0xd4e   : > { %v4097_v8 = vsel %vm4096_vm7, %v4060_v1, %v4095_v46 }
 0xd4f   : > { %4121 = vmatpush.msra.mxu0 %v4069_v41  ;;  %4161 = vmatpush.msra.mxu1 %v4134_v50  ;;  %v4099_v24 = vsel %vm4098_vm8, %v4061_v39, %v4097_v8 }
 0xd50   : > { %v4101_v3 = vsel %vm4100_vm9, %v4062_v51, %v4099_v24 }
 0xd51   : > { %4122 = vmatpush.msra.mxu0 %v4068_v43  ;;  %4162 = vmatpush.msra.mxu1 %v4133_v33  ;;  %v4103_v9 = vsel %vm4102_vm10, %v4063_v59, %v4101_v3 }
 0xd52   : > { %v4105_v57 = vsel %vm4104_vm11, %v4064_v56, %v4103_v9 }
 0xd53   : > { %4123 = vmatpush.msra.mxu0 %v4067_v4  ;;  %v4107_v61 = vsel %vm4106_vm12, %v4065_v0, %v4105_v57  ;;  %4163 = vmatpush.msra.mxu1 %v4132_v27 }
 0xd55   : > { %4124 = vmatpush.msra.mxu0 %v4066_v49  ;;  %4164 = vmatpush.msra.mxu1 %v4131_v38 }
 0xd56   : > { %4125 = vmatmul.f32.vlgmr.msra.gmra.mxu0 %v4107_v61 }
 0xd57   : > { %4165 = vmatpush.msra.mxu1 %v4130_v16 }
 0xdd3   : > { %v4126_v6 = vpop.f32.mrf.mxu0 }
 0xdd4   : > { %v4127_v13 = vadd.f32 %v4955_v62, %v4126_v6 }
 0xdd6   : > { %v4129_v21 = vmax.f32 %v4127_v13, 0.0 }
 0xdd8   : > { %4166 = vmatmul.f32.vlgmr.msra.gmra.mxu1 %v4129_v21 }
 0xe55   : > { %v4167_v11 = vpop.f32.mrf.mxu1 }
 0xe56   : > { %v4168_v31 = vadd.f32 %v4956_v2, %v4167_v11 }
 0xe58   : > { %4171 = vst.msk [vmem:[%s5563_s26] sm:$0xff] %vm4170_vm13, %v4168_v31 }
 0xe59 PF: > { %s6867_s14 = sld [smem:[#allocation21_spill]] }
 0xe5a   : > { %s6868_s27 = sld [smem:[#allocation17_spill]] }
 0xe5b   : > { %s6869_s28 = sld [smem:[#allocation18_spill]] }
 0xe5c   : > { %s6870_s29 = sld [smem:[#allocation24_spill]] }
 0xe5d   : > { %s6871_s30 = sld [smem:[#allocation19_spill]] }
 0xe5e   : > { %s6872_s0 = sld [smem:[#allocation20_spill]] }
 0xe5f   : > { %s38_s20 = sadd.s32 1, %s6867_s14   ;;  %s6873_s19 = sld [smem:[#allocation22_spill]] }
 0xe60   : > { %p35_p7 = scmp.ge.s32.totalorder %s38_s20, 6   ;;  %s6874_s1 = sld [smem:[#allocation23_spill]] }
 0xe62   :  { %37 = sbr.rel (!%p35_p7) target bundleno = 30 (0x1e), region = 219 }
 0xe67   :  { %4191 = vsyncpa [#allocation4], 1 }
 0xe68   :  { %4193 = vsyncpa [#allocation4 + $0x1], 1 }
 0xe69   :  { %4194 = vsyncpa [#allocation6], 1 }
 0xe6a   :  { %4196 = vsyncpa [#allocation6 + $0x1], 1 }
 0xe6b   :  { %4197 = vsyncpa [#allocation9], 1 }
 0xe6c   :  { %4199 = vsyncpa [#allocation9 + $0x1], 1 }
 0xe6d   :  { %4200 = vsyncpa [#allocation12], 1 }

</bundles_post_ra>
